<compile_context>
chip_gen: v7x
topology: tpu7x:2x2x1
jax: 0.10.0
libtpu: 0.0.40
codegen_flags: <defaults>
</compile_context>

<pallas_src>
import functools

import jax
import jax.numpy as jnp
from jax.experimental import pallas as pl
from jax.experimental.pallas import tpu as pltpu

_LANE = 128


def _pick_block_rows(H):
    """Row-block size: 8-16 rows/step when H allows >=2 blocks, else whole image."""
    for tr in (16, 8, 4, 2):
        if H % tr == 0 and H // tr >= 2:
            return tr
    return H


def _residual_block_kernel(x_ref, w1_ref, b1_ref, w2_ref, b2_ref, out_ref, s_ref,
                           *, H, W, Cp, TR, compute_dtype):
    """One (batch, row-block) per grid step.

    x_ref  : (1, H+4, W, Cp)   input, zero-padded by 2 rows top/bottom (halo)
    w*_ref : (3, 3*Cp, Cp)     conv weights, rows per dy ordered [dx0|dx1|dx2] x Cin
    b*_ref : (1, Cp)           f32 bias
    out_ref: (1, TR, W, Cp)    this block's output rows
    s_ref  : (TR+4, W, 3*Cp)   VMEM scratch holding the dx-concat band (reused)
    """
    TR2 = TR + 2                      # h1 band rows (1-row halo for conv2)
    TR4 = TR + 4                      # x  band rows (2-row halo for conv1)
    row0 = pl.multiple_of(pl.program_id(1) * TR, TR)   # first output row (abs)

    w1 = w1_ref[...]                  # hoisted, already compute_dtype
    w2 = w2_ref[...]
    b1 = b1_ref[...]                  # (1, Cp) f32
    b2 = b2_ref[...]

    # Input band for this row block: padded rows row0 .. row0+TR4 (always in range).
    xb = x_ref[0, pl.ds(row0, TR4), :, :]               # (TR4, W, Cp)

    def dx_cat(t):
        """(rows, W, Cp) -> (rows, W, 3*Cp): [x[w-1] | x[w] | x[w+1]] with zero fill."""
        rows = t.shape[0]
        z = jnp.zeros((rows, 1, Cp), t.dtype)
        left = jnp.concatenate([z, t[:, :W - 1, :]], axis=1)
        right = jnp.concatenate([t[:, 1:, :], z], axis=1)
        return jnp.concatenate([left, t, right], axis=-1)

    def band_dots(n_rows, w, init):
        """init + sum_dy  (scratch[dy:dy+n_rows] as (n_rows*W, 3Cp)) @ w[dy]."""
        m = n_rows * W
        dots = [
            jnp.dot(s_ref[pl.ds(dy, n_rows)].reshape(m, 3 * Cp), w[dy],
                    preferred_element_type=jnp.float32)
            for dy in range(3)
        ]
        # single summed chain (bias/residual as init) -> MXU-friendly accumulation
        return init + (dots[0] + dots[1] + dots[2])

    # ---- conv1 over the haloed band -> h1 at abs rows [row0-1, row0+TR+1)
    s_ref[...] = dx_cat(xb.astype(compute_dtype))       # one scratch write, no dy copies
    h1 = jnp.maximum(band_dots(TR2, w1, b1), 0.0)       # (TR2*W, Cp) f32 (bias fused)
    h1 = h1.reshape(TR2, W, Cp)

    # Zero h1 halo rows outside the image (= conv2's zero padding along H).
    abs_row = jax.lax.broadcasted_iota(jnp.int32, (TR2, W, Cp), 0) + (row0 - 1)
    h1 = jnp.where((abs_row >= 0) & (abs_row < H), h1, 0.0)

    # ---- conv2 + bias + residual + relu -> TR output rows (scratch reused)
    s_ref[pl.ds(0, TR2)] = dx_cat(h1.astype(compute_dtype))
    residual = xb[2:2 + TR].astype(jnp.float32).reshape(TR * W, Cp)
    y = band_dots(TR, w2, residual + b2)                 # residual+bias fused into init
    out_ref[0] = jnp.maximum(y, 0.0).reshape(TR, W, Cp).astype(out_ref.dtype)


def residual_block_nhwc(x_nhwc, w1, b1, w2, b2, *, compute_dtype=jnp.float32,
                        block_rows=None):
    """NHWC entry point (preferred: no layout transposes around the kernel).

    x_nhwc: (B, H, W, C).  w*: (3, 3, C, C) HWIO.  b*: (C,).
    compute_dtype=jnp.bfloat16 is recommended on v6e/v7x (f32 accumulation).
    """
    B, H, W, C = x_nhwc.shape
    assert W % 8 == 0, "W must be a multiple of 8 (sublane granularity)"
    Cp = ((C + _LANE - 1) // _LANE) * _LANE              # lane-dense channel count
    TR = block_rows if block_rows is not None else _pick_block_rows(H)
    assert H % TR == 0, "block_rows must divide H"

    # Host-side prep (layout plumbing, done once):
    #  - pad channels to a 128 multiple (lane-dense stores, full MXU N/K)
    #  - pad H by 2 zero rows each side (2-row halo -> no in-kernel clamping)
    #  - fuse dx taps into the contraction dim: (3, 3*Cp, Cp)
    #  - pre-cast weights to compute_dtype (halves weight DMA for bf16)
    xp = jnp.pad(x_nhwc, ((0, 0), (2, 2), (0, 0), (0, Cp - C)))

    def prep_w(w):
        wp = jnp.pad(w, ((0, 0), (0, 0), (0, Cp - C), (0, Cp - C)))
        return wp.reshape(3, 3 * Cp, Cp).astype(compute_dtype)

    def prep_b(b):
        return jnp.pad(b, (0, Cp - C)).reshape(1, Cp).astype(jnp.float32)

    kernel = functools.partial(_residual_block_kernel, H=H, W=W, Cp=Cp, TR=TR,
                               compute_dtype=compute_dtype)

    # Explicit scoped-VMEM budget: 2x in/out blocks + weights + scratch + headroom.
    ct = jnp.dtype(compute_dtype).itemsize
    xi = jnp.dtype(x_nhwc.dtype).itemsize
    est = (2 * (H + 4) * W * Cp * xi
           + 2 * TR * W * Cp * xi
           + 2 * (2 * 3 * 3 * Cp * Cp * ct + 2 * Cp * 4)
           + (TR + 4) * W * 3 * Cp * ct
           + 8 * (TR + 4) * W * Cp * 4)
    vmem_limit = int(min(max(2 * est, 32 << 20), 64 << 20))   # 64 MiB cap (v7x-safe)

    out = pl.pallas_call(
        kernel,
        out_shape=jax.ShapeDtypeStruct((B, H, W, Cp), x_nhwc.dtype),
        grid_spec=pltpu.PrefetchScalarGridSpec(
            num_scalar_prefetch=0,
            grid=(B, H // TR),
            in_specs=[
                # Full padded image per batch element; block index constant over
                # the row axis so it is fetched once per image.
                pl.BlockSpec((1, H + 4, W, Cp), lambda b, r: (b, 0, 0, 0)),
                pl.BlockSpec((3, 3 * Cp, Cp), lambda b, r: (0, 0, 0)),
                pl.BlockSpec((1, Cp), lambda b, r: (0, 0)),
                pl.BlockSpec((3, 3 * Cp, Cp), lambda b, r: (0, 0, 0)),
                pl.BlockSpec((1, Cp), lambda b, r: (0, 0)),
            ],
            out_specs=pl.BlockSpec((1, TR, W, Cp), lambda b, r: (b, r, 0, 0)),
            scratch_shapes=[pltpu.VMEM((TR + 4, W, 3 * Cp), compute_dtype)],
        ),
        compiler_params=pltpu.CompilerParams(
            dimension_semantics=("parallel", "parallel"),
            vmem_limit_bytes=vmem_limit),
    )(xp, prep_w(w1), prep_b(b1), prep_w(w2), prep_b(b2))

    return out[..., :C] if Cp != C else out


def residual_block(x_nchw, b_w1, b_b1, b_w2, b_b2, *, compute_dtype=jnp.float32,
                   block_rows=None):
    """PyTorch-layout wrapper: (B, C, H, W) in/out.

    In a full network keep activations NHWC and call residual_block_nhwc()
    directly to avoid the two HBM transpose passes below.
    """
    x = jnp.transpose(x_nchw, (0, 2, 3, 1))
    y = residual_block_nhwc(x, b_w1, b_b1, b_w2, b_b2,
                            compute_dtype=compute_dtype, block_rows=block_rows)
    return jnp.transpose(y, (0, 3, 1, 2))


def _reference(x_nchw, w1, b1, w2, b2):
    """Pure-JAX reference (lax conv) for the correctness check."""
    x = jnp.transpose(x_nchw, (0, 2, 3, 1))
    dn = jax.lax.conv_dimension_numbers(x.shape, w1.shape, ('NHWC', 'HWIO', 'NHWC'))
    h = jax.lax.conv_general_dilated(x, w1, (1, 1), 'SAME', dimension_numbers=dn) + b1
    h = jnp.maximum(h, 0.0)
    y = jax.lax.conv_general_dilated(h, w2, (1, 1), 'SAME', dimension_numbers=dn) + b2
    y = jnp.maximum(y + x, 0.0)
    return jnp.transpose(y, (0, 3, 1, 2))


if __name__ == "__main__":
    B, C, H, W = 2, 4, 16, 16
    key = jax.random.PRNGKey(0)
    kx, kw1, kb1, kw2, kb2 = jax.random.split(key, 5)

    x = jax.random.normal(kx, (B, C, H, W), dtype=jnp.float32)
    # Conv2d(C, C, 3, 1, 1) parameters, stored as (kh, kw, Cin, Cout) HWIO.
    w1 = jax.random.normal(kw1, (3, 3, C, C), dtype=jnp.float32) * 0.1
    b1 = jax.random.normal(kb1, (C,), dtype=jnp.float32) * 0.1
    w2 = jax.random.normal(kw2, (3, 3, C, C), dtype=jnp.float32) * 0.1
    b2 = jax.random.normal(kb2, (C,), dtype=jnp.float32) * 0.1

    ref = jax.block_until_ready(_reference(x, w1, b1, w2, b2))

    # f32 compute path (tight tolerance).
    out = jax.block_until_ready(residual_block(x, w1, b1, w2, b2))
    assert out.shape == (B, C, H, W)
    assert jnp.max(jnp.abs(out - ref)) < 1e-4

    # bf16 MXU path (recommended default on v6e/v7x): f32 accumulation keeps the
    # error at bf16-quantization level, so check against a bf16-aware tolerance.
    out_bf16 = jax.block_until_ready(
        residual_block(x, w1, b1, w2, b2, compute_dtype=jnp.bfloat16))
    assert jnp.max(jnp.abs(out_bf16 - ref)) < 1e-1

    print("KERNEL_OK")
</pallas_src>

<mosaic_0001>
module attributes {stable_mosaic.version = 11 : i64} {
  func.func @_residual_block_kernel(%arg0: i32, %arg1: i32, %arg2: memref<1x20x16x128xf32, #tpu.memory_space<vmem>>, %arg3: memref<3x384x128xf32, #tpu.memory_space<vmem>>, %arg4: memref<1x128xf32, #tpu.memory_space<vmem>>, %arg5: memref<3x384x128xf32, #tpu.memory_space<vmem>>, %arg6: memref<1x128xf32, #tpu.memory_space<vmem>>, %arg7: memref<1x8x16x128xf32, #tpu.memory_space<vmem>>, %arg8: memref<12x16x384xf32, #tpu.memory_space<vmem>>) attributes {dimension_semantics = [#tpu.dimension_semantics<parallel>, #tpu.dimension_semantics<parallel>], iteration_bounds = array<i64: 2, 2>, scalar_prefetch = 0 : i64, scratch_operands = 1 : i64, tpu.core_type = #tpu.core_type<tc>, window_params = [{transform_indices = @transform_0, window_bounds = array<i64: 1, 20, 16, 128>}, {pipeline_mode = #tpu.pipeline_mode<synchronous>, transform_indices = @transform_1, window_bounds = array<i64: 3, 384, 128>}, {pipeline_mode = #tpu.pipeline_mode<synchronous>, transform_indices = @transform_2, window_bounds = array<i64: 1, 128>}, {pipeline_mode = #tpu.pipeline_mode<synchronous>, transform_indices = @transform_3, window_bounds = array<i64: 3, 384, 128>}, {pipeline_mode = #tpu.pipeline_mode<synchronous>, transform_indices = @transform_4, window_bounds = array<i64: 1, 128>}, {transform_indices = @transform_5, window_bounds = array<i64: 1, 8, 16, 128>}]} {
    %c8_i32 = arith.constant 8 : i32
    %0 = arith.muli %arg1, %c8_i32 : i32
    %1 = tpu.assume_multiple %0, 8 : i32
    %c0 = arith.constant 0 : index
    %c0_0 = arith.constant 0 : index
    %c0_1 = arith.constant 0 : index
    %2 = vector.load %arg3[%c0, %c0_0, %c0_1] : memref<3x384x128xf32, #tpu.memory_space<vmem>>, vector<3x384x128xf32>
    %c0_2 = arith.constant 0 : index
    %c0_3 = arith.constant 0 : index
    %c0_4 = arith.constant 0 : index
    %3 = vector.load %arg5[%c0_2, %c0_3, %c0_4] : memref<3x384x128xf32, #tpu.memory_space<vmem>>, vector<3x384x128xf32>
    %c0_5 = arith.constant 0 : index
    %c0_6 = arith.constant 0 : index
    %4 = vector.load %arg4[%c0_5, %c0_6] : memref<1x128xf32, #tpu.memory_space<vmem>>, vector<1x128xf32>
    %c0_7 = arith.constant 0 : index
    %c0_8 = arith.constant 0 : index
    %5 = vector.load %arg6[%c0_7, %c0_8] : memref<1x128xf32, #tpu.memory_space<vmem>>, vector<1x128xf32>
    %c0_9 = arith.constant 0 : index
    %6 = arith.index_cast %1 : i32 to index
    %c0_10 = arith.constant 0 : index
    %c0_11 = arith.constant 0 : index
    %7 = vector.load %arg2[%c0_9, %6, %c0_10, %c0_11] : memref<1x20x16x128xf32, #tpu.memory_space<vmem>>, vector<1x12x16x128xf32>
    %8 = vector.shape_cast %7 : vector<1x12x16x128xf32> to vector<12x16x128xf32>
    %cst = arith.constant 0.000000e+00 : f32
    %9 = vector.broadcast %cst : f32 to vector<12x1x128xf32>
    %10 = vector.extract_strided_slice %8 {offsets = [0, 0, 0], sizes = [12, 15, 128], strides = [1, 1, 1]} : vector<12x16x128xf32> to vector<12x15x128xf32>
    %11 = tpu.concatenate %9, %10 in 1 : vector<12x1x128xf32>, vector<12x15x128xf32> -> vector<12x16x128xf32>
    %12 = vector.extract_strided_slice %8 {offsets = [0, 1, 0], sizes = [12, 15, 128], strides = [1, 1, 1]} : vector<12x16x128xf32> to vector<12x15x128xf32>
    %13 = tpu.concatenate %12, %9 in 1 : vector<12x15x128xf32>, vector<12x1x128xf32> -> vector<12x16x128xf32>
    %14 = tpu.concatenate %11, %8, %13 in 2 : vector<12x16x128xf32>, vector<12x16x128xf32>, vector<12x16x128xf32> -> vector<12x16x384xf32>
    %c0_12 = arith.constant 0 : index
    %c0_13 = arith.constant 0 : index
    %c0_14 = arith.constant 0 : index
    %15 = vector.load %arg8[%c0_12, %c0_13, %c0_14] : memref<12x16x384xf32, #tpu.memory_space<vmem>>, vector<12x16x384xf32>
    tpu.vector_store %arg8[%c0_12, %c0_13, %c0_14], %14 {strides = array<i32>} : memref<12x16x384xf32, #tpu.memory_space<vmem>>, vector<12x16x384xf32>,
    %c0_15 = arith.constant 0 : index
    %c0_16 = arith.constant 0 : index
    %c0_17 = arith.constant 0 : index
    %16 = vector.load %arg8[%c0_15, %c0_16, %c0_17] : memref<12x16x384xf32, #tpu.memory_space<vmem>>, vector<10x16x384xf32>
    %17 = vector.shape_cast %16 : vector<10x16x384xf32> to vector<160x384xf32>
    %18 = vector.extract_strided_slice %2 {offsets = [0, 0, 0], sizes = [1, 384, 128], strides = [1, 1, 1]} : vector<3x384x128xf32> to vector<1x384x128xf32>
    %19 = vector.shape_cast %18 : vector<1x384x128xf32> to vector<384x128xf32>
    %cst_18 = arith.constant dense<0.000000e+00> : vector<160x128xf32>
    %20 = tpu.matmul %17, %19, %cst_18 {dimension_numbers = #tpu.dot_dimension_numbers<[1], [0], [0], [1], [0, 0, 1, 1], [], []>} : vector<160x384xf32>, vector<384x128xf32>, vector<160x128xf32> -> vector<160x128xf32>
    %c1 = arith.constant 1 : index
    %c0_19 = arith.constant 0 : index
    %c0_20 = arith.constant 0 : index
    %21 = vector.load %arg8[%c1, %c0_19, %c0_20] : memref<12x16x384xf32, #tpu.memory_space<vmem>>, vector<10x16x384xf32>
    %22 = vector.shape_cast %21 : vector<10x16x384xf32> to vector<160x384xf32>
    %23 = vector.extract_strided_slice %2 {offsets = [1, 0, 0], sizes = [1, 384, 128], strides = [1, 1, 1]} : vector<3x384x128xf32> to vector<1x384x128xf32>
    %24 = vector.shape_cast %23 : vector<1x384x128xf32> to vector<384x128xf32>
    %cst_21 = arith.constant dense<0.000000e+00> : vector<160x128xf32>
    %25 = tpu.matmul %22, %24, %cst_21 {dimension_numbers = #tpu.dot_dimension_numbers<[1], [0], [0], [1], [0, 0, 1, 1], [], []>} : vector<160x384xf32>, vector<384x128xf32>, vector<160x128xf32> -> vector<160x128xf32>
    %c2 = arith.constant 2 : index
    %c0_22 = arith.constant 0 : index
    %c0_23 = arith.constant 0 : index
    %26 = vector.load %arg8[%c2, %c0_22, %c0_23] : memref<12x16x384xf32, #tpu.memory_space<vmem>>, vector<10x16x384xf32>
    %27 = vector.shape_cast %26 : vector<10x16x384xf32> to vector<160x384xf32>
    %28 = vector.extract_strided_slice %2 {offsets = [2, 0, 0], sizes = [1, 384, 128], strides = [1, 1, 1]} : vector<3x384x128xf32> to vector<1x384x128xf32>
    %29 = vector.shape_cast %28 : vector<1x384x128xf32> to vector<384x128xf32>
    %cst_24 = arith.constant dense<0.000000e+00> : vector<160x128xf32>
    %30 = tpu.matmul %27, %29, %cst_24 {dimension_numbers = #tpu.dot_dimension_numbers<[1], [0], [0], [1], [0, 0, 1, 1], [], []>} : vector<160x384xf32>, vector<384x128xf32>, vector<160x128xf32> -> vector<160x128xf32>
    %31 = arith.addf %20, %25 : vector<160x128xf32>
    %32 = arith.addf %31, %30 : vector<160x128xf32>
    %33 = vector.broadcast %4 : vector<1x128xf32> to vector<160x128xf32>
    %34 = arith.addf %33, %32 : vector<160x128xf32>
    %cst_25 = arith.constant 0.000000e+00 : f32
    %35 = vector.broadcast %cst_25 : f32 to vector<160x128xf32>
    %36 = arith.maximumf %34, %35 : vector<160x128xf32>
    %37 = vector.shape_cast %36 : vector<160x128xf32> to vector<10x16x128xf32>
    %38 = tpu.iota {dimensions = array<i32: 0>} : vector<10x16x128xi32>
    %c1_i32 = arith.constant 1 : i32
    %39 = arith.subi %1, %c1_i32 : i32
    %40 = vector.broadcast %39 : i32 to vector<10x16x128xi32>
    %41 = arith.addi %38, %40 : vector<10x16x128xi32>
    %c0_i32 = arith.constant 0 : i32
    %42 = vector.broadcast %c0_i32 : i32 to vector<10x16x128xi32>
    %43 = arith.cmpi sge, %41, %42 : vector<10x16x128xi32>
    %c16_i32 = arith.constant 16 : i32
    %44 = vector.broadcast %c16_i32 : i32 to vector<10x16x128xi32>
    %45 = arith.cmpi slt, %41, %44 : vector<10x16x128xi32>
    %46 = arith.andi %43, %45 : vector<10x16x128xi1>
    %cst_26 = arith.constant 0.000000e+00 : f32
    %47 = vector.broadcast %cst_26 : f32 to vector<10x16x128xf32>
    %48 = arith.select %46, %37, %47 : vector<10x16x128xi1>, vector<10x16x128xf32>
    %cst_27 = arith.constant 0.000000e+00 : f32
    %49 = vector.broadcast %cst_27 : f32 to vector<10x1x128xf32>
    %50 = vector.extract_strided_slice %48 {offsets = [0, 0, 0], sizes = [10, 15, 128], strides = [1, 1, 1]} : vector<10x16x128xf32> to vector<10x15x128xf32>
    %51 = tpu.concatenate %49, %50 in 1 : vector<10x1x128xf32>, vector<10x15x128xf32> -> vector<10x16x128xf32>
    %52 = vector.extract_strided_slice %48 {offsets = [0, 1, 0], sizes = [10, 15, 128], strides = [1, 1, 1]} : vector<10x16x128xf32> to vector<10x15x128xf32>
    %53 = tpu.concatenate %52, %49 in 1 : vector<10x15x128xf32>, vector<10x1x128xf32> -> vector<10x16x128xf32>
    %54 = tpu.concatenate %51, %48, %53 in 2 : vector<10x16x128xf32>, vector<10x16x128xf32>, vector<10x16x128xf32> -> vector<10x16x384xf32>
    %c0_28 = arith.constant 0 : index
    %c0_29 = arith.constant 0 : index
    %c0_30 = arith.constant 0 : index
    %55 = vector.load %arg8[%c0_28, %c0_29, %c0_30] : memref<12x16x384xf32, #tpu.memory_space<vmem>>, vector<10x16x384xf32>
    tpu.vector_store %arg8[%c0_28, %c0_29, %c0_30], %54 {strides = array<i32>} : memref<12x16x384xf32, #tpu.memory_space<vmem>>, vector<10x16x384xf32>,
    %56 = vector.extract_strided_slice %8 {offsets = [2, 0, 0], sizes = [8, 16, 128], strides = [1, 1, 1]} : vector<12x16x128xf32> to vector<8x16x128xf32>
    %57 = vector.shape_cast %56 : vector<8x16x128xf32> to vector<128x128xf32>
    %58 = vector.broadcast %5 : vector<1x128xf32> to vector<128x128xf32>
    %59 = arith.addf %57, %58 : vector<128x128xf32>
    %c0_31 = arith.constant 0 : index
    %c0_32 = arith.constant 0 : index
    %c0_33 = arith.constant 0 : index
    %60 = vector.load %arg8[%c0_31, %c0_32, %c0_33] : memref<12x16x384xf32, #tpu.memory_space<vmem>>, vector<8x16x384xf32>
    %61 = vector.shape_cast %60 : vector<8x16x384xf32> to vector<128x384xf32>
    %62 = vector.extract_strided_slice %3 {offsets = [0, 0, 0], sizes = [1, 384, 128], strides = [1, 1, 1]} : vector<3x384x128xf32> to vector<1x384x128xf32>
    %63 = vector.shape_cast %62 : vector<1x384x128xf32> to vector<384x128xf32>
    %cst_34 = arith.constant dense<0.000000e+00> : vector<128x128xf32>
    %64 = tpu.matmul %61, %63, %cst_34 {dimension_numbers = #tpu.dot_dimension_numbers<[1], [0], [0], [1], [0, 0, 1, 1], [], []>} : vector<128x384xf32>, vector<384x128xf32>, vector<128x128xf32> -> vector<128x128xf32>
    %c1_35 = arith.constant 1 : index
    %c0_36 = arith.constant 0 : index
    %c0_37 = arith.constant 0 : index
    %65 = vector.load %arg8[%c1_35, %c0_36, %c0_37] : memref<12x16x384xf32, #tpu.memory_space<vmem>>, vector<8x16x384xf32>
    %66 = vector.shape_cast %65 : vector<8x16x384xf32> to vector<128x384xf32>
    %67 = vector.extract_strided_slice %3 {offsets = [1, 0, 0], sizes = [1, 384, 128], strides = [1, 1, 1]} : vector<3x384x128xf32> to vector<1x384x128xf32>
    %68 = vector.shape_cast %67 : vector<1x384x128xf32> to vector<384x128xf32>
    %cst_38 = arith.constant dense<0.000000e+00> : vector<128x128xf32>
    %69 = tpu.matmul %66, %68, %cst_38 {dimension_numbers = #tpu.dot_dimension_numbers<[1], [0], [0], [1], [0, 0, 1, 1], [], []>} : vector<128x384xf32>, vector<384x128xf32>, vector<128x128xf32> -> vector<128x128xf32>
    %c2_39 = arith.constant 2 : index
    %c0_40 = arith.constant 0 : index
    %c0_41 = arith.constant 0 : index
    %70 = vector.load %arg8[%c2_39, %c0_40, %c0_41] : memref<12x16x384xf32, #tpu.memory_space<vmem>>, vector<8x16x384xf32>
    %71 = vector.shape_cast %70 : vector<8x16x384xf32> to vector<128x384xf32>
    %72 = vector.extract_strided_slice %3 {offsets = [2, 0, 0], sizes = [1, 384, 128], strides = [1, 1, 1]} : vector<3x384x128xf32> to vector<1x384x128xf32>
    %73 = vector.shape_cast %72 : vector<1x384x128xf32> to vector<384x128xf32>
    %cst_42 = arith.constant dense<0.000000e+00> : vector<128x128xf32>
    %74 = tpu.matmul %71, %73, %cst_42 {dimension_numbers = #tpu.dot_dimension_numbers<[1], [0], [0], [1], [0, 0, 1, 1], [], []>} : vector<128x384xf32>, vector<384x128xf32>, vector<128x128xf32> -> vector<128x128xf32>
    %75 = arith.addf %64, %69 : vector<128x128xf32>
    %76 = arith.addf %75, %74 : vector<128x128xf32>
    %77 = arith.addf %59, %76 : vector<128x128xf32>
    %cst_43 = arith.constant 0.000000e+00 : f32
    %78 = vector.broadcast %cst_43 : f32 to vector<128x128xf32>
    %79 = arith.maximumf %77, %78 : vector<128x128xf32>
    %80 = vector.shape_cast %79 : vector<128x128xf32> to vector<8x16x128xf32>
    %c0_44 = arith.constant 0 : index
    %c0_45 = arith.constant 0 : index
    %c0_46 = arith.constant 0 : index
    %c0_47 = arith.constant 0 : index
    %81 = vector.load %arg7[%c0_44, %c0_45, %c0_46, %c0_47] : memref<1x8x16x128xf32, #tpu.memory_space<vmem>>, vector<1x8x16x128xf32>
    %82 = vector.shape_cast %81 : vector<1x8x16x128xf32> to vector<8x16x128xf32>
    %83 = vector.shape_cast %80 : vector<8x16x128xf32> to vector<1x8x16x128xf32>
    tpu.vector_store %arg7[%c0_44, %c0_45, %c0_46, %c0_47], %83 {strides = array<i32>} : memref<1x8x16x128xf32, #tpu.memory_space<vmem>>, vector<1x8x16x128xf32>,
    return
  }
  func.func @transform_0(%arg0: i32, %arg1: i32) -> (i32, i32, i32, i32) {
    %c0_i32 = arith.constant 0 : i32
    %c0_i32_0 = arith.constant 0 : i32
    %c0_i32_1 = arith.constant 0 : i32
    %c0_i32_2 = arith.constant 0 : i32
    return %arg0, %c0_i32, %c0_i32_0, %c0_i32_1 : i32, i32, i32, i32
  }
  func.func @transform_1(%arg0: i32, %arg1: i32) -> (i32, i32, i32) {
    %c0_i32 = arith.constant 0 : i32
    %c0_i32_0 = arith.constant 0 : i32
    %c0_i32_1 = arith.constant 0 : i32
    %c0_i32_2 = arith.constant 0 : i32
    return %c0_i32, %c0_i32_0, %c0_i32_1 : i32, i32, i32
  }
  func.func @transform_2(%arg0: i32, %arg1: i32) -> (i32, i32) {
    %c0_i32 = arith.constant 0 : i32
    %c0_i32_0 = arith.constant 0 : i32
    %c0_i32_1 = arith.constant 0 : i32
    return %c0_i32, %c0_i32_0 : i32, i32
  }
  func.func @transform_3(%arg0: i32, %arg1: i32) -> (i32, i32, i32) {
    %c0_i32 = arith.constant 0 : i32
    %c0_i32_0 = arith.constant 0 : i32
    %c0_i32_1 = arith.constant 0 : i32
    %c0_i32_2 = arith.constant 0 : i32
    return %c0_i32, %c0_i32_0, %c0_i32_1 : i32, i32, i32
  }
  func.func @transform_4(%arg0: i32, %arg1: i32) -> (i32, i32) {
    %c0_i32 = arith.constant 0 : i32
    %c0_i32_0 = arith.constant 0 : i32
    %c0_i32_1 = arith.constant 0 : i32
    return %c0_i32, %c0_i32_0 : i32, i32
  }
  func.func @transform_5(%arg0: i32, %arg1: i32) -> (i32, i32, i32, i32) {
    %c0_i32 = arith.constant 0 : i32
    %c0_i32_0 = arith.constant 0 : i32
    %c0_i32_1 = arith.constant 0 : i32
    return %arg0, %arg1, %c0_i32, %c0_i32_0 : i32, i32, i32, i32
  }
}

</mosaic_0001>

<bundles_post_ra>
// kernel: tpu_custom_call.1
= control target key start
LH: loop header
LB: loop body
LE: loop exit
PB: predicated region body
PF: predicated region fallthrough
CT: control target
= control target key end

     0   :  { %s7422_s0 = inlined_call_operand.hbm [shape: f32[2,20,16,128], index: 0, kind: input, shape index: {}]   ;;  %s7423_s1 = inlined_call_operand.hbm [shape: f32[3,384,128], index: 1, kind: input, shape index: {}]   ;;  %s7424_s2 = inlined_call_operand.vmem [shape: f32[1,128], index: 2, kind: input, shape index: {}]   ;;  %s7425_s3 = inlined_call_operand.hbm [shape: f32[3,384,128], index: 3, kind: input, shape index: {}]   ;;  %s7426_s4 = inlined_call_operand.vmem [shape: f32[1,128], index: 4, kind: input, shape index: {}]   ;;  %s7427_s5 = inlined_call_operand.hbm [shape: f32[2,16,16,128], index: 5, kind: output, shape index: {}]  }
   0x1   :  { %7495 = sst [smem:[#allocation45_spill]] %s7423_s1 }
   0x2   :  { %7496 = sst [smem:[#allocation46_spill]] %s7425_s3 }
   0x3   :  { %7497 = sst [smem:[#allocation47_spill]] %s7427_s5 }
   0x4   :  { %10 = vsyncpa [#allocation4], 0 }
   0x5   :  { %12 = vsyncpa [#allocation4 + $0x1], 0 }
   0x6   :  { %13 = vsyncpa [#allocation7], 0 }
   0x7   :  { %14 = vsyncpa [#allocation5], 0 }
   0x8   :  { %16 = vsyncpa [#allocation5 + $0x1], 0  ;;  %s5518_s18 = smov 0   ;;  %s5520_s19 = smov 0  }
   0x9   :  { %s5522_s20 = smov 0   ;;  %s5524_s21 = smov 0  }
   0xa   :  { %s5526_s22 = smov 0   ;;  %s5528_s23 = smov 0  }
   0xb   :  { %s5530_s24 = smov 0   ;;  %s5532_s25 = smov 0  }
   0xc   :  { %s5534_s26 = smov 0   ;;  %s5536_s27 = smov 0  }
   0xd   :  { %s5538_s28 = smov 0  }
   0xe LB: > { %7498 = sst [smem:[#allocation13_spill]] %s5437_s18  ;;  %s3570_s29 = sadd.s32 4294967295, %s5477_s28   ;;  %s5477_s28 = sphi %s5538_s28, %s22_s28   ;;  %s5473_s27 = sphi %s5536_s27, %s7636_s27   ;;  %s5469_s26 = sphi %s5534_s26, %s7627_s26   ;;  %s5465_s25 = sphi %s5532_s25, %s7635_s25   ;;  %s5461_s24 = sphi %s5530_s24, %s7634_s24   ;;  %s5457_s23 = sphi %s5528_s23, %s7633_s23   ;;  %s5453_s22 = sphi %s5526_s22, %s7632_s22   ;;  %s5449_s21 = sphi %s5524_s21, %s7631_s21   ;;  %s5445_s20 = sphi %s5522_s20, %s7630_s20   ;;  %s5441_s19 = sphi %s5520_s19, %s7629_s19   ;;  %s5437_s18 = sphi %s5518_s18, %s7628_s18  }
   0xf   : > { %7499 = sst [smem:[#allocation14_spill]] %s5469_s26  ;;  %s3571_s30 = sadd.s32 4294967294, %s5477_s28  }
  0x10   : > { %p54_p0 = scmp.ne.s32.totalorder %s5453_s22, %s5449_s21  ;;  %p5574_p1 = scmp.eq.s32.totalorder %s3570_s29, 0 }
  0x11   : > { %p163_p2 = scmp.ne.s32.totalorder %s5445_s20, %s5441_s19  ;;  %p164_p4 = scmp.eq.s32.totalorder %s3570_s29, 3 }
  0x12   : > { %s7500_s6 = scalar_select %p5574_p1, 1, 0 }
  0x13   : > { %p5583_p3 = por %p5574_p1, %p54_p0  ;;  %p169_p5 = scmp.ne.s32.totalorder %s5441_s19, %s5437_s18 }
  0x14   : > { %p170_p6 = scmp.eq.s32.totalorder %s3571_s30, 3  ;;  %p5589_p7 = por %p164_p4, %p163_p2 }
  0x15   : > { %s7501_s8 = scalar_select %p5583_p3, 1, 0 }
  0x16   : > { %s7502_s9 = scalar_select %p5589_p7, 1, 0 }
  0x17   : > { %p3572_p8 = scmp.ge.s32.totalorder %s5477_s28, 1  ;;  %p5594_p9 = por %p170_p6, %p169_p5 }
  0x18   : > { %7503 = sst [smem:[#allocation15_spill]] %s7502_s9  ;;  %p177_p10 = scmp.lt.s32.totalorder %s5477_s28, 5 }
  0x19   : > { %s7504_s10 = scalar_select %p5594_p9, 1, 0 }
  0x1a   : > { %p5599_p11 = pnand %p3572_p8, %p177_p10  ;;  %s5479_s12 = smov [#allocation6]  }
  0x1b   : > { %7505 = sst [smem:[#allocation16_spill]] %s7504_s10  ;;  %s189_s13 = sshll.u32 %s5479_s12, 4  ;;  %s190_s13 = int_to_ptr.vmem [resolvable:$true] %s189_s13 }
  0x1c   : > { %s7506_s11 = scalar_select %p5599_p11, 1, 0 }
  0x1d   : > { %p5130_p12 = pneg %p5599_p11  ;;  %s5480_s15 = smov [#allocation8]  }
  0x1e   : > { %s205_s16 = sshll.u32 %s5480_s15, 4  ;;  %s7508_s1 = sld [smem:[#allocation45_spill]]  ;;  %s5611_s16 = int_to_ptr.vmem [resolvable:$true] %s205_s16 }
  0x1f   : > { %p5607_p13 = pnand %p5130_p12, %p5574_p1 }
  0x21   : > { %p5267_p2 = pneg %p5607_p13 }
  0x24   : > { %s5265_s29 = scalar_lea.hbm %s7508_s1, 18432 }
  0x25   : > { %p5266_p0 = scmp.ne.s32.totalorder %s7508_s1, %s5265_s29  ;;  %p5272_p6 = scmp.lt.u32.totalorder %s5265_s29, %s7508_s1 }
  0x27   : > { %p5268_p4 = pnand %p5267_p2, %p5266_p0 }
  0x29   : > { %p5269_p5 = pneg %p5268_p4 }
  0x2b   : > { %p5274_p8 = pnand %p5272_p6, %p5269_p5 }
  0x2d   : > { %5277 = shalt.err (!%p5274_p8)
}
  0x2e   : > { %s5278_s15 = scalar_lea.vmem %s190_s13, 18432  ;;  %p5286_p7 = scmp.lt.s32.totalorder %s190_s13, %s190_s13 }
  0x2f   : > { %p5279_p10 = scmp.ne.s32.totalorder %s190_s13, %s5278_s15  ;;  %p5287_p1 = scmp.lt.s32.totalorder %s5278_s15, %s5278_s15 }
  0x31   : > { %p5281_p12 = pnand %p5279_p10, %p5267_p2  ;;  %p5288_p3 = por %p5287_p1, %p5286_p7 }
  0x33   : > { %p5282_p9 = pneg %p5281_p12 }
  0x35   : > { %p5289_p11 = pnand %p5288_p3, %p5282_p9 }
  0x37   : > { %5292 = shalt.err (!%p5289_p11)
}
  0x38   : > { %s7438_s17 = smov 128   ;;  %s7439_s21 = smov 8  }
  0x39   : > { %5133 = dma.hbm_to_vmem [thread:$0]  (!%p5607_p13), %s7508_s1, 18432, %s190_s13, [#allocation7], %s7438_s17, %s7438_s17, %s7439_s21  }
  0x3a   : > { %s7509_s3 = sld [smem:[#allocation46_spill]] }
  0x40   : > { %s5293_s12 = scalar_lea.hbm %s7509_s3, 18432 }
  0x41   : > { %p5294_p1 = scmp.ne.s32.totalorder %s7509_s3, %s5293_s12  ;;  %p5300_p9 = scmp.lt.u32.totalorder %s5293_s12, %s7509_s3 }
  0x43   : > { %p5296_p3 = pnand %p5294_p1, %p5267_p2 }
  0x45   : > { %p5297_p7 = pneg %p5296_p3 }
  0x47   : > { %p5302_p11 = pnand %p5300_p9, %p5297_p7 }
  0x49   : > { %5305 = shalt.err (!%p5302_p11)
}
  0x4a   : > { %s5306_s13 = scalar_lea.vmem %s5611_s16, 18432  ;;  %p5314_p6 = scmp.lt.s32.totalorder %s5611_s16, %s5611_s16 }
  0x4b   : > { %p5307_p0 = scmp.ne.s32.totalorder %s5611_s16, %s5306_s13  ;;  %p5315_p8 = scmp.lt.s32.totalorder %s5306_s13, %s5306_s13 }
  0x4d   : > { %p5309_p4 = pnand %p5307_p0, %p5267_p2  ;;  %p5316_p10 = por %p5315_p8, %p5314_p6 }
  0x4f   : > { %p5310_p5 = pneg %p5309_p4 }
  0x51   : > { %p5317_p12 = pnand %p5316_p10, %p5310_p5 }
  0x53   : > { %5320 = shalt.err (!%p5317_p12)
}
  0x54   : > { %5136 = dma.hbm_to_vmem [thread:$0]  (!%p5607_p13), %s7509_s3, 18432, %s5611_s16, [#allocation7], %s7438_s17, %s7438_s17, %s7439_s21  }
  0x55   : > { %s31_s9 = sadd.s32 1, %s5469_s26  ;;  %s34_s14 = sadd.s32 1, %s5473_s27 }
  0x56   : > { %p32_p2 = scmp.ge.s32.totalorder %s31_s9, 2  ;;  %s41_s7 = sadd.s32 1, %s5457_s23 }
  0x57   : > { %p48_p1 = scmp.ne.s32.totalorder %s5457_s23, %s5453_s22  ;;  %p49_p3 = scmp.eq.s32.totalorder %s5477_s28, 0 }
  0x58   : > { %s7638_s9 = smov (%p32_p2, %s31_s9), 0  ;;  %s7640_s14 = smov (!%p32_p2, %s34_s14), %s5473_s27 }
  0x59   : > { %7510 = sst [smem:[#allocation17_spill]] %s7638_s9  ;;  %p5675_p7 = por %p49_p3, %p48_p1 }
  0x5a   : > { %s149_s29 = ssub.s32 %s5469_s26, %s7638_s9  ;;  %p36_p13 = scmp.ge.s32.totalorder %s7640_s14, 2 }
  0x5b   : > { %p5147_p9 = scmp.lt.s32.totalorder %s5477_s28, 4  ;;  %s222_s16 = sand.u32 1, %s5457_s23  }
  0x5c   : > { %s5116_s30 = smul.u32 5120, %s5473_s27  ;;  %s7642_s14 = smov (%p36_p13, %s7640_s14), 0 }
  0x5d   : > { %s5115_s12 = smul.u32 320, %s222_s16  ;;  %s38_s15 = ssub.s32 %s5473_s27, %s7642_s14 }
  0x5e   : > { %s5691_s18 = scalar_lea.hbm %s7422_s0, %s5116_s30  ;;  %p39_p11 = scmp.eq.s32.totalorder %s38_s15, 0 }
  0x5f   : > { %s150_s17 = sor.u32 %s149_s29, %s38_s15  ;;  %s7512_s1 = sadd.s32 1, %s5445_s20 }
  0x60   : > { %p151_p0 = scmp.eq.s32.totalorder %s150_s17, 0  ;;  %s226_s9 = scalar_lea.vmem [#allocation3], %s5115_s12 }
  0x61   : > { %s5694_s21 = scalar_select %p39_p11, %s5457_s23, %s41_s7  }
  0x62   : > { %s5699_s3 = scalar_select %p151_p0, %s5445_s20, %s7512_s1  }
  0x63   : > { %s233_s26 = sshll.u32 %s226_s9, 4  ;;  %p5705_p4 = pnand %p5147_p9, %p5675_p7  ;;  %s5709_s26 = int_to_ptr.vmem [resolvable:$true] %s233_s26 }
  0x64   : > { %s5711_s29 = scalar_lea.sflag [#allocation4], %s222_s16  ;;  %s5321_s17 = scalar_lea.hbm %s5691_s18, 5120 }
  0x65   : > { %p5322_p5 = scmp.ne.s32.totalorder %s5691_s18, %s5321_s17  ;;  %p5323_p6 = pneg %p5705_p4 }
  0x66   : > { %s5326_s7 = scalar_lea.hbm %s7422_s0, 10240  ;;  %p5327_p12 = scmp.lt.u32.totalorder %s5691_s18, %s7422_s0 }
  0x67   : > { %p5324_p8 = pnand %p5323_p6, %p5322_p5  ;;  %p5328_p2 = scmp.lt.u32.totalorder %s5326_s7, %s5321_s17 }
  0x68   : > { %p5330_p3 = scmp.lt.u32.totalorder %s5321_s17, %s5691_s18 }
  0x69   : > { %p5325_p10 = pneg %p5324_p8  ;;  %p5329_p1 = por %p5328_p2, %p5327_p12 }
  0x6b   : > { %p5331_p7 = por %p5330_p3, %p5329_p1 }
  0x6d   : > { %p5332_p13 = pnand %p5331_p7, %p5325_p10 }
  0x6f   : > { %5335 = shalt.err (!%p5332_p13)
}
  0x70   : > { %s5336_s16 = scalar_lea.vmem %s5709_s26, 5120  ;;  %s5483_s12 = smov [#allocation3]  }
  0x71   : > { %p5337_p9 = scmp.ne.s32.totalorder %s5709_s26, %s5336_s16  ;;  %s5341_s15 = sshll.u32 %s5483_s12, 4  ;;  %s5342_s15 = int_to_ptr.vmem [resolvable:$false] %s5341_s15 }
  0x72   : > { %s5343_s5 = scalar_lea.vmem %s5342_s15, 10240  ;;  %p5344_p5 = scmp.lt.s32.totalorder %s5709_s26, %s5342_s15 }
  0x73   : > { %p5339_p11 = pnand %p5337_p9, %p5323_p6  ;;  %p5345_p8 = scmp.lt.s32.totalorder %s5343_s5, %s5336_s16 }
  0x75   : > { %p5340_p0 = pneg %p5339_p11  ;;  %p5346_p12 = por %p5345_p8, %p5344_p5 }
  0x77   : > { %p5347_p2 = pnand %p5346_p12, %p5340_p0 }
  0x79   : > { %5350 = shalt.err (!%p5347_p2)
}
  0x7a   : > { %s7514_s17 = smov 8   ;;  %s7515_s1 = smov 128  }
  0x7b   : > { %5140 = dma.hbm_to_vmem [thread:$0]  (!%p5705_p4), %s5691_s18, 5120, %s5709_s26, %s5711_s29, %s7515_s1, %s7515_s1, %s7514_s17  }
  0x7c   : > { %p7516_p6 = scmp.ne.s32.totalorder %s7506_s11, 0 }
  0x7e   : > { %245 = sbr.rel (%p7516_p6) target bundleno = 954 (0x3ba), region = 40 }
  0x85   : > { %s247_s9 = sand.u32 1, %s5453_s22   ;;  %p7517_p10 = scmp.ne.s32.totalorder %s7501_s8, 0 }
  0x86   : > { %s5745_s7 = smul.u32 320, %s247_s9  ;;  %s248_s10 = scalar_lea.sflag [#allocation4], %s247_s9 }
  0x88   : > { %s251_s30 = scalar_lea.vmem [#allocation3], %s5745_s7 }
  0x89   : > { %5424 = dma.done.wait (%p7517_p10), %s248_s10, 5120  }
  0x8a   : > { %5426 = vsyncadd (%p7517_p10), %s248_s10, 4294962176  ;;  %p7518_p1 = scmp.ne.s32.totalorder %s7500_s6, 0 }
  0x8c   : > { %5428 = dma.done.wait (%p7518_p1), [#allocation7], 36864  }
  0x8d   : > { %5430 = vsyncadd (%p7518_p1), [#allocation7], 4294930432  ;;  %v5484_v0 = vmov 0.0|0.0   ;;  %v336_v1 = vld [vmem:[#allocation6 + $0x180] sm:$0xff]  ;;  %v337_v2 = vld [vmem:[#allocation6 + $0x188] sm:$0xff]  ;;  %s3593_s26 = sshll.u32 %s5461_s24, 7 }
  0x8e   : > { %4603 = vmatprep.subr.bf16.mxu0 %v5484_v0  ;;  %v368_v3 = vld [vmem:[#allocation6 + $0x280] sm:$0xff]  ;;  %v4604_v4 = vpack.c.bf16 %v337_v2, %v336_v1  ;;  %v369_v5 = vld [vmem:[#allocation6 + $0x288] sm:$0xff]  ;;  %v338_v6 = vld [vmem:[#allocation6 + $0x190] sm:$0xff]  ;;  %s5761_s6 = scalar_lea.vmem %s251_s30, %s3593_s26 [#allocation3]  ;;  %vm701_vm0 = vcmask 1046528   ;;  %vm628_vm1 = vcmask 1040384   ;;  %s3581_s8 = sshll.u32 %s5461_s24, 3 }
  0x8f   : > { %v339_v7 = vld [vmem:[#allocation6 + $0x198] sm:$0xff]  ;;  %v4651_v8 = vpack.c.bf16 %v369_v5, %v368_v3  ;;  %v370_v9 = vld [vmem:[#allocation6 + $0x290] sm:$0xff]  ;;  %v372_v13 = vld [vmem:[#allocation6 + $0x2a0] sm:$0xff]  ;;  %s3584_s11 = sadd.s32 4294967295, %s3581_s8  ;;  %s283_s12 = sand.u32 1, %s5441_s19  }
  0x90   : > { %v371_v10 = vld [vmem:[#allocation6 + $0x298] sm:$0xff]  ;;  %4605 = vmatpush1.bf16.msra.mxu0 %v4604_v4  ;;  %v4607_v11 = vpack.c.bf16 %v339_v7, %v338_v6  ;;  %v373_v14 = vld [vmem:[#allocation6 + $0x2a8] sm:$0xff]  ;;  %v340_v15 = vld [vmem:[#allocation6 + $0x1a0] sm:$0xff]  ;;  %s3580_s15 = sshll.u32 %s283_s12, 7  ;;  %s3594_s17 = sshll.u32 %s5461_s24, 4 }
  0x91   : > { %v4655_v12 = vpack.c.bf16 %v371_v10, %v370_v9  ;;  %4652 = vmatprep.subr.bf16.mxu1 %v4651_v8  ;;  %4606 = vmatprep.subr.bf16.mxu0 %v5484_v0  ;;  %v341_v16 = vld [vmem:[#allocation6 + $0x1a8] sm:$0xff]  ;;  %v4659_v17 = vpack.c.bf16 %v373_v14, %v372_v13  ;;  %v374_v19 = vld [vmem:[#allocation6 + $0x2b0] sm:$0xff]  ;;  %v375_v20 = vld [vmem:[#allocation6 + $0x2b8] sm:$0xff]  ;;  %s7290_s5 = scalar_lea.vmem [#allocation9], %s3580_s15  ;;  %s3589_s1 = sshll.u32 %s5465_s25, 5 }
  0x92   : > { %4654 = vmatpush3.bf16.msra.mxu1 %v4651_v8  ;;  %v4610_v18 = vpack.c.bf16 %v341_v16, %v340_v15  ;;  %v342_v21 = vld [vmem:[#allocation6 + $0x1b0] sm:$0xff]  ;;  %v343_v22 = vld [vmem:[#allocation6 + $0x1b8] sm:$0xff]  ;;  %v4663_v23 = vpack.c.bf16 %v375_v20, %v374_v19  ;;  %v376_v26 = vld [vmem:[#allocation6 + $0x2c0] sm:$0xff]  ;;  %s3459_s9 = sadd.s32 %s3594_s17, %s3589_s1  ;;  %s7618_s24 = sld [smem:[#allocation15_spill]] }
  0x93   : > { %4656 = vmatprep.subr.bf16.mxu1 %v4655_v12  ;;  %v5765_v24 = vld [vmem:[%s5761_s6 + $0x10] sm:$0xff]  ;;  %v4613_v25 = vpack.c.bf16 %v343_v22, %v342_v21  ;;  %v377_v27 = vld [vmem:[#allocation6 + $0x2c8] sm:$0xff]  ;;  %v5768_v28 = vld [vmem:[%s5761_s6 + $0x18] sm:$0xff]  ;;  %s3590_s25 = sshll.u32 %s3459_s9, 7  ;;  %s3462_s7 = sshll.u32 %s7290_s5, 4  ;;  %s7355_s7 = int_to_ptr.vmem [resolvable:$true] %s3462_s7 }
  0x94   : > { %4608 = vmatpush1.bf16.msra.mxu0 %v4607_v11  ;;  %v705_v29 = vrot.slane %v5765_v24, 1  ;;  %1031 = vmatprep.mubr.f32.mxu0 %v5765_v24  ;;  %v344_v30 = vld [vmem:[#allocation6 + $0x1c0] sm:$0xff]  ;;  %v345_v31 = vld [vmem:[#allocation6 + $0x1c8] sm:$0xff]  ;;  %v5774_v32 = vrot.slane %v5768_v28, 1  ;;  %v4667_v33 = vpack.c.bf16 %v377_v27, %v376_v26  ;;  %v378_v36 = vld [vmem:[#allocation6 + $0x2d0] sm:$0xff]  ;;  %s7619_s26 = sld [smem:[#allocation47_spill]] }
  0x95   : > { %4609 = vmatprep.subr.bf16.mxu0 %v5484_v0  ;;  %v4616_v35 = vpack.c.bf16 %v345_v31, %v344_v30  ;;  %v379_v37 = vld [vmem:[#allocation6 + $0x2d8] sm:$0xff]  ;;  %v346_v38 = vld [vmem:[#allocation6 + $0x1d0] sm:$0xff]  ;;  %v380_v42 = vld [vmem:[#allocation6 + $0x2e0] sm:$0xff]  ;;  %s5351_s18 = scalar_lea.vmem %s7355_s7, 2048  ;;  %s5485_s13 = smov [#allocation9]  }
  0x96   : > { %4658 = vmatpush3.bf16.msra.mxu1 %v4655_v12  ;;  %v5778_v34 = vsel %vm701_vm0, %v705_v29, %v5774_v32  ;;  %v347_v39 = vld [vmem:[#allocation6 + $0x1d8] sm:$0xff]  ;;  %v4671_v40 = vpack.c.bf16 %v379_v37, %v378_v36  ;;  %v381_v43 = vld [vmem:[#allocation6 + $0x2e8] sm:$0xff]  ;;  %v348_v44 = vld [vmem:[#allocation6 + $0x1e0] sm:$0xff]  ;;  %p5352_p4 = scmp.ne.s32.totalorder %s7355_s7, %s5351_s18  ;;  %s5355_s29 = sshll.u32 %s5485_s13, 4  ;;  %s5356_s29 = int_to_ptr.vmem [resolvable:$false] %s5355_s29 }
  0x97   : > { %4660 = vmatprep.subr.bf16.mxu1 %v4659_v17  ;;  %4281 = vmatprep.mubr.f32.mxu1 %v5778_v34  ;;  %v4619_v41 = vpack.c.bf16 %v347_v39, %v346_v38  ;;  %v349_v45 = vld [vmem:[#allocation6 + $0x1e8] sm:$0xff]  ;;  %v4675_v46 = vpack.c.bf16 %v381_v43, %v380_v42  ;;  %v382_v48 = vld [vmem:[#allocation6 + $0x2f0] sm:$0xff]  ;;  %v383_v49 = vld [vmem:[#allocation6 + $0x2f8] sm:$0xff]  ;;  %s5357_s16 = scalar_lea.vmem %s5356_s29, 4096  ;;  %p5358_p9 = scmp.lt.s32.totalorder %s7355_s7, %s5356_s29 }
  0x98   : > { %4611 = vmatpush1.bf16.msra.mxu0 %v4610_v18  ;;  %v4622_v47 = vpack.c.bf16 %v349_v45, %v348_v44  ;;  %v350_v50 = vld [vmem:[#allocation6 + $0x1f0] sm:$0xff]  ;;  %v351_v51 = vld [vmem:[#allocation6 + $0x1f8] sm:$0xff]  ;;  %v4679_v52 = vpack.c.bf16 %v383_v49, %v382_v48  ;;  %v5785_v54 = vld [vmem:[%s5761_s6 + $0x20] sm:$0xff]  ;;  %p7621_p3 = scmp.ne.s32.totalorder %s7618_s24, 0  ;;  %p5359_p11 = scmp.lt.s32.totalorder %s5357_s16, %s5351_s18 }
  0x99   : > { %4612 = vmatprep.subr.bf16.mxu0 %v5484_v0  ;;  %v4625_v53 = vpack.c.bf16 %v351_v51, %v350_v50  ;;  %v5788_v55 = vld [vmem:[%s5761_s6 + $0x28] sm:$0xff]  ;;  %v352_v56 = vld [vmem:[#allocation6 + $0x200] sm:$0xff]  ;;  %v708_v60 = vrot.slane %v5785_v54, 1  ;;  %v5796_v63 = vld [vmem:[%s5761_s6 + $0x30] sm:$0xff] }
  0x9a   : > { %4662 = vmatpush3.bf16.msra.mxu1 %v4659_v17  ;;  %v353_v57 = vld [vmem:[#allocation6 + $0x208] sm:$0xff]  ;;  %v384_v58 = vld [vmem:[#allocation6 + $0x300] sm:$0xff]  ;;  %v5793_v61 = vrot.slane %v5788_v55, 1  ;;  %v5799_v1 = vld [vmem:[%s5761_s6 + $0x38] sm:$0xff]  ;;  %v711_v8 = vrot.slane %v5796_v63, 1  ;;  %s7353_s8 = scalar_lea.hbm %s7619_s26, %s3590_s25  ;;  %p5353_p7 = pnand %p5352_p4, %p7621_p3 }
  0x9b   : > { %4664 = vmatprep.subr.bf16.mxu1 %v4663_v23  ;;  %v385_v59 = vld [vmem:[#allocation6 + $0x308] sm:$0xff]  ;;  %v4628_v62 = vpack.c.bf16 %v353_v57, %v352_v56  ;;  %v354_v2 = vld [vmem:[#allocation6 + $0x210] sm:$0xff]  ;;  %v355_v3 = vld [vmem:[#allocation6 + $0x218] sm:$0xff]  ;;  %v5809_v9 = vrot.slane %v5799_v1, 1  ;;  %p5360_p0 = por %p5359_p11, %p5358_p9 }
  0x9c   : > { %4614 = vmatpush1.bf16.msra.mxu0 %v4613_v25  ;;  %v4684_v4 = vpack.c.bf16 %v385_v59, %v384_v58  ;;  %v386_v5 = vld [vmem:[#allocation6 + $0x310] sm:$0xff]  ;;  %v387_v6 = vld [vmem:[#allocation6 + $0x318] sm:$0xff]  ;;  %v5805_v7 = vsel %vm701_vm0, %v708_v60, %v5793_v61  ;;  %v4631_v10 = vpack.c.bf16 %v355_v3, %v354_v2  ;;  %v5812_v11 = vld [vmem:[%s5761_s6 + $0x40] sm:$0xff]  ;;  %p5354_p13 = pneg %p5353_p7 }
  0x9d   : > { %4615 = vmatprep.subr.bf16.mxu0 %v5484_v0  ;;  %v5815_v12 = vld [vmem:[%s5761_s6 + $0x48] sm:$0xff]  ;;  %v356_v13 = vld [vmem:[#allocation6 + $0x220] sm:$0xff]  ;;  %v4687_v15 = vpack.c.bf16 %v387_v6, %v386_v5  ;;  %v5824_v18 = vsel %vm701_vm0, %v711_v8, %v5809_v9  ;;  %v714_v19 = vrot.slane %v5812_v11, 1  ;;  %v5831_v22 = vld [vmem:[%s5761_s6 + $0x50] sm:$0xff] }
  0x9e   : > { %4666 = vmatpush3.bf16.msra.mxu1 %v4663_v23  ;;  %v357_v14 = vld [vmem:[#allocation6 + $0x228] sm:$0xff]  ;;  %v388_v16 = vld [vmem:[#allocation6 + $0x320] sm:$0xff]  ;;  %v5828_v20 = vrot.slane %v5815_v12, 1  ;;  %v5834_v23 = vld [vmem:[%s5761_s6 + $0x58] sm:$0xff]  ;;  %p5361_p5 = pnand %p5360_p0, %p5354_p13 }
  0x9f   : > { %4668 = vmatprep.subr.bf16.mxu1 %v4667_v33  ;;  %v389_v17 = vld [vmem:[#allocation6 + $0x328] sm:$0xff]  ;;  %v4634_v21 = vpack.c.bf16 %v357_v14, %v356_v13  ;;  %7519 = vst [vmem:[#allocation18_spill] sm:$0xff] %v5834_v23  ;;  %v358_v25 = vld [vmem:[#allocation6 + $0x230] sm:$0xff]  ;;  %v359_v26 = vld [vmem:[#allocation6 + $0x238] sm:$0xff] }
  0xa0   : > { %4617 = vmatpush1.bf16.msra.mxu0 %v4616_v35  ;;  %v4690_v27 = vpack.c.bf16 %v389_v17, %v388_v16  ;;  %v390_v29 = vld [vmem:[#allocation6 + $0x330] sm:$0xff]  ;;  %v391_v30 = vld [vmem:[#allocation6 + $0x338] sm:$0xff]  ;;  %v5843_v31 = vsel %vm701_vm0, %v714_v19, %v5828_v20  ;;  %v5847_v35 = vrot.slane %v5834_v23, 1  ;;  %v4637_v36 = vpack.c.bf16 %v359_v26, %v358_v25  ;;  %v5850_v37 = vld [vmem:[%s5761_s6 + $0x60] sm:$0xff] }
  0xa1   : > { %4618 = vmatprep.subr.bf16.mxu0 %v5484_v0  ;;  %7520 = vst [vmem:[#allocation19_spill] sm:$0xff] %v5850_v37  ;;  %v5853_v38 = vld [vmem:[%s5761_s6 + $0x68] sm:$0xff]  ;;  %v360_v39 = vld [vmem:[#allocation6 + $0x240] sm:$0xff]  ;;  %v720_v45 = vrot.slane %v5850_v37, 1  ;;  %v5869_v48 = vld [vmem:[%s5761_s6 + $0x70] sm:$0xff] }
  0xa2   : > { %4670 = vmatpush3.bf16.msra.mxu1 %v4667_v33  ;;  %v717_v33 = vrot.slane %v5831_v22, 1  ;;  %7521 = vst [vmem:[#allocation20_spill] sm:$0xff] %v5853_v38  ;;  %v392_v42 = vld [vmem:[#allocation6 + $0x340] sm:$0xff]  ;;  %v393_v43 = vld [vmem:[#allocation6 + $0x348] sm:$0xff]  ;;  %7522 = vst [vmem:[#allocation21_spill] sm:$0xff] %v5869_v48  ;;  %v723_v58 = vrot.slane %v5869_v48, 1 }
  0xa3   : > { %4672 = vmatprep.subr.bf16.mxu1 %v4671_v40  ;;  %v5872_v49 = vld [vmem:[%s5761_s6 + $0x78] sm:$0xff]  ;;  %v362_v50 = vld [vmem:[#allocation6 + $0x250] sm:$0xff]  ;;  %v5891_v2 = vld [vmem:[%s5761_s6 + $0x88] sm:$0xff] }
  0xa4   : > { %4620 = vmatpush1.bf16.msra.mxu0 %v4619_v41  ;;  %v4693_v41 = vpack.c.bf16 %v391_v30, %v390_v29  ;;  %v5862_v44 = vsel %vm701_vm0, %v717_v33, %v5847_v35  ;;  %7523 = vst [vmem:[#allocation22_spill] sm:$0xff] %v5872_v49  ;;  %v363_v51 = vld [vmem:[#allocation6 + $0x258] sm:$0xff]  ;;  %v5885_v59 = vrot.slane %v5872_v49, 1  ;;  %v364_v3 = vld [vmem:[#allocation6 + $0x260] sm:$0xff]  ;;  %v397_v8 = vld [vmem:[#allocation6 + $0x368] sm:$0xff]  ;;  %v5904_v14 = vrot.slane %v5891_v2, 1 }
  0xa5   : > { %4621 = vmatprep.subr.bf16.mxu0 %v5484_v0  ;;  %v395_v56 = vld [vmem:[#allocation6 + $0x358] sm:$0xff]  ;;  %v4643_v60 = vpack.c.bf16 %v363_v51, %v362_v50  ;;  %v396_v6 = vld [vmem:[#allocation6 + $0x360] sm:$0xff]  ;;  %v5907_v16 = vld [vmem:[%s5761_s6 + $0x90] sm:$0xff]  ;;  %v5937_v51 = vrot.slane %v5765_v24, 7  ;;  %v633_v24 = vrot.slane %v5768_v28, 7 }
  0xa6   : > { %4674 = vmatpush3.bf16.msra.mxu1 %v4671_v40  ;;  %v361_v40 = vld [vmem:[#allocation6 + $0x248] sm:$0xff]  ;;  %v5910_v17 = vld [vmem:[%s5761_s6 + $0x98] sm:$0xff]  ;;  %v366_v19 = vld [vmem:[#allocation6 + $0x270] sm:$0xff]  ;;  %v4702_v25 = vpack.c.bf16 %v397_v8, %v396_v6 }
  0xa7   : > { %4676 = vmatprep.subr.bf16.mxu1 %v4675_v46  ;;  %v416_v26 = vld [vmem:[#allocation6 + $0x400] sm:$0xff]  ;;  %v398_v29 = vld [vmem:[#allocation6 + $0x370] sm:$0xff]  ;;  %v399_v30 = vld [vmem:[#allocation6 + $0x378] sm:$0xff] }
  0xa8   : > { %4623 = vmatpush1.bf16.msra.mxu0 %v4622_v47  ;;  %v4640_v47 = vpack.c.bf16 %v361_v40, %v360_v39  ;;  %v5923_v39 = vrot.slane %v5910_v17, 1  ;;  %v419_v50 = vld [vmem:[#allocation6 + $0x418] sm:$0xff]  ;;  %vm5948_vm2 = vmneg %vm628_vm1  ;;  %v420_v6 = vld [vmem:[#allocation6 + $0x420] sm:$0xff] }
  0xa9   : > { %4624 = vmatprep.subr.bf16.mxu0 %v5484_v0  ;;  %v421_v8 = vld [vmem:[#allocation6 + $0x428] sm:$0xff] }
  0xaa   : > { %4678 = vmatpush3.bf16.msra.mxu1 %v4675_v46  ;;  %v5866_v46 = vrot.slane %v5853_v38, 1 }
  0xab   : > { %4680 = vmatprep.subr.bf16.mxu1 %v4679_v52 }
  0xac   : > { %4626 = vmatpush1.bf16.msra.mxu0 %v4625_v53  ;;  %v394_v53 = vld [vmem:[#allocation6 + $0x350] sm:$0xff]  ;;  %v5881_v57 = vsel %vm701_vm0, %v720_v45, %v5866_v46  ;;  %v4705_v45 = vpack.c.bf16 %v399_v30, %v398_v29  ;;  %v423_v29 = vld [vmem:[#allocation6 + $0x438] sm:$0xff]  ;;  %v404_v30 = vld [vmem:[#allocation6 + $0x3a0] sm:$0xff] }
  0xad   : > { %4627 = vmatprep.subr.bf16.mxu0 %v5484_v0  ;;  %v4699_v5 = vpack.c.bf16 %v395_v56, %v394_v53  ;;  %v401_v53 = vld [vmem:[#allocation6 + $0x388] sm:$0xff] }
  0xae   : > { %4682 = vmatpush3.bf16.msra.mxu1 %v4679_v52  ;;  %v4696_v52 = vpack.c.bf16 %v393_v43, %v392_v42  ;;  %v5929_v42 = vld [vmem:[%s5761_s6 + $0xa8] sm:$0xff] }
  0xaf   : > { %4683 = vmatprep.subr.bf16.mxu1 %v5484_v0 }
  0xb0   : > { %4629 = vmatpush1.bf16.msra.mxu0 %v4628_v62  ;;  %v5888_v62 = vld [vmem:[%s5761_s6 + $0x80] sm:$0xff] }
  0xb1   : > { %4282 = vmatmul.mubr.msk.f32.vlgmr.msra.gmra.mrb[0].mxu1 %vm701_vm0, %v5774_v32  ;;  %4630 = vmatprep.subr.bf16.mxu0 %v5484_v0  ;;  %7524 = vst [vmem:[#allocation23_spill] sm:$0xff] %v5888_v62  ;;  %v726_v13 = vrot.slane %v5888_v62, 1 }
  0xb2   : > { %4685 = vmatpush1.bf16.msra.mxu1 %v4684_v4  ;;  %4284 = vmatprep.mubr.f32.mxu1 %v5805_v7  ;;  %v365_v4 = vld [vmem:[#allocation6 + $0x268] sm:$0xff] }
  0xb3   : > { %4686 = vmatprep.subr.bf16.mxu1 %v5484_v0  ;;  %v5919_v33 = vsel %vm701_vm0, %v726_v13, %v5904_v14  ;;  %v402_v13 = vld [vmem:[#allocation6 + $0x390] sm:$0xff] }
  0xb4   : > { %4632 = vmatpush1.bf16.msra.mxu0 %v4631_v10  ;;  %v5900_v10 = vsel %vm701_vm0, %v723_v58, %v5885_v59 }
  0xb5   : > { %4633 = vmatprep.subr.bf16.mxu0 %v5484_v0  ;;  %4285 = vmatmul.mubr.msk.f32.gmra.mrb[2].mxu1 %vm701_vm0, %v5793_v61 }
  0xb6   : > { %4688 = vmatpush1.bf16.msra.mxu1 %v4687_v15  ;;  %4287 = vmatprep.mubr.f32.mxu1 %v5824_v18  ;;  %v4646_v15 = vpack.c.bf16 %v365_v4, %v364_v3 }
  0xb7   : > { %4689 = vmatprep.subr.bf16.mxu1 %v5484_v0 }
  0xb8   : > { %4635 = vmatpush1.bf16.msra.mxu0 %v4634_v21  ;;  %v367_v21 = vld [vmem:[#allocation6 + $0x278] sm:$0xff] }
  0xb9   : > { %4636 = vmatprep.subr.bf16.mxu0 %v5484_v0  ;;  %4288 = vmatmul.mubr.msk.f32.gmra.mrb[4].mxu1 %vm701_vm0, %v5809_v9  ;;  %v4649_v40 = vpack.c.bf16 %v367_v21, %v366_v19  ;;  %v5967_v21 = vsel %vm628_vm1, %v5937_v51, %v633_v24 }
  0xba   : > { %4691 = vmatpush1.bf16.msra.mxu1 %v4690_v27  ;;  %4290 = vmatprep.mubr.f32.mxu1 %v5843_v31  ;;  %v417_v27 = vld [vmem:[#allocation6 + $0x408] sm:$0xff] }
  0xbb   : > { %4692 = vmatprep.subr.bf16.mxu1 %v5484_v0  ;;  %v4731_v43 = vpack.c.bf16 %v417_v27, %v416_v26  ;;  %v422_v27 = vld [vmem:[#allocation6 + $0x430] sm:$0xff] }
  0xbc   : > { %4638 = vmatpush1.bf16.msra.mxu0 %v4637_v36  ;;  %v729_v36 = vrot.slane %v5907_v16, 1 }
  0xbd   : > { %4639 = vmatprep.subr.bf16.mxu0 %v5484_v0  ;;  %4291 = vmatmul.mubr.msk.f32.gmra.mrb[6].mxu1 %vm701_vm0, %v5828_v20 }
  0xbe   : > { %4694 = vmatpush1.bf16.msra.mxu1 %v4693_v41  ;;  %4293 = vmatprep.mubr.f32.mxu1 %v5862_v44  ;;  %v5926_v41 = vld [vmem:[%s5761_s6 + $0xa0] sm:$0xff]  ;;  %v5941_v56 = vsel %vm701_vm0, %v729_v36, %v5923_v39  ;;  %v405_v36 = vld [vmem:[#allocation6 + $0x3a8] sm:$0xff] }
  0xbf   : > { %4695 = vmatprep.subr.bf16.mxu1 %v5484_v0  ;;  %v732_v58 = vrot.slane %v5926_v41, 1 }
  0xc0   : > { %4641 = vmatpush1.bf16.msra.mxu0 %v4640_v47  ;;  %v418_v47 = vld [vmem:[#allocation6 + $0x410] sm:$0xff] }
  0xc1   : > { %4642 = vmatprep.subr.bf16.mxu0 %v5484_v0  ;;  %4294 = vmatmul.mubr.msk.f32.gmra.mrb[8].mxu1 %vm701_vm0, %v5847_v35  ;;  %v4735_v4 = vpack.c.bf16 %v419_v50, %v418_v47  ;;  %v424_v47 = vld [vmem:[#allocation6 + $0x440] sm:$0xff]  ;;  %v425_v50 = vld [vmem:[#allocation6 + $0x448] sm:$0xff] }
  0xc2   : > { %4697 = vmatpush1.bf16.msra.mxu1 %v4696_v52  ;;  %4296 = vmatprep.mubr.f32.mxu1 %v5881_v57  ;;  %v400_v52 = vld [vmem:[#allocation6 + $0x380] sm:$0xff]  ;;  %v4747_v24 = vpack.c.bf16 %v425_v50, %v424_v47  ;;  %v430_v50 = vld [vmem:[#allocation6 + $0x470] sm:$0xff] }
  0xc3   : > { %4698 = vmatprep.subr.bf16.mxu1 %v5484_v0 }
  0xc4   : > { %4644 = vmatpush1.bf16.msra.mxu0 %v4643_v60  ;;  %v5945_v60 = vrot.slane %v5929_v42, 1 }
  0xc5   : > { %4645 = vmatprep.subr.bf16.mxu0 %v5484_v0  ;;  %4297 = vmatmul.mubr.msk.f32.gmra.mrb[10].mxu1 %vm701_vm0, %v5866_v46 }
  0xc6   : > { %4700 = vmatpush1.bf16.msra.mxu1 %v4699_v5  ;;  %4299 = vmatprep.mubr.f32.mxu1 %v5900_v10  ;;  %v4708_v5 = vpack.c.bf16 %v401_v53, %v400_v52  ;;  %v5962_v19 = vsel %vm701_vm0, %v732_v58, %v5945_v60  ;;  %v406_v52 = vld [vmem:[#allocation6 + $0x3b0] sm:$0xff]  ;;  %v407_v53 = vld [vmem:[#allocation6 + $0x3b8] sm:$0xff] }
  0xc7   : > { %4701 = vmatprep.subr.bf16.mxu1 %v5484_v0 }
  0xc8   : > { %4647 = vmatpush1.bf16.msra.mxu0 %v4646_v15  ;;  %v403_v15 = vld [vmem:[#allocation6 + $0x398] sm:$0xff] }
  0xc9   : > { %4648 = vmatprep.subr.bf16.mxu0 %v5484_v0  ;;  %4300 = vmatmul.mubr.msk.f32.gmra.mrb[12].mxu1 %vm701_vm0, %v5885_v59  ;;  %v4711_v26 = vpack.c.bf16 %v403_v15, %v402_v13  ;;  %v408_v13 = vld [vmem:[#allocation6 + $0x3c0] sm:$0xff]  ;;  %v409_v15 = vld [vmem:[#allocation6 + $0x3c8] sm:$0xff] }
  0xca   : > { %4703 = vmatpush1.bf16.msra.mxu1 %v4702_v25  ;;  %4302 = vmatprep.mubr.f32.mxu1 %v5919_v33  ;;  %v4739_v25 = vpack.c.bf16 %v421_v8, %v420_v6  ;;  %v427_v6 = vld [vmem:[#allocation6 + $0x458] sm:$0xff]  ;;  %v5994_v8 = vrot.slane %v5796_v63, 7 }
  0xcb   : > { %4704 = vmatprep.subr.bf16.mxu1 %v5484_v0 }
  0xcc   : > { %4650 = vmatpush1.bf16.msra.mxu0 %v4649_v40  ;;  %v636_v40 = vrot.slane %v5788_v55, 7 }
  0xcd   : > { %4732 = vmatprep.subr.bf16.mxu0 %v4731_v43  ;;  %4303 = vmatmul.mubr.msk.f32.gmra.mrb[14].mxu1 %vm701_vm0, %v5904_v14 }
  0xce   : > { %4706 = vmatpush1.bf16.msra.mxu1 %v4705_v45  ;;  %4305 = vmatprep.mubr.f32.mxu1 %v5941_v56  ;;  %v4714_v45 = vpack.c.bf16 %v405_v36, %v404_v30  ;;  %v429_v30 = vld [vmem:[#allocation6 + $0x468] sm:$0xff]  ;;  %v410_v36 = vld [vmem:[#allocation6 + $0x3d0] sm:$0xff] }
  0xcf   : > { %3596 = vmatmul.mubr.msk.f32.vlgmr.msra.gmra.mrb[0].mxu0 %vm5948_vm2, %v5937_v51  ;;  %4707 = vmatprep.subr.bf16.mxu1 %v5484_v0 }
  0xd0   : > { %1036 = vmatprep.mubr.f32.mxu0 %v5768_v28  ;;  %4734 = vmatpush3.bf16.msra.mxu0 %v4731_v43  ;;  %v5975_v28 = vrot.slane %v5785_v54, 7  ;;  %v4743_v43 = vpack.c.bf16 %v423_v29, %v422_v27  ;;  %v4720_v27 = vpack.c.bf16 %v409_v15, %v408_v13  ;;  %v428_v29 = vld [vmem:[#allocation6 + $0x460] sm:$0xff] }
  0xd1   : > { %4736 = vmatprep.subr.bf16.mxu0 %v4735_v4  ;;  %4306 = vmatmul.mubr.msk.f32.gmra.mrb[16].mxu1 %vm701_vm0, %v5923_v39  ;;  %v320_v15 = vld [vmem:[#allocation6 + $0x100] sm:$0xff] }
  0xd2   : > { %4709 = vmatpush1.bf16.msra.mxu1 %v4708_v5  ;;  %4308 = vmatprep.mubr.f32.mxu1 %v5962_v19  ;;  %v5989_v58 = vsel %vm628_vm1, %v5975_v28, %v636_v40  ;;  %v426_v5 = vld [vmem:[#allocation6 + $0x450] sm:$0xff]  ;;  %v411_v40 = vld [vmem:[#allocation6 + $0x3d8] sm:$0xff] }
  0xd3   : > { %1037 = vmatmul.mubr.f32.gmra.mrb[2].mxu0 %v5967_v21  ;;  %4710 = vmatprep.subr.bf16.mxu1 %v5484_v0  ;;  %v4723_v47 = vpack.c.bf16 %v411_v40, %v410_v36  ;;  %v6028_v40 = vrot.slane %v5831_v22, 7 }
  0xd4   : > { %1041 = vmatprep.mubr.f32.mxu0 %v5785_v54  ;;  %4738 = vmatpush3.bf16.msra.mxu0 %v4735_v4  ;;  %v4717_v4 = vpack.c.bf16 %v407_v53, %v406_v52  ;;  %v431_v52 = vld [vmem:[#allocation6 + $0x478] sm:$0xff]  ;;  %v6010_v53 = vrot.slane %v5812_v11, 7 }
  0xd5   : > { %4740 = vmatprep.subr.bf16.mxu0 %v4739_v25  ;;  %4309 = vmatmul.mubr.msk.f32.gmra.mrb[18].mxu1 %vm701_vm0, %v5945_v60 }
  0xd6   : > { %4712 = vmatpush1.bf16.msra.mxu1 %v4711_v26  ;;  %1422 = vmatprep.mubr.f32.mxu1 %v5785_v54  ;;  %v639_v26 = vrot.slane %v5799_v1, 7 }
  0xd7   : > { %3598 = vmatmul.mubr.msk.f32.gmra.mrb[4].mxu0 %vm5948_vm2, %v5975_v28  ;;  %4713 = vmatprep.subr.bf16.mxu1 %v5484_v0 }
  0xd8   : > { %1046 = vmatprep.mubr.f32.mxu0 %v5788_v55  ;;  %4742 = vmatpush3.bf16.msra.mxu0 %v4739_v25  ;;  %v4751_v25 = vpack.c.bf16 %v427_v6, %v426_v5  ;;  %v413_v5 = vld [vmem:[#allocation6 + $0x3e8] sm:$0xff]  ;;  %v642_v6 = vrot.slane %v5815_v12, 7 }
  0xd9   : > { %4744 = vmatprep.subr.bf16.mxu0 %v4743_v43 }
  0xda   : > { %4715 = vmatpush1.bf16.msra.mxu1 %v4714_v45  ;;  %v6005_v45 = vsel %vm628_vm1, %v5994_v8, %v639_v26  ;;  %v321_v26 = vld [vmem:[#allocation6 + $0x108] sm:$0xff] }
  0xdb   : > { %1047 = vmatmul.mubr.f32.gmra.mrb[6].mxu0 %v5989_v58  ;;  %4716 = vmatprep.subr.bf16.mxu1 %v5484_v0 }
  0xdc   : > { %1051 = vmatprep.mubr.f32.mxu0 %v5796_v63  ;;  %4746 = vmatpush3.bf16.msra.mxu0 %v4743_v43  ;;  %v4755_v43 = vpack.c.bf16 %v429_v30, %v428_v29  ;;  %v415_v29 = vld [vmem:[#allocation6 + $0x3f8] sm:$0xff]  ;;  %v6021_v30 = vsel %vm628_vm1, %v6010_v53, %v642_v6 }
  0xdd   : > { %4748 = vmatprep.subr.bf16.mxu0 %v4747_v24 }
  0xde   : > { %4718 = vmatpush1.bf16.msra.mxu1 %v4717_v4  ;;  %v412_v4 = vld [vmem:[#allocation6 + $0x3e0] sm:$0xff] }
  0xdf   : > { %3600 = vmatmul.mubr.msk.f32.gmra.mrb[8].mxu0 %vm5948_vm2, %v5994_v8  ;;  %4719 = vmatprep.subr.bf16.mxu1 %v5484_v0  ;;  %v4726_v13 = vpack.c.bf16 %v413_v5, %v412_v4  ;;  %v290_v4 = vld [vmem:[#allocation6 + $0x10] sm:$0xff]  ;;  %v291_v5 = vld [vmem:[#allocation6 + $0x18] sm:$0xff] }
  0xe0   : > { %1056 = vmatprep.mubr.f32.mxu0 %v5799_v1  ;;  %4750 = vmatpush3.bf16.msra.mxu0 %v4747_v24  ;;  %v4759_v24 = vpack.c.bf16 %v431_v52, %v430_v50  ;;  %v289_v50 = vld [vmem:[#allocation6 + $0x8] sm:$0xff]  ;;  %v645_v52 = vrot.slane %v5834_v23, 7 }
  0xe1   : > { %4752 = vmatprep.subr.bf16.mxu0 %v4751_v25 }
  0xe2   : > { %4721 = vmatpush1.bf16.msra.mxu1 %v4720_v27  ;;  %v414_v27 = vld [vmem:[#allocation6 + $0x3f0] sm:$0xff]  ;;  %v6040_v6 = vsel %vm628_vm1, %v6028_v40, %v645_v52  ;;  %v6070_v52 = vrot.slane %v5869_v48, 7 }
  0xe3   : > { %1057 = vmatmul.mubr.f32.gmra.mrb[10].mxu0 %v6005_v45  ;;  %4722 = vmatprep.subr.bf16.mxu1 %v5484_v0  ;;  %v4729_v36 = vpack.c.bf16 %v415_v29, %v414_v27  ;;  %v648_v27 = vrot.slane %v5853_v38, 7  ;;  %v294_v29 = vld [vmem:[#allocation6 + $0x30] sm:$0xff] }
  0xe4   : > { %1061 = vmatprep.mubr.f32.mxu0 %v5812_v11  ;;  %4754 = vmatpush3.bf16.msra.mxu0 %v4751_v25  ;;  %v6023_v25 = vpack.c.bf16 %v321_v26, %v320_v15  ;;  %v292_v15 = vld [vmem:[#allocation6 + $0x20] sm:$0xff]  ;;  %v293_v26 = vld [vmem:[#allocation6 + $0x28] sm:$0xff]  ;;  %7528 = vst [vmem:[#allocation25_spill] sm:$0xff] %v6070_v52 }
  0xe5   : > { %4756 = vmatprep.subr.bf16.mxu0 %v4755_v43 }
  0xe6   : > { %4724 = vmatpush1.bf16.msra.mxu1 %v4723_v47  ;;  %v288_v47 = vld [vmem:[#allocation6] sm:$0xff] }
  0xe7   : > { %3602 = vmatmul.mubr.msk.f32.gmra.mrb[12].mxu0 %vm5948_vm2, %v6010_v53  ;;  %4725 = vmatprep.subr.bf16.mxu1 %v5484_v0 }
  0xe8   : > { %1066 = vmatprep.mubr.f32.mxu0 %v5815_v12  ;;  %4758 = vmatpush3.bf16.msra.mxu0 %v4755_v43  ;;  %v4764_v43 = vpack.c.bf16 %v289_v50, %v288_v47 }
  0xe9   : > { %4760 = vmatprep.subr.bf16.mxu0 %v4759_v24 }
  0xea   : > { %4727 = vmatpush1.bf16.msra.mxu1 %v4726_v13  ;;  %v6049_v13 = vrot.slane %v5850_v37, 7 }
  0xeb   : > { %1067 = vmatmul.mubr.f32.gmra.mrb[14].mxu0 %v6021_v30  ;;  %4728 = vmatprep.subr.bf16.mxu1 %v5484_v0 }
  0xec   : > { %1071 = vmatprep.mubr.f32.mxu0 %v5831_v22  ;;  %4762 = vmatpush3.bf16.msra.mxu0 %v4759_v24  ;;  %v4767_v24 = vpack.c.bf16 %v291_v5, %v290_v4  ;;  %v6062_v47 = vsel %vm628_vm1, %v6049_v13, %v648_v27  ;;  %v297_v4 = vld [vmem:[#allocation6 + $0x48] sm:$0xff]  ;;  %v651_v5 = vrot.slane %v5872_v49, 7 }
  0xed   : > { %4812 = vmatprep.subr.bf16.mxu0 %v6023_v25  ;;  %7527 = vst [vmem:[#allocation24_spill] sm:$0xff] %v6062_v47 }
  0xee   : > { %4730 = vmatpush1.bf16.msra.mxu1 %v4729_v36  ;;  %v295_v36 = vld [vmem:[#allocation6 + $0x38] sm:$0xff]  ;;  %v6084_v27 = vsel %vm628_vm1, %v6070_v52, %v651_v5  ;;  %v302_v5 = vld [vmem:[#allocation6 + $0x70] sm:$0xff] }
  0xef   : > { %3604 = vmatmul.mubr.msk.f32.gmra.mrb[16].mxu0 %vm5948_vm2, %v6028_v40  ;;  %4763 = vmatprep.subr.bf16.mxu1 %v5484_v0  ;;  %v4773_v50 = vpack.c.bf16 %v295_v36, %v294_v29  ;;  %v6092_v29 = vrot.slane %v5888_v62, 7  ;;  %v300_v36 = vld [vmem:[#allocation6 + $0x60] sm:$0xff] }
  0xf0   : > { %1076 = vmatprep.mubr.f32.mxu0 %v5834_v23 }
  0xf1   : > { %3626 = vmatmul.mubr.msk.f32.vlgmr.msra.gmra.mrb[20].mxu1 %vm5948_vm2, %v5975_v28 }
  0xf2   : > { %4765 = vmatpush1.bf16.msra.mxu1 %v4764_v43  ;;  %1427 = vmatprep.mubr.f32.mxu1 %v5788_v55  ;;  %v4770_v55 = vpack.c.bf16 %v293_v26, %v292_v15  ;;  %v296_v43 = vld [vmem:[#allocation6 + $0x40] sm:$0xff]  ;;  %v298_v15 = vld [vmem:[#allocation6 + $0x50] sm:$0xff]  ;;  %v299_v26 = vld [vmem:[#allocation6 + $0x58] sm:$0xff] }
  0xf3   : > { %1077 = vmatmul.mubr.f32.gmra.mrb[18].mxu0 %v6040_v6  ;;  %4766 = vmatprep.subr.bf16.mxu1 %v5484_v0 }
  0xf4   : > { %1081 = vmatprep.mubr.f32.mxu0 %v5850_v37 }
  0xf5   : > { %1428 = vmatmul.mubr.f32.gmra.mrb[22].mxu1 %v5989_v58 }
  0xf6   : > { %4768 = vmatpush1.bf16.msra.mxu1 %v4767_v24  ;;  %1432 = vmatprep.mubr.f32.mxu1 %v5796_v63  ;;  %v4776_v24 = vpack.c.bf16 %v297_v4, %v296_v43  ;;  %v654_v43 = vrot.slane %v5891_v2, 7 }
  0xf7   : > { %3606 = vmatmul.mubr.msk.f32.gmra.mrb[20].mxu0 %vm5948_vm2, %v6049_v13  ;;  %4769 = vmatprep.subr.bf16.mxu1 %v5484_v0 }
  0xf8   : > { %1086 = vmatprep.mubr.f32.mxu0 %v5853_v38 }
  0xf9   : > { %3628 = vmatmul.mubr.msk.f32.gmra.mrb[24].mxu1 %vm5948_vm2, %v5994_v8 }
  0xfa   : > { %1437 = vmatprep.mubr.f32.mxu1 %v5799_v1  ;;  %4771 = vmatpush1.bf16.msra.mxu1 %v4770_v55  ;;  %v4779_v55 = vpack.c.bf16 %v299_v26, %v298_v15  ;;  %v6106_v15 = vsel %vm628_vm1, %v6092_v29, %v654_v43  ;;  %v657_v43 = vrot.slane %v5910_v17, 7 }
  0xfb   : > { %1087 = vmatmul.mubr.f32.gmra.mrb[22].mxu0 %v6062_v47  ;;  %4772 = vmatprep.subr.bf16.mxu1 %v5484_v0 }
  0xfc   : > { %1091 = vmatprep.mubr.f32.mxu0 %v5869_v48 }
  0xfd   : > { %1438 = vmatmul.mubr.f32.gmra.mrb[26].mxu1 %v6005_v45 }
  0xfe   : > { %1442 = vmatprep.mubr.f32.mxu1 %v5812_v11  ;;  %4774 = vmatpush1.bf16.msra.mxu1 %v4773_v50  ;;  %v301_v50 = vld [vmem:[#allocation6 + $0x68] sm:$0xff] }
  0xff   : > { %3608 = vmatmul.mubr.msk.f32.gmra.mrb[24].mxu0 %vm5948_vm2, %v6070_v52  ;;  %4775 = vmatprep.subr.bf16.mxu1 %v5484_v0  ;;  %v4782_v4 = vpack.c.bf16 %v301_v50, %v300_v36  ;;  %v304_v36 = vld [vmem:[#allocation6 + $0x80] sm:$0xff]  ;;  %v305_v50 = vld [vmem:[#allocation6 + $0x88] sm:$0xff] }
 0x100   : > { %1096 = vmatprep.mubr.f32.mxu0 %v5872_v49 }
 0x101   : > { %3630 = vmatmul.mubr.msk.f32.gmra.mrb[28].mxu1 %vm5948_vm2, %v6010_v53 }
 0x102   : > { %1447 = vmatprep.mubr.f32.mxu1 %v5815_v12  ;;  %4777 = vmatpush1.bf16.msra.mxu1 %v4776_v24  ;;  %v303_v24 = vld [vmem:[#allocation6 + $0x78] sm:$0xff] }
 0x103   : > { %1097 = vmatmul.mubr.f32.gmra.mrb[26].mxu0 %v6084_v27  ;;  %4778 = vmatprep.subr.bf16.mxu1 %v5484_v0  ;;  %v4785_v26 = vpack.c.bf16 %v303_v24, %v302_v5  ;;  %v306_v5 = vld [vmem:[#allocation6 + $0x90] sm:$0xff]  ;;  %v307_v24 = vld [vmem:[#allocation6 + $0x98] sm:$0xff] }
 0x104   : > { %1101 = vmatprep.mubr.f32.mxu0 %v5888_v62 }
 0x105   : > { %1448 = vmatmul.mubr.f32.gmra.mrb[30].mxu1 %v6021_v30 }
 0x106   : > { %1452 = vmatprep.mubr.f32.mxu1 %v5831_v22  ;;  %4780 = vmatpush1.bf16.msra.mxu1 %v4779_v55  ;;  %v6114_v55 = vrot.slane %v5907_v16, 7 }
 0x107   : > { %3610 = vmatmul.mubr.msk.f32.gmra.mrb[28].mxu0 %vm5948_vm2, %v6092_v29  ;;  %4781 = vmatprep.subr.bf16.mxu1 %v5484_v0 }
 0x108   : > { %1106 = vmatprep.mubr.f32.mxu0 %v5891_v2 }
 0x109   : > { %3632 = vmatmul.mubr.msk.f32.gmra.mrb[32].mxu1 %vm5948_vm2, %v6028_v40 }
 0x10a   : > { %1457 = vmatprep.mubr.f32.mxu1 %v5834_v23  ;;  %4783 = vmatpush1.bf16.msra.mxu1 %v4782_v4  ;;  %v4788_v4 = vpack.c.bf16 %v305_v50, %v304_v36  ;;  %v6128_v23 = vsel %vm628_vm1, %v6114_v55, %v657_v43  ;;  %v6136_v36 = vrot.slane %v5926_v41, 7  ;;  %v308_v50 = vld [vmem:[#allocation6 + $0xa0] sm:$0xff]  ;;  %v660_v43 = vrot.slane %v5929_v42, 7 }
 0x10b   : > { %1107 = vmatmul.mubr.f32.gmra.mrb[30].mxu0 %v6106_v15  ;;  %4784 = vmatprep.subr.bf16.mxu1 %v5484_v0 }
 0x10c   : > { %1111 = vmatprep.mubr.f32.mxu0 %v5907_v16 }
 0x10d   : > { %1458 = vmatmul.mubr.f32.gmra.mrb[34].mxu1 %v6040_v6 }
 0x10e   : > { %1462 = vmatprep.mubr.f32.mxu1 %v5850_v37  ;;  %4786 = vmatpush1.bf16.msra.mxu1 %v4785_v26  ;;  %v4791_v26 = vpack.c.bf16 %v307_v24, %v306_v5  ;;  %v309_v37 = vld [vmem:[#allocation6 + $0xa8] sm:$0xff]  ;;  %v310_v5 = vld [vmem:[#allocation6 + $0xb0] sm:$0xff]  ;;  %v311_v24 = vld [vmem:[#allocation6 + $0xb8] sm:$0xff] }
 0x10f   : > { %3612 = vmatmul.mubr.msk.f32.gmra.mrb[32].mxu0 %vm5948_vm2, %v6114_v55  ;;  %4787 = vmatprep.subr.bf16.mxu1 %v5484_v0 }
 0x110   : > { %1116 = vmatprep.mubr.f32.mxu0 %v5910_v17 }
 0x111   : > { %3634 = vmatmul.mubr.msk.f32.gmra.mrb[36].mxu1 %vm5948_vm2, %v6049_v13 }
 0x112   : > { %1467 = vmatprep.mubr.f32.mxu1 %v5853_v38  ;;  %4789 = vmatpush1.bf16.msra.mxu1 %v4788_v4  ;;  %v4794_v4 = vpack.c.bf16 %v309_v37, %v308_v50  ;;  %v6150_v38 = vsel %vm628_vm1, %v6136_v36, %v660_v43  ;;  %v322_v37 = vld [vmem:[#allocation6 + $0x110] sm:$0xff]  ;;  %v4797_v50 = vpack.c.bf16 %v311_v24, %v310_v5  ;;  %v315_v24 = vld [vmem:[#allocation6 + $0xd8] sm:$0xff] }
 0x113   : > { %1117 = vmatmul.mubr.f32.gmra.mrb[34].mxu0 %v6128_v23  ;;  %4790 = vmatprep.subr.bf16.mxu1 %v5484_v0  ;;  %v314_v5 = vld [vmem:[#allocation6 + $0xd0] sm:$0xff] }
 0x114   : > { %1121 = vmatprep.mubr.f32.mxu0 %v5926_v41 }
 0x115   : > { %1468 = vmatmul.mubr.f32.gmra.mrb[38].mxu1 %v6062_v47  ;;  %v313_v47 = vld [vmem:[#allocation6 + $0xc8] sm:$0xff] }
 0x116   : > { %1472 = vmatprep.mubr.f32.mxu1 %v5869_v48  ;;  %4792 = vmatpush1.bf16.msra.mxu1 %v4791_v26  ;;  %v323_v26 = vld [vmem:[#allocation6 + $0x118] sm:$0xff]  ;;  %v312_v48 = vld [vmem:[#allocation6 + $0xc0] sm:$0xff] }
 0x117   : > { %3614 = vmatmul.mubr.msk.f32.gmra.mrb[36].mxu0 %vm5948_vm2, %v6136_v36  ;;  %4793 = vmatprep.subr.bf16.mxu1 %v5484_v0  ;;  %v4815_v43 = vpack.c.bf16 %v323_v26, %v322_v37  ;;  %v4803_v26 = vpack.c.bf16 %v315_v24, %v314_v5  ;;  %v318_v5 = vld [vmem:[#allocation6 + $0xf0] sm:$0xff]  ;;  %v319_v24 = vld [vmem:[#allocation6 + $0xf8] sm:$0xff] }
 0x118   : > { %1126 = vmatprep.mubr.f32.mxu0 %v5929_v42 }
 0x119   : > { %3636 = vmatmul.mubr.msk.f32.gmra.mrb[40].mxu1 %vm5948_vm2, %v6070_v52  ;;  %v324_v52 = vld [vmem:[#allocation6 + $0x120] sm:$0xff] }
 0x11a   : > { %1477 = vmatprep.mubr.f32.mxu1 %v5872_v49  ;;  %4795 = vmatpush1.bf16.msra.mxu1 %v4794_v4  ;;  %v325_v49 = vld [vmem:[#allocation6 + $0x128] sm:$0xff]  ;;  %v4800_v4 = vpack.c.bf16 %v313_v47, %v312_v48  ;;  %v326_v48 = vld [vmem:[#allocation6 + $0x130] sm:$0xff]  ;;  %v327_v47 = vld [vmem:[#allocation6 + $0x138] sm:$0xff] }
 0x11b   : > { %1127 = vmatmul.mubr.f32.gmra.mrb[38].mxu0 %v6150_v38  ;;  %4796 = vmatprep.subr.bf16.mxu1 %v5484_v0  ;;  %v4819_v37 = vpack.c.bf16 %v325_v49, %v324_v52  ;;  %v4823_v49 = vpack.c.bf16 %v327_v47, %v326_v48  ;;  %v329_v52 = vld [vmem:[#allocation6 + $0x148] sm:$0xff]  ;;  %v331_v48 = vld [vmem:[#allocation6 + $0x158] sm:$0xff]  ;;  %v4809_v47 = vpack.c.bf16 %v319_v24, %v318_v5 }
 0x11c   : > { %4343 = vmatprep.mubr.f32.mxu0 %v5805_v7 }
 0x11d   : > { %1478 = vmatmul.mubr.f32.gmra.mrb[42].mxu1 %v6084_v27 }
 0x11e   : > { %1482 = vmatprep.mubr.f32.mxu1 %v5888_v62  ;;  %4798 = vmatpush1.bf16.msra.mxu1 %v4797_v50  ;;  %v316_v50 = vld [vmem:[#allocation6 + $0xe0] sm:$0xff]  ;;  %v317_v62 = vld [vmem:[#allocation6 + $0xe8] sm:$0xff] }
 0x11f   : > { %4344 = vmatmul.mubr.msk.f32.vlgmr.msra.gmra.mrb[40].mxu0 %vm701_vm0, %v5793_v61  ;;  %4799 = vmatprep.subr.bf16.mxu1 %v5484_v0 }
 0x120   : > { %4346 = vmatprep.mubr.f32.mxu0 %v5824_v18  ;;  %4814 = vmatpush3.bf16.msra.mxu0 %v6023_v25  ;;  %v328_v25 = vld [vmem:[#allocation6 + $0x140] sm:$0xff] }
 0x121   : > { %3638 = vmatmul.mubr.msk.f32.gmra.mrb[44].mxu1 %vm5948_vm2, %v6092_v29  ;;  %4816 = vmatprep.subr.bf16.mxu0 %v4815_v43 }
 0x122   : > { %1487 = vmatprep.mubr.f32.mxu1 %v5891_v2  ;;  %4801 = vmatpush1.bf16.msra.mxu1 %v4800_v4  ;;  %v4806_v4 = vpack.c.bf16 %v317_v62, %v316_v50  ;;  %v330_v62 = vld [vmem:[#allocation6 + $0x150] sm:$0xff]  ;;  %v333_v50 = vld [vmem:[#allocation6 + $0x168] sm:$0xff] }
 0x123   : > { %4347 = vmatmul.mubr.msk.f32.gmra.mrb[42].mxu0 %vm701_vm0, %v5809_v9  ;;  %4802 = vmatprep.subr.bf16.mxu1 %v5484_v0 }
 0x124   : > { %4349 = vmatprep.mubr.f32.mxu0 %v5843_v31  ;;  %4818 = vmatpush3.bf16.msra.mxu0 %v4815_v43  ;;  %v4827_v43 = vpack.c.bf16 %v329_v52, %v328_v25  ;;  %v334_v25 = vld [vmem:[#allocation6 + $0x170] sm:$0xff]  ;;  %v603_v52 = vld [vmem:[%s5761_s6 + $0xb8] sm:$0xff] }
 0x125   : > { %1488 = vmatmul.mubr.f32.gmra.mrb[46].mxu1 %v6106_v15  ;;  %4820 = vmatprep.subr.bf16.mxu0 %v4819_v37  ;;  %v663_v5 = vrot.slane %v603_v52, 7  ;;  %v736_v24 = vrot.slane %v603_v52, 1 }
 0x126   : > { %1492 = vmatprep.mubr.f32.mxu1 %v5907_v16  ;;  %4804 = vmatpush1.bf16.msra.mxu1 %v4803_v26  ;;  %v332_v26 = vld [vmem:[#allocation6 + $0x160] sm:$0xff] }
 0x127   : > { %4350 = vmatmul.mubr.msk.f32.gmra.mrb[44].mxu0 %vm701_vm0, %v5828_v20  ;;  %4805 = vmatprep.subr.bf16.mxu1 %v5484_v0 }
 0x128   : > { %4352 = vmatprep.mubr.f32.mxu0 %v5862_v44  ;;  %4822 = vmatpush3.bf16.msra.mxu0 %v4819_v37  ;;  %v4831_v37 = vpack.c.bf16 %v331_v48, %v330_v62  ;;  %v581_v62 = vld [vmem:[%s5761_s6 + $0x8] sm:$0xff] }
 0x129   : > { %3640 = vmatmul.mubr.msk.f32.gmra.mrb[48].mxu1 %vm5948_vm2, %v6114_v55  ;;  %4824 = vmatprep.subr.bf16.mxu0 %v4823_v49 }
 0x12a   : > { %1497 = vmatprep.mubr.f32.mxu1 %v5910_v17  ;;  %4807 = vmatpush1.bf16.msra.mxu1 %v4806_v4 }
 0x12b   : > { %4353 = vmatmul.mubr.msk.f32.gmra.mrb[46].mxu0 %vm701_vm0, %v5847_v35  ;;  %4808 = vmatprep.subr.bf16.mxu1 %v5484_v0  ;;  %v4835_v0 = vpack.c.bf16 %v333_v50, %v332_v26  ;;  %v703_v26 = vrot.slane %v581_v62, 1  ;;  %v630_v50 = vrot.slane %v581_v62, 7 }
 0x12c   : > { %4355 = vmatprep.mubr.f32.mxu0 %v5881_v57  ;;  %4826 = vmatpush3.bf16.msra.mxu0 %v4823_v49  ;;  %v602_v49 = vld [vmem:[%s5761_s6 + $0xb0] sm:$0xff] }
 0x12d   : > { %1498 = vmatmul.mubr.f32.gmra.mrb[50].mxu1 %v6128_v23  ;;  %4828 = vmatprep.subr.bf16.mxu0 %v4827_v43  ;;  %v662_v4 = vrot.slane %v602_v49, 7 }
 0x12e   : > { %1502 = vmatprep.mubr.f32.mxu1 %v5926_v41  ;;  %4810 = vmatpush1.bf16.msra.mxu1 %v4809_v47  ;;  %v335_v41 = vld [vmem:[#allocation6 + $0x178] sm:$0xff] }
 0x12f   : > { %4356 = vmatmul.mubr.msk.f32.gmra.mrb[48].mxu0 %vm701_vm0, %v5866_v46 }
 0x130   : > { %4358 = vmatprep.mubr.f32.mxu0 %v5900_v10  ;;  %4830 = vmatpush3.bf16.msra.mxu0 %v4827_v43  ;;  %v580_v43 = vld [vmem:[%s5761_s6] sm:$0xff] }
 0x131   : > { %3642 = vmatmul.mubr.msk.f32.gmra.mrb[52].mxu1 %vm5948_vm2, %v6136_v36  ;;  %4832 = vmatprep.subr.bf16.mxu0 %v4831_v37  ;;  %v4839_v36 = vpack.c.bf16 %v335_v41, %v334_v25  ;;  %v629_v48 = vrot.slane %v580_v43, 7  ;;  %v702_v47 = vrot.slane %v580_v43, 1  ;;  %v502_v25 = vld [vmem:[#allocation8 + $0x230] sm:$0xff]  ;;  %v503_v41 = vld [vmem:[#allocation8 + $0x238] sm:$0xff] }
 0x132   : > { %1507 = vmatprep.mubr.f32.mxu1 %v5929_v42  ;;  %v735_v42 = vrot.slane %v602_v49, 1 }
 0x133   : > { %4359 = vmatmul.mubr.msk.f32.gmra.mrb[50].mxu0 %vm701_vm0, %v5885_v59 }
 0x134   : > { %4361 = vmatprep.mubr.f32.mxu0 %v5919_v33  ;;  %4834 = vmatpush3.bf16.msra.mxu0 %v4831_v37  ;;  %v737_v37 = vsel %vm701_vm0, %v735_v42, %v736_v24 }
 0x135   : > { %1508 = vmatmul.mubr.f32.gmra.mrb[54].mxu1 %v6150_v38  ;;  %4836 = vmatprep.subr.bf16.mxu0 %v4835_v0  ;;  %v664_v38 = vsel %vm628_vm1, %v662_v4, %v663_v5 }
 0x136   : > { %1512 = vmatprep.mubr.f32.mxu1 %v602_v49  ;;  %v5246_v49 = vld [vmem:[%s5761_s6 + $0x10] sm:$0xff] }
 0x137   : > { %4362 = vmatmul.mubr.msk.f32.gmra.mrb[52].mxu0 %vm701_vm0, %v5904_v14 }
 0x138   : > { %4364 = vmatprep.mubr.f32.mxu0 %v5941_v56  ;;  %4838 = vmatpush3.bf16.msra.mxu0 %v4835_v0  ;;  %v631_v0 = vsel %vm628_vm1, %v629_v48, %v630_v50  ;;  %v489_v50 = vld [vmem:[#allocation8 + $0x1c8] sm:$0xff] }
 0x139   : > { %3644 = vmatmul.mubr.msk.f32.gmra.mrb[56].mxu1 %vm5948_vm2, %v662_v4  ;;  %4840 = vmatprep.subr.bf16.mxu0 %v4839_v36  ;;  %v4855_v4 = vpack.c.bf16 %v503_v41, %v502_v25  ;;  %v570_v41 = vld [vmem:[#allocation8 + $0x450] sm:$0xff] }
 0x13a   : > { %1517 = vmatprep.mubr.f32.mxu1 %v603_v52  ;;  %v486_v52 = vld [vmem:[#allocation8 + $0x1b0] sm:$0xff] }
 0x13b   : > { %4365 = vmatmul.mubr.msk.f32.gmra.mrb[54].mxu0 %vm701_vm0, %v5923_v39 }
 0x13c   : > { %4367 = vmatprep.mubr.f32.mxu0 %v5962_v19  ;;  %4842 = vmatpush3.bf16.msra.mxu0 %v4839_v36  ;;  %v704_v19 = vsel %vm701_vm0, %v702_v47, %v703_v26  ;;  %v487_v36 = vld [vmem:[#allocation8 + $0x1b8] sm:$0xff]  ;;  %v505_v47 = vld [vmem:[#allocation8 + $0x248] sm:$0xff] }
 0x13d   : > { %1518 = vmatmul.mubr.f32.gmra.mrb[58].mxu1 %v664_v38  ;;  %v4857_v5 = vpack.c.bf16 %v487_v36, %v486_v52  ;;  %v564_v38 = vld [vmem:[#allocation8 + $0x420] sm:$0xff]  ;;  %v571_v52 = vld [vmem:[#allocation8 + $0x458] sm:$0xff] }
 0x13e   : > { %1752 = vmatprep.mubr.f32.mxu1 %v580_v43  ;;  %v565_v43 = vld [vmem:[#allocation8 + $0x428] sm:$0xff]  ;;  %v4959_v36 = vpack.c.bf16 %v571_v52, %v570_v41  ;;  %v448_v41 = vld [vmem:[#allocation8 + $0x80] sm:$0xff] }
 0x13f   : > { %4368 = vmatmul.mubr.msk.f32.gmra.mrb[56].mxu0 %vm701_vm0, %v5945_v60  ;;  %v5247_v60 = vld [vmem:[%s5761_s6 + $0x18] sm:$0xff] }
 0x140   : > { %4370 = vmatprep.mubr.f32.mxu0 %v737_v37  ;;  %v488_v37 = vld [vmem:[#allocation8 + $0x1c0] sm:$0xff] }
 0x141   : > { %3656 = vmatmul.mubr.msk.f32.vlgmr.msra.gmra.mrb[60].mxu1 %vm5948_vm2, %v629_v48  ;;  %v4947_v48 = vpack.c.bf16 %v565_v43, %v564_v38  ;;  %v572_v38 = vld [vmem:[#allocation8 + $0x460] sm:$0xff]  ;;  %v573_v43 = vld [vmem:[#allocation8 + $0x468] sm:$0xff] }
 0x142   : > { %1757 = vmatprep.mubr.f32.mxu1 %v581_v62  ;;  %v504_v62 = vld [vmem:[#allocation8 + $0x240] sm:$0xff] }
 0x143   : > { %4371 = vmatmul.mubr.msk.f32.gmra.mrb[58].mxu0 %vm701_vm0, %v736_v24 }
 0x144   : > { %4405 = vmatprep.mubr.f32.mxu0 %v704_v19 }
 0x145   : > { %1758 = vmatmul.mubr.f32.gmra.mrb[62].mxu1 %v631_v0  ;;  %v4861_v0 = vpack.c.bf16 %v489_v50, %v488_v37  ;;  %v575_v50 = vld [vmem:[#allocation8 + $0x478] sm:$0xff] }
 0x146   : > { %1762 = vmatprep.mubr.f32.mxu1 %v5246_v49 }
 0x147   : > { %4406 = vmatmul.mubr.msk.f32.vlgmr.msra.gmra.mrb[60].mxu0 %vm701_vm0, %v703_v26  ;;  %v4859_v26 = vpack.c.bf16 %v505_v47, %v504_v62 }
 0x148   : > { %4408 = vmatprep.mubr.f32.mxu0 %v5778_v34  ;;  %v5248_v34 = vld [vmem:[%s5761_s6 + $0x28] sm:$0xff] }
 0x149   : > { %3658 = vmatmul.mubr.msk.f32.gmra.mrb[64].mxu1 %vm5948_vm2, %v5937_v51 }
 0x14a   : > { %1767 = vmatprep.mubr.f32.mxu1 %v5247_v60  ;;  %v506_v60 = vld [vmem:[#allocation8 + $0x250] sm:$0xff] }
 0x14b   : > { %4409 = vmatmul.mubr.msk.f32.gmra.mrb[62].mxu0 %vm701_vm0, %v5774_v32  ;;  %v7529_v32 = vld [vmem:[#allocation18_spill] sm:$0xff] }
 0x14c   : > { %4411 = vmatprep.mubr.f32.mxu0 %v5805_v7  ;;  %v7534_v7 = vld [vmem:[#allocation25_spill] sm:$0xff] }
 0x14d   : > { %1768 = vmatmul.mubr.f32.gmra.mrb[66].mxu1 %v5967_v21  ;;  %v483_v21 = vld [vmem:[#allocation8 + $0x198] sm:$0xff] }
 0x14e   : > { %1772 = vmatprep.mubr.f32.mxu1 %v5785_v54  ;;  %v7530_v54 = vld [vmem:[#allocation19_spill] sm:$0xff] }
 0x14f   : > { %4412 = vmatmul.mubr.msk.f32.gmra.mrb[64].mxu0 %vm701_vm0, %v5793_v61  ;;  %v7531_v61 = vld [vmem:[#allocation20_spill] sm:$0xff] }
 0x150   : > { %4414 = vmatprep.mubr.f32.mxu0 %v5824_v18  ;;  %v560_v18 = vld [vmem:[#allocation8 + $0x400] sm:$0xff] }
 0x151   : > { %3660 = vmatmul.mubr.msk.f32.gmra.mrb[68].mxu1 %vm5948_vm2, %v5975_v28 }
 0x152   : > { %1777 = vmatprep.mubr.f32.mxu1 %v5248_v34  ;;  %v507_v34 = vld [vmem:[#allocation8 + $0x258] sm:$0xff] }
 0x153   : > { %4415 = vmatmul.mubr.msk.f32.gmra.mrb[66].mxu0 %vm701_vm0, %v5809_v9  ;;  %v7535_v9 = vld [vmem:[#allocation22_spill] sm:$0xff] }
 0x154   : > { %4417 = vmatprep.mubr.f32.mxu0 %v5843_v31 }
 0x155   : > { %1778 = vmatmul.mubr.f32.gmra.mrb[70].mxu1 %v5989_v58 }
 0x156   : > { %1782 = vmatprep.mubr.f32.mxu1 %v5796_v63  ;;  %v7532_v63 = vld [vmem:[#allocation24_spill] sm:$0xff] }
 0x157   : > { %4418 = vmatmul.mubr.msk.f32.gmra.mrb[68].mxu0 %vm701_vm0, %v5828_v20  ;;  %v561_v20 = vld [vmem:[#allocation8 + $0x408] sm:$0xff] }
 0x158   : > { %4420 = vmatprep.mubr.f32.mxu0 %v5862_v44  ;;  %v4939_v31 = vpack.c.bf16 %v561_v20, %v560_v18  ;;  %v497_v44 = vld [vmem:[#allocation8 + $0x208] sm:$0xff]  ;;  %v508_v18 = vld [vmem:[#allocation8 + $0x260] sm:$0xff] }
 0x159   : > { %3662 = vmatmul.mubr.msk.f32.gmra.mrb[72].mxu1 %vm5948_vm2, %v5994_v8  ;;  %v562_v8 = vld [vmem:[#allocation8 + $0x410] sm:$0xff] }
 0x15a   : > { %1787 = vmatprep.mubr.f32.mxu1 %v5799_v1  ;;  %v7533_v1 = vld [vmem:[#allocation21_spill] sm:$0xff]  ;;  %4940 = vmatprep.subr.bf16.mxu1 %v4939_v31 }
 0x15b   : > { %4421 = vmatmul.mubr.msk.f32.gmra.mrb[70].mxu0 %vm701_vm0, %v5847_v35  ;;  %v496_v35 = vld [vmem:[#allocation8 + $0x200] sm:$0xff]  ;;  %4942 = vmatpush3.bf16.msra.mxu1 %v4939_v31 }
 0x15c   : > { %4423 = vmatprep.mubr.f32.mxu0 %v5881_v57  ;;  %v480_v57 = vld [vmem:[#allocation8 + $0x180] sm:$0xff] }
 0x15d   : > { %1788 = vmatmul.mubr.f32.gmra.mrb[74].mxu1 %v6005_v45  ;;  %v563_v45 = vld [vmem:[#allocation8 + $0x418] sm:$0xff] }
 0x15e   : > { %1792 = vmatprep.mubr.f32.mxu1 %v5812_v11  ;;  %v7536_v11 = vld [vmem:[#allocation23_spill] sm:$0xff] }
 0x15f   : > { %4424 = vmatmul.mubr.msk.f32.gmra.mrb[72].mxu0 %vm701_vm0, %v5866_v46  ;;  %v4843_v46 = vpack.c.bf16 %v497_v44, %v496_v35  ;;  %v509_v35 = vld [vmem:[#allocation8 + $0x268] sm:$0xff]  ;;  %v492_v44 = vld [vmem:[#allocation8 + $0x1e0] sm:$0xff] }
 0x160   : > { %4426 = vmatprep.mubr.f32.mxu0 %v5900_v10 }
 0x161   : > { %3664 = vmatmul.mubr.msk.f32.gmra.mrb[76].mxu1 %vm5948_vm2, %v6010_v53  ;;  %4844 = vmatprep.subr.bf16.mxu0 %v4843_v46  ;;  %v4943_v53 = vpack.c.bf16 %v563_v45, %v562_v8  ;;  %v493_v46 = vld [vmem:[#allocation8 + $0x1e8] sm:$0xff] }
 0x162   : > { %1797 = vmatprep.mubr.f32.mxu1 %v5815_v12 }
 0x163   : > { %4427 = vmatmul.mubr.msk.f32.gmra.mrb[74].mxu0 %vm701_vm0, %v5885_v59  ;;  %v481_v59 = vld [vmem:[#allocation8 + $0x188] sm:$0xff]  ;;  %4944 = vmatprep.subr.bf16.mxu1 %v4943_v53 }
 0x164   : > { %4429 = vmatprep.mubr.f32.mxu0 %v5919_v33  ;;  %v498_v33 = vld [vmem:[#allocation8 + $0x210] sm:$0xff]  ;;  %4946 = vmatpush3.bf16.msra.mxu1 %v4943_v53  ;;  %v569_v53 = vld [vmem:[#allocation8 + $0x448] sm:$0xff] }
 0x165   : > { %1798 = vmatmul.mubr.f32.gmra.mrb[78].mxu1 %v6021_v30  ;;  %4948 = vmatprep.subr.bf16.mxu1 %v4947_v48 }
 0x166   : > { %1802 = vmatprep.mubr.f32.mxu1 %v5831_v22 }
 0x167   : > { %4430 = vmatmul.mubr.msk.f32.gmra.mrb[76].mxu0 %vm701_vm0, %v5904_v14 }
 0x168   : > { %4432 = vmatprep.mubr.f32.mxu0 %v5941_v56  ;;  %v482_v56 = vld [vmem:[#allocation8 + $0x190] sm:$0xff]  ;;  %4950 = vmatpush3.bf16.msra.mxu1 %v4947_v48  ;;  %v4963_v48 = vpack.c.bf16 %v573_v43, %v572_v38 }
 0x169   : > { %3666 = vmatmul.mubr.msk.f32.gmra.mrb[80].mxu1 %vm5948_vm2, %v6028_v40  ;;  %v4849_v58 = vpack.c.bf16 %v483_v21, %v482_v56  ;;  %v501_v40 = vld [vmem:[#allocation8 + $0x228] sm:$0xff]  ;;  %v510_v56 = vld [vmem:[#allocation8 + $0x270] sm:$0xff]  ;;  %v511_v21 = vld [vmem:[#allocation8 + $0x278] sm:$0xff] }
 0x16a   : > { %1807 = vmatprep.mubr.f32.mxu1 %v7529_v32  ;;  %v4863_v32 = vpack.c.bf16 %v507_v34, %v506_v60  ;;  %v4871_v45 = vpack.c.bf16 %v511_v21, %v510_v56 }
 0x16b   : > { %4433 = vmatmul.mubr.msk.f32.gmra.mrb[78].mxu0 %vm701_vm0, %v5923_v39 }
 0x16d   : > { %1808 = vmatmul.mubr.f32.gmra.mrb[82].mxu1 %v6040_v6 }
 0x16e   : > { %1812 = vmatprep.mubr.f32.mxu1 %v7530_v54  ;;  %v490_v54 = vld [vmem:[#allocation8 + $0x1d0] sm:$0xff] }
 0x171   : > { %3668 = vmatmul.mubr.msk.f32.gmra.mrb[84].mxu1 %vm5948_vm2, %v6049_v13 }
 0x172   : > { %1817 = vmatprep.mubr.f32.mxu1 %v7531_v61  ;;  %v491_v61 = vld [vmem:[#allocation8 + $0x1d8] sm:$0xff] }
 0x175   : > { %1818 = vmatmul.mubr.f32.gmra.mrb[86].mxu1 %v7532_v63  ;;  %v4865_v63 = vpack.c.bf16 %v491_v61, %v490_v54  ;;  %v513_v54 = vld [vmem:[#allocation8 + $0x288] sm:$0xff] }
 0x176   : > { %1822 = vmatprep.mubr.f32.mxu1 %v7533_v1 }
 0x179   : > { %3670 = vmatmul.mubr.msk.f32.gmra.mrb[88].mxu1 %vm5948_vm2, %v7534_v7 }
 0x17a   : > { %1827 = vmatprep.mubr.f32.mxu1 %v7535_v9  ;;  %v566_v9 = vld [vmem:[#allocation8 + $0x430] sm:$0xff] }
 0x17d   : > { %1828 = vmatmul.mubr.f32.gmra.mrb[90].mxu1 %v6084_v27  ;;  %v484_v27 = vld [vmem:[#allocation8 + $0x1a0] sm:$0xff] }
 0x17e   : > { %1832 = vmatprep.mubr.f32.mxu1 %v7536_v11  ;;  %v567_v11 = vld [vmem:[#allocation8 + $0x438] sm:$0xff] }
 0x17f   : > { %v4951_v31 = vpack.c.bf16 %v567_v11, %v566_v9 }
 0x181   : > { %3672 = vmatmul.mubr.msk.f32.gmra.mrb[92].mxu1 %vm5948_vm2, %v6092_v29  ;;  %v485_v29 = vld [vmem:[#allocation8 + $0x1a8] sm:$0xff]  ;;  %4952 = vmatprep.subr.bf16.mxu1 %v4951_v31 }
 0x182   : > { %1837 = vmatprep.mubr.f32.mxu1 %v5891_v2  ;;  %v4845_v2 = vpack.c.bf16 %v481_v59, %v480_v57  ;;  %4954 = vmatpush3.bf16.msra.mxu1 %v4951_v31 }
 0x184   : > { %v6297_v12 = vpop.f32.mrb[0].mxu1  ;;  %4846 = vmatpush3.bf16.msra.mxu0 %v4845_v2  ;;  %v4867_v2 = vpack.c.bf16 %v509_v35, %v508_v18 }
 0x185   : > { %v6299_v22 = vpop.f32.mrb[1].mxu1  ;;  %1838 = vmatmul.mubr.f32.gmra.mrb[94].mxu1 %v6106_v15 }
 0x186   : > { %1842 = vmatprep.mubr.f32.mxu1 %v5907_v16  ;;  %v499_v16 = vld [vmem:[#allocation8 + $0x218] sm:$0xff] }
 0x187   : > { %v4847_v51 = vpack.c.bf16 %v499_v16, %v498_v33  ;;  %v4869_v33 = vpack.c.bf16 %v493_v46, %v492_v44 }
 0x188   : > { %v6303_v10 = vpop.f32.mrb[2].mxu1 }
 0x189   : > { %3674 = vmatmul.mubr.msk.f32.gmra.mrb[96].mxu1 %vm5948_vm2, %v6114_v55  ;;  %v6308_v14 = vpop.f32.mrb[3].mxu1  ;;  %4848 = vmatprep.subr.bf16.mxu0 %v4847_v51 }
 0x18a   : > { %1847 = vmatprep.mubr.f32.mxu1 %v5910_v17  ;;  %4850 = vmatpush3.bf16.msra.mxu0 %v4849_v58  ;;  %v500_v17 = vld [vmem:[#allocation8 + $0x220] sm:$0xff] }
 0x18b   : > { %v4851_v13 = vpack.c.bf16 %v501_v40, %v500_v17  ;;  %v568_v58 = vld [vmem:[#allocation8 + $0x440] sm:$0xff]  ;;  %v494_v17 = vld [vmem:[#allocation8 + $0x1f0] sm:$0xff] }
 0x18c   : > { %v6311_v39 = vpop.f32.mrb[4].mxu1 }
 0x18d   : > { %1848 = vmatmul.mubr.f32.gmra.mrb[98].mxu1 %v6128_v23  ;;  %v6314_v28 = vpop.f32.mrb[5].mxu1  ;;  %v4853_v23 = vpack.c.bf16 %v485_v29, %v484_v27  ;;  %4852 = vmatprep.subr.bf16.mxu0 %v4851_v13  ;;  %v4955_v27 = vpack.c.bf16 %v569_v53, %v568_v58 }
 0x18f   : > { %4854 = vmatpush3.bf16.msra.mxu0 %v4853_v23  ;;  %4956 = vmatprep.subr.bf16.mxu1 %v4955_v27 }
 0x190   : > { %v6316_v30 = vpop.f32.mrb[6].mxu1  ;;  %4856 = vmatprep.subr.bf16.mxu0 %v4855_v4  ;;  %4958 = vmatpush3.bf16.msra.mxu1 %v4955_v27 }
 0x191   : > { %v6318_v6 = vpop.f32.mrb[7].mxu1  ;;  %4960 = vmatprep.subr.bf16.mxu1 %v4959_v36 }
 0x193   : > { %4858 = vmatpush3.bf16.msra.mxu0 %v4857_v5 }
 0x194   : > { %v6320_v15 = vpop.f32.mrb[8].mxu1  ;;  %4860 = vmatprep.subr.bf16.mxu0 %v4859_v26  ;;  %4962 = vmatpush3.bf16.msra.mxu1 %v4959_v36  ;;  %v574_v26 = vld [vmem:[#allocation8 + $0x470] sm:$0xff] }
 0x195   : > { %v6322_v55 = vpop.f32.mrb[9].mxu1  ;;  %4964 = vmatprep.subr.bf16.mxu1 %v4963_v48  ;;  %v4967_v60 = vpack.c.bf16 %v575_v50, %v574_v26 }
 0x197   : > { %4862 = vmatpush3.bf16.msra.mxu0 %v4861_v0 }
 0x198   : > { %v6324_v42 = vpop.f32.mrb[10].mxu1  ;;  %4864 = vmatprep.subr.bf16.mxu0 %v4863_v32  ;;  %4966 = vmatpush3.bf16.msra.mxu1 %v4963_v48  ;;  %v512_v32 = vld [vmem:[#allocation8 + $0x280] sm:$0xff] }
 0x199   : > { %v6326_v24 = vpop.f32.mrb[11].mxu1  ;;  %4968 = vmatprep.subr.bf16.mxu1 %v4967_v60 }
 0x19b   : > { %4866 = vmatpush3.bf16.msra.mxu0 %v4865_v63  ;;  %v6359_v63 = vpack.c.bf16 %v513_v54, %v512_v32 }
 0x19c   : > { %v6328_v19 = vpop.f32.mrb[12].mxu1  ;;  %4868 = vmatprep.subr.bf16.mxu0 %v4867_v2  ;;  %4970 = vmatpush3.bf16.msra.mxu1 %v4967_v60 }
 0x19d   : > { %v6330_v49 = vpop.f32.mrb[13].mxu1 }
 0x19f   : > { %4870 = vmatpush3.bf16.msra.mxu0 %v4869_v33 }
 0x1a0   : > { %v6332_v1 = vpop.f32.mrb[14].mxu1  ;;  %4872 = vmatprep.subr.bf16.mxu0 %v4871_v45 }
 0x1a1   : > { %v6334_v7 = vpop.f32.mrb[15].mxu1 }
 0x1a2   : > { %v1033_v20 = vpop.f32.mrb[0].mxu0 }
 0x1a3   : > { %v6337_v57 = vadd.f32 %v6299_v22, %v1033_v20  ;;  %v1035_v59 = vpop.f32.mrb[1].mxu0  ;;  %v495_v22 = vld [vmem:[#allocation8 + $0x1f8] sm:$0xff] }
 0x1a4   : > { %v6339_v16 = vpop.f32.mrb[16].mxu1  ;;  %v4873_v29 = vpack.c.bf16 %v495_v22, %v494_v17 }
 0x1a5   : > { %v6341_v51 = vpop.f32.mrb[17].mxu1 }
 0x1a6   : > { %v1038_v8 = vpop.f32.mrb[2].mxu0  ;;  %4874 = vmatpush3.bf16.msra.mxu0 %v4873_v29 }
 0x1a7   : > { %v6344_v40 = vadd.f32 %v6297_v12, %v1038_v8  ;;  %v1040_v13 = vpop.f32.mrb[3].mxu0  ;;  %4876 = vmatprep.subr.bf16.mxu0 %v6359_v63 }
 0x1a8   : > { %v6346_v23 = vpop.f32.mrb[18].mxu1 }
 0x1a9   : > { %v6348_v25 = vpop.f32.mrb[19].mxu1 }
 0x1aa   : > { %v1043_v4 = vpop.f32.mrb[4].mxu0 }
 0x1ab   : > { %v6351_v5 = vadd.f32 %v6308_v14, %v1043_v4  ;;  %v1045_v12 = vpop.f32.mrb[5].mxu0 }
 0x1ae   : > { %v1048_v62 = vpop.f32.mrb[6].mxu0 }
 0x1af   : > { %v6354_v47 = vadd.f32 %v6303_v10, %v1048_v62  ;;  %v1050_v37 = vpop.f32.mrb[7].mxu0 }
 0x1b2   : > { %v1053_v0 = vpop.f32.mrb[8].mxu0 }
 0x1b3   : > { %v6357_v14 = vadd.f32 %v6314_v28, %v1053_v0  ;;  %v1055_v34 = vpop.f32.mrb[9].mxu0 }
 0x1b6   : > { %v1058_v61 = vpop.f32.mrb[10].mxu0 }
 0x1b7   : > { %v6362_v10 = vadd.f32 %v6311_v39, %v1058_v61  ;;  %v1060_v9 = vpop.f32.mrb[11].mxu0 }
 0x1ba   : > { %v1063_v11 = vpop.f32.mrb[12].mxu0 }
 0x1bb   : > { %v6366_v18 = vadd.f32 %v6318_v6, %v1063_v11  ;;  %v1065_v28 = vpop.f32.mrb[13].mxu0 }
 0x1be   : > { %v1068_v20 = vpop.f32.mrb[14].mxu0 }
 0x1bf   : > { %v6369_v31 = vadd.f32 %v6316_v30, %v1068_v20  ;;  %v1070_v35 = vpop.f32.mrb[15].mxu0 }
 0x1c2   : > { %v1073_v44 = vpop.f32.mrb[16].mxu0 }
 0x1c3   : > { %v6372_v46 = vadd.f32 %v6322_v55, %v1073_v44  ;;  %v1075_v59 = vpop.f32.mrb[17].mxu0 }
 0x1c4   : > { %v6374_v39 = vpop.f32.mrb[20].mxu1 }
 0x1c5   : > { %v1426_v2 = vpop.f32.mrb[21].mxu1 }
 0x1c6   : > { %v1078_v33 = vpop.f32.mrb[18].mxu0 }
 0x1c7   : > { %v6377_v56 = vadd.f32 %v6320_v15, %v1078_v33  ;;  %v1080_v6 = vpop.f32.mrb[19].mxu0  ;;  %v449_v15 = vld [vmem:[#allocation8 + $0x88] sm:$0xff] }
 0x1c8   : > { %v1429_v21 = vpop.f32.mrb[22].mxu1  ;;  %v4971_v4 = vpack.c.bf16 %v449_v15, %v448_v41 }
 0x1c9   : > { %v1431_v58 = vpop.f32.mrb[23].mxu1 }
 0x1ca   : > { %v1083_v8 = vpop.f32.mrb[20].mxu0  ;;  %4972 = vmatprep.subr.bf16.mxu1 %v4971_v4 }
 0x1cb   : > { %v6380_v30 = vadd.f32 %v6326_v24, %v1083_v8  ;;  %v1085_v45 = vpop.f32.mrb[21].mxu0 }
 0x1cc   : > { %v1434_v53 = vpop.f32.mrb[24].mxu1 }
 0x1cd   : > { %v1436_v17 = vpop.f32.mrb[25].mxu1 }
 0x1ce   : > { %v1088_v55 = vpop.f32.mrb[22].mxu0 }
 0x1cf   : > { %v6383_v22 = vadd.f32 %v6324_v42, %v1088_v55  ;;  %v1090_v13 = vpop.f32.mrb[23].mxu0 }
 0x1d0   : > { %v1439_v27 = vpop.f32.mrb[26].mxu1 }
 0x1d1   : > { %v1441_v29 = vpop.f32.mrb[27].mxu1 }
 0x1d2   : > { %v1093_v52 = vpop.f32.mrb[24].mxu0 }
 0x1d3   : > { %v6386_v36 = vadd.f32 %v6330_v49, %v1093_v52  ;;  %v1095_v12 = vpop.f32.mrb[25].mxu0 }
 0x1d4   : > { %v1444_v24 = vpop.f32.mrb[28].mxu1 }
 0x1d5   : > { %v1446_v38 = vpop.f32.mrb[29].mxu1 }
 0x1d6   : > { %v1098_v43 = vpop.f32.mrb[26].mxu0 }
 0x1d7   : > { %v6389_v62 = vadd.f32 %v6328_v19, %v1098_v43  ;;  %v1100_v42 = vpop.f32.mrb[27].mxu0 }
 0x1d8   : > { %v1449_v48 = vpop.f32.mrb[30].mxu1 }
 0x1d9   : > { %v1451_v37 = vpop.f32.mrb[31].mxu1 }
 0x1da   : > { %v1103_v26 = vpop.f32.mrb[28].mxu0 }
 0x1db   : > { %v6392_v50 = vadd.f32 %v6334_v7, %v1103_v26  ;;  %v1105_v0 = vpop.f32.mrb[29].mxu0 }
 0x1dc   : > { %v1454_v60 = vpop.f32.mrb[32].mxu1 }
 0x1dd   : > { %v1456_v34 = vpop.f32.mrb[33].mxu1 }
 0x1de   : > { %v1108_v49 = vpop.f32.mrb[30].mxu0 }
 0x1df   : > { %v6395_v32 = vadd.f32 %v6332_v1, %v1108_v49  ;;  %v1110_v54 = vpop.f32.mrb[31].mxu0 }
 0x1e0   : > { %v1459_v61 = vpop.f32.mrb[34].mxu1 }
 0x1e1   : > { %v1461_v9 = vpop.f32.mrb[35].mxu1 }
 0x1e2   : > { %v1113_v11 = vpop.f32.mrb[32].mxu0 }
 0x1e3   : > { %v6398_v19 = vadd.f32 %v6341_v51, %v1113_v11  ;;  %v1115_v28 = vpop.f32.mrb[33].mxu0 }
 0x1e4   : > { %v1464_v20 = vpop.f32.mrb[36].mxu1 }
 0x1e5   : > { %v1466_v35 = vpop.f32.mrb[37].mxu1 }
 0x1e6   : > { %v1118_v44 = vpop.f32.mrb[34].mxu0 }
 0x1e7   : > { %v6401_v7 = vadd.f32 %v6339_v16, %v1118_v44  ;;  %v1120_v59 = vpop.f32.mrb[35].mxu0 }
 0x1e8   : > { %v1469_v2 = vpop.f32.mrb[38].mxu1 }
 0x1e9   : > { %v1471_v33 = vpop.f32.mrb[39].mxu1 }
 0x1ea   : > { %v1123_v6 = vpop.f32.mrb[36].mxu0 }
 0x1eb   : > { %v6404_v1 = vadd.f32 %v6348_v25, %v1123_v6  ;;  %v1125_v58 = vpop.f32.mrb[37].mxu0 }
 0x1ec   : > { %v1474_v8 = vpop.f32.mrb[40].mxu1 }
 0x1ed   : > { %v1476_v45 = vpop.f32.mrb[41].mxu1 }
 0x1ee   : > { %v1128_v17 = vpop.f32.mrb[38].mxu0 }
 0x1ef   : > { %v6407_v51 = vadd.f32 %v6346_v23, %v1128_v17  ;;  %v1130_v55 = vpop.f32.mrb[39].mxu0 }
 0x1f0   : > { %v1479_v13 = vpop.f32.mrb[42].mxu1 }
 0x1f1   : > { %v1481_v29 = vpop.f32.mrb[43].mxu1 }
 0x1f2   : > { %v4345_v41 = vpop.f32.mrb[40].mxu0 }
 0x1f3   : > { %v6409_v16 = vadd.f32 %v4345_v41, %v1429_v21  ;;  %v1589_v15 = vpop.f32.mrb[41].mxu0 }
 0x1f4   : > { %v1484_v52 = vpop.f32.mrb[44].mxu1  ;;  %v6412_v4 = vadd.f32 %v1589_v15, %v6374_v39 }
 0x1f5   : > { %v1486_v25 = vpop.f32.mrb[45].mxu1 }
 0x1f6   : > { %v4348_v12 = vpop.f32.mrb[42].mxu0 }
 0x1f7   : > { %v6414_v38 = vadd.f32 %v4348_v12, %v1439_v27  ;;  %v1599_v43 = vpop.f32.mrb[43].mxu0 }
 0x1f8   : > { %v1489_v42 = vpop.f32.mrb[46].mxu1  ;;  %v6416_v37 = vadd.f32 %v1599_v43, %v1434_v53 }
 0x1f9   : > { %v1491_v23 = vpop.f32.mrb[47].mxu1 }
 0x1fa   : > { %v4351_v26 = vpop.f32.mrb[44].mxu0 }
 0x1fb   : > { %v6418_v0 = vadd.f32 %v4351_v26, %v1449_v48  ;;  %v1609_v34 = vpop.f32.mrb[45].mxu0 }
 0x1fc   : > { %v1494_v21 = vpop.f32.mrb[48].mxu1  ;;  %v6420_v49 = vadd.f32 %v1609_v34, %v1444_v24 }
 0x1fd   : > { %v1496_v54 = vpop.f32.mrb[49].mxu1 }
 0x1fe   : > { %v4354_v9 = vpop.f32.mrb[46].mxu0 }
 0x1ff   : > { %v6422_v39 = vadd.f32 %v4354_v9, %v1459_v61  ;;  %v1619_v11 = vpop.f32.mrb[47].mxu0 }
 0x200   : > { %v1499_v28 = vpop.f32.mrb[50].mxu1  ;;  %v6424_v27 = vadd.f32 %v1619_v11, %v1454_v60 }
 0x201   : > { %v1501_v35 = vpop.f32.mrb[51].mxu1 }
 0x202   : > { %v4357_v44 = vpop.f32.mrb[48].mxu0 }
 0x203   : > { %v6426_v53 = vadd.f32 %v4357_v44, %v1469_v2  ;;  %v1629_v59 = vpop.f32.mrb[49].mxu0 }
 0x204   : > { %v1504_v33 = vpop.f32.mrb[52].mxu1  ;;  %v6428_v48 = vadd.f32 %v1629_v59, %v1464_v20 }
 0x205   : > { %v1506_v6 = vpop.f32.mrb[53].mxu1 }
 0x206   : > { %v4360_v58 = vpop.f32.mrb[50].mxu0 }
 0x207   : > { %v6430_v24 = vadd.f32 %v4360_v58, %v1479_v13  ;;  %v1639_v45 = vpop.f32.mrb[51].mxu0 }
 0x208   : > { %v1509_v17 = vpop.f32.mrb[54].mxu1  ;;  %v6432_v61 = vadd.f32 %v1639_v45, %v1474_v8 }
 0x209   : > { %v1511_v55 = vpop.f32.mrb[55].mxu1 }
 0x20a   : > { %v4363_v29 = vpop.f32.mrb[52].mxu0 }
 0x20b   : > { %v6434_v60 = vadd.f32 %v4363_v29, %v1489_v42  ;;  %v1649_v41 = vpop.f32.mrb[53].mxu0 }
 0x20c   : > { %v1514_v2 = vpop.f32.mrb[56].mxu1  ;;  %v6436_v15 = vadd.f32 %v1649_v41, %v1484_v52 }
 0x20d   : > { %v1516_v25 = vpop.f32.mrb[57].mxu1 }
 0x20e   : > { %v4366_v20 = vpop.f32.mrb[54].mxu0 }
 0x20f   : > { %v6438_v12 = vadd.f32 %v4366_v20, %v1499_v28  ;;  %v1659_v43 = vpop.f32.mrb[55].mxu0 }
 0x210   : > { %v1519_v13 = vpop.f32.mrb[58].mxu1  ;;  %v6440_v23 = vadd.f32 %v1659_v43, %v1494_v21 }
 0x211   : > { %v1521_v26 = vpop.f32.mrb[59].mxu1 }
 0x212   : > { %v4369_v8 = vpop.f32.mrb[56].mxu0 }
 0x213   : > { %v6442_v34 = vadd.f32 %v4369_v8, %v1509_v17  ;;  %v1669_v54 = vpop.f32.mrb[57].mxu0  ;;  %v6453_v17 = vstv %s3584_s11  ;;  %s7361_s11 = scalar_lea.sflag [#allocation5], %s283_s12 }
 0x214   : > { %v6444_v42 = vadd.f32 %v1669_v54, %v1504_v33  ;;  %v1754_v9 = vpop.f32.mrb[60].mxu1  ;;  %vm2095_vm3 = vcmp.ge.s32.totalorder %v6453_v17, 0  ;;  %vm2105_vm4 = vcmp.lt.s32.totalorder %v6453_v17, 16 }
 0x215   : > { %v1755_v52 = vadd.f32 %v1754_v9, %v6337_v57  ;;  %v1756_v11 = vpop.f32.mrb[61].mxu1  ;;  %v6458_v57 = vld [vmem:[%s7424_s2] ss:$0 sm:$0xff]  ;;  %vm6472_vm5 = vmand %vm2095_vm3, %vm2105_vm4 }
 0x216   : > { %v4372_v35 = vpop.f32.mrb[58].mxu0 }
 0x217   : > { %v6448_v44 = vadd.f32 %v4372_v35, %v1519_v13  ;;  %v1679_v28 = vpop.f32.mrb[59].mxu0  ;;  %v2086_v13 = vadd.s32 1, %v6453_v17 }
 0x218   : > { %v6450_v59 = vadd.f32 %v1679_v28, %v1514_v2  ;;  %v1759_v21 = vpop.f32.mrb[62].mxu1 }
 0x219   : > { %v1760_v6 = vadd.f32 %v1759_v21, %v6344_v40  ;;  %v1761_v58 = vpop.f32.mrb[63].mxu1  ;;  %vm2096_vm6 = vcmp.ge.s32.totalorder %v2086_v13, 0  ;;  %vm2106_vm7 = vcmp.lt.s32.totalorder %v2086_v13, 16  ;;  %v515_v13 = vld [vmem:[#allocation8 + $0x298] sm:$0xff] }
 0x21a   : > { %v4407_v45 = vpop.f32.mrb[60].mxu0  ;;  %vm6498_vm8 = vmand %vm2096_vm6, %vm2106_vm7 }
 0x21b   : > { %v1925_v33 = vadd.f32 %v4407_v45, %v1760_v6  ;;  %v1919_v55 = vpop.f32.mrb[61].mxu0  ;;  %v2087_v45 = vadd.s32 2, %v6453_v17 }
 0x21c   : > { %v1764_v29 = vpop.f32.mrb[64].mxu1  ;;  %v1920_v41 = vadd.f32 %v1919_v55, %v1755_v52 }
 0x21d   : > { %v2019_v25 = vadd.f32 %v1925_v33, %v6409_v16  ;;  %v1765_v2 = vadd.f32 %v1764_v29, %v6351_v5  ;;  %v1766_v20 = vpop.f32.mrb[65].mxu1  ;;  %v7539_v5 = vmov 0  ;;  %vm2097_vm9 = vcmp.ge.s32.totalorder %v2087_v45, 0 }
 0x21e   : > { %v2018_v40 = vadd.f32 %v1920_v41, %v6412_v4  ;;  %v4410_v43 = vpop.f32.mrb[62].mxu0  ;;  %v7540_v5 = vsel %vm6472_vm5, 4294967295, %v7539_v5  ;;  %vm2107_vm10 = vcmp.lt.s32.totalorder %v2087_v45, 16 }
 0x21f   : > { %v6467_v26 = vadd.f32 %v6458_v57, %v2019_v25  ;;  %v1929_v8 = vpop.f32.mrb[63].mxu0  ;;  %7541 = vst [vmem:[#allocation20_spill] sm:$0xff] %v7540_v5  ;;  %vm6554_vm11 = vmand %vm2097_vm9, %vm2107_vm10 }
 0x220   : > { %v6470_v54 = vadd.f32 %v6458_v57, %v2018_v40  ;;  %v1769_v16 = vpop.f32.mrb[66].mxu1  ;;  %v1930_v9 = vadd.f32 %v1929_v8, %v1765_v2  ;;  %v7544_v40 = vmov 0 }
 0x221   : > { %7537 = vst [vmem:[#allocation18_spill] sm:$0xff] %v6467_v26  ;;  %v7450_v52 = vmax.f32 %v6467_v26, 0.0  ;;  %v1770_v4 = vadd.f32 %v1769_v16, %v6354_v47  ;;  %v1771_v11 = vpop.f32.mrb[67].mxu1  ;;  %v7545_v40 = vsel %vm6498_vm8, 4294967295, %v7544_v40  ;;  %v434_v26 = vld [vmem:[#allocation8 + $0x10] sm:$0xff] }
 0x222   : > { %7538 = vst [vmem:[#allocation19_spill] sm:$0xff] %v6470_v54  ;;  %v7452_v35 = vmax.f32 %v6470_v54, 0.0  ;;  %v2020_v28 = vadd.f32 %v1930_v9, %v6416_v37  ;;  %v4413_v21 = vpop.f32.mrb[64].mxu0  ;;  %7546 = vst [vmem:[#allocation25_spill] sm:$0xff] %v7545_v40 }
 0x223   : > { %v1935_v6 = vadd.f32 %v4410_v43, %v1770_v4  ;;  %v1939_v58 = vpop.f32.mrb[65].mxu0  ;;  %v6485_v33 = vsel %vm6472_vm5, %v7450_v52, 0.0  ;;  %v514_v43 = vld [vmem:[#allocation8 + $0x290] sm:$0xff] }
 0x224   : > { %7542 = vst [vmem:[#allocation24_spill] sm:$0xff] %v6485_v33  ;;  %v2046_v47 = vadd.f32 %v6458_v57, %v2020_v28  ;;  %v1774_v55 = vpop.f32.mrb[68].mxu1  ;;  %v6492_v37 = vsel %vm6472_vm5, %v7452_v35, 0.0  ;;  %v2166_v29 = vrot.slane %v6485_v33, 7  ;;  %v7454_v41 = vrot.slane %v6485_v33, 1  ;;  %v516_v35 = vld [vmem:[#allocation8 + $0x2a0] sm:$0xff] }
 0x225   : > { %7543 = vst [vmem:[#allocation21_spill] sm:$0xff] %v6492_v37  ;;  %v2021_v25 = vadd.f32 %v1935_v6, %v6414_v38  ;;  %v1775_v2 = vadd.f32 %v1774_v55, %v6357_v14  ;;  %v1776_v20 = vpop.f32.mrb[69].mxu1  ;;  %v7451_v8 = vrot.slane %v6492_v37, 7  ;;  %v2225_v4 = vrot.slane %v6492_v37, 1  ;;  %v519_v33 = vld [vmem:[#allocation8 + $0x2b8] sm:$0xff] }
 0x226   : > { %v6503_v16 = vmax.f32 %v2046_v47, 0.0  ;;  %v6505_v9 = vpop.f32.mrb[66].mxu0  ;;  %v4879_v55 = vpack.c.bf16 %v515_v13, %v514_v43 }
 0x227   : > { %v2047_v11 = vadd.f32 %v6458_v57, %v2021_v25  ;;  %v1940_v38 = vadd.f32 %v1939_v58, %v1775_v2  ;;  %v1949_v28 = vpop.f32.mrb[67].mxu0  ;;  %v6512_v14 = vsel %vm628_vm1, %v7451_v8, %v2166_v29  ;;  %v6525_v58 = vsel %vm701_vm0, %v2225_v4, %v7454_v41 }
 0x228   : > { %7547 = vst [vmem:[#allocation22_spill] sm:$0xff] %v6503_v16  ;;  %7548 = vst [vmem:[#allocation23_spill] sm:$0xff] %v6512_v14  ;;  %v1779_v6 = vpop.f32.mrb[70].mxu1  ;;  %v6517_v47 = vsel %vm6498_vm8, %v6503_v16, 0.0  ;;  %3685 = vmatprep.mubr.msk.f32.mxu0 %vm6498_vm8, %v6503_v16  ;;  %v517_v16 = vld [vmem:[#allocation8 + $0x2a8] sm:$0xff] }
 0x229   : > { %7549 = vst [vmem:[#allocation26_spill] sm:$0xff] %v6525_v58  ;;  %v6527_v25 = vmax.f32 %v2047_v11, 0.0  ;;  %v2022_v29 = vadd.f32 %v1940_v38, %v6420_v49  ;;  %v1780_v2 = vadd.f32 %v1779_v6, %v6362_v10  ;;  %v1781_v20 = vpop.f32.mrb[71].mxu1  ;;  %v6532_v52 = vrot.slane %v6517_v47, 7 }
 0x22a   : > { %v6534_v8 = vpop.f32.mrb[68].mxu0  ;;  %v7552_v11 = vmov 0  ;;  %v2088_v38 = vadd.s32 3, %v6453_v17  ;;  %v4883_v41 = vpack.c.bf16 %v517_v16, %v516_v35 }
 0x22b   : > { %7550 = vst [vmem:[#allocation27_spill] sm:$0xff] %v6527_v25  ;;  %7551 = vst [vmem:[#allocation28_spill] sm:$0xff] %v6532_v52  ;;  %v2048_v43 = vadd.f32 %v6458_v57, %v2022_v29  ;;  %v1945_v13 = vadd.f32 %v4413_v21, %v1780_v2  ;;  %3687 = vmatmul.mubr.msk.f32.vlgmr.msra.gmra.mrb[80].mxu0 %vm5948_vm2, %v6532_v52  ;;  %v6543_v49 = vsel %vm6498_vm8, %v6527_v25, 0.0  ;;  %v6545_v10 = vpop.f32.mrb[69].mxu0  ;;  %v7553_v11 = vsel %vm6554_vm11, 4294967295, %v7552_v11 }
 0x22c   : > { %v1784_v4 = vpop.f32.mrb[72].mxu1  ;;  %3688 = vmatprep.mubr.msk.f32.mxu0 %vm6498_vm8, %v6527_v25  ;;  %4878 = vmatpush3.bf16.msra.mxu0 %v6359_v63  ;;  %v2169_v21 = vrot.slane %v6543_v49, 7  ;;  %7554 = vst [vmem:[#allocation29_spill] sm:$0xff] %v7553_v11  ;;  %v518_v63 = vld [vmem:[#allocation8 + $0x2b0] sm:$0xff]  ;;  %vm2098_vm12 = vcmp.ge.s32.totalorder %v2088_v38, 0  ;;  %vm2108_vm13 = vcmp.lt.s32.totalorder %v2088_v38, 16 }
 0x22d   : > { %v6559_v6 = vmax.f32 %v2048_v43, 0.0  ;;  %v2023_v29 = vadd.f32 %v1945_v13, %v6418_v0  ;;  %v1785_v2 = vadd.f32 %v1784_v4, %v6366_v18  ;;  %v1786_v20 = vpop.f32.mrb[73].mxu1  ;;  %4880 = vmatprep.subr.bf16.mxu0 %v4879_v55  ;;  %v4887_v16 = vpack.c.bf16 %v519_v33, %v518_v63  ;;  %v521_v33 = vld [vmem:[#allocation8 + $0x2c8] sm:$0xff]  ;;  %vm6604_vm14 = vmand %vm2098_vm12, %vm2108_vm13 }
 0x22e   : > { %v6565_v45 = vsel %vm628_vm1, %v6532_v52, %v2169_v21  ;;  %v6567_v58 = vpop.f32.mrb[70].mxu0  ;;  %v432_v20 = vld [vmem:[#allocation8] sm:$0xff] }
 0x22f   : > { %7555 = vst [vmem:[#allocation30_spill] sm:$0xff] %v6559_v6  ;;  %7556 = vst [vmem:[#allocation31_spill] sm:$0xff] %v6565_v45  ;;  %v2049_v25 = vadd.f32 %v6458_v57, %v2023_v29  ;;  %v1950_v40 = vadd.f32 %v1949_v28, %v1785_v2  ;;  %2533 = vmatmul.mubr.f32.gmra.mrb[82].mxu0 %v6565_v45  ;;  %v2129_v18 = vsel %vm6554_vm11, %v6559_v6, 0.0  ;;  %v6574_v0 = vpop.f32.mrb[71].mxu0  ;;  %v520_v2 = vld [vmem:[#allocation8 + $0x2c0] sm:$0xff]  ;;  %v433_v45 = vld [vmem:[#allocation8 + $0x8] sm:$0xff] }
 0x230   : > { %v1789_v35 = vpop.f32.mrb[74].mxu1  ;;  %3689 = vmatprep.mubr.msk.f32.mxu0 %vm6554_vm11, %v6559_v6  ;;  %4882 = vmatpush3.bf16.msra.mxu0 %v4879_v55  ;;  %v6583_v21 = vrot.slane %v2129_v18, 7 }
 0x231   : > { %v6579_v43 = vmax.f32 %v2049_v25, 0.0  ;;  %v2024_v28 = vadd.f32 %v1950_v40, %v6424_v27  ;;  %v1790_v13 = vadd.f32 %v1789_v35, %v6369_v31  ;;  %v1791_v4 = vpop.f32.mrb[75].mxu1  ;;  %4884 = vmatprep.subr.bf16.mxu0 %v4883_v41  ;;  %v450_v40 = vld [vmem:[#allocation8 + $0x90] sm:$0xff]  ;;  %v451_v25 = vld [vmem:[#allocation8 + $0x98] sm:$0xff]  ;;  %v2231_v35 = vrot.slane %v2129_v18, 1 }
 0x232   : > { %7558 = vst [vmem:[#allocation33_spill] sm:$0xff] %v6583_v21  ;;  %v6585_v29 = vpop.f32.mrb[72].mxu0  ;;  %v2089_v4 = vadd.s32 4, %v6453_v17  ;;  %v4973_v18 = vpack.c.bf16 %v433_v45, %v432_v20  ;;  %v4975_v5 = vpack.c.bf16 %v451_v25, %v450_v40  ;;  %v522_v20 = vld [vmem:[#allocation8 + $0x2d0] sm:$0xff] }
 0x233   : > { %7557 = vst [vmem:[#allocation32_spill] sm:$0xff] %v6579_v43  ;;  %v2050_v55 = vadd.f32 %v6458_v57, %v2024_v28  ;;  %v1955_v6 = vadd.f32 %v6505_v9, %v1790_v13  ;;  %3691 = vmatmul.mubr.msk.f32.gmra.mrb[84].mxu0 %vm5948_vm2, %v6583_v21  ;;  %v2130_v31 = vsel %vm6554_vm11, %v6579_v43, 0.0  ;;  %v6595_v27 = vpop.f32.mrb[73].mxu0  ;;  %v7560_v13 = vmov 0 }
 0x234   : > { %v1794_v63 = vpop.f32.mrb[76].mxu1  ;;  %3692 = vmatprep.mubr.msk.f32.mxu0 %vm6554_vm11, %v6579_v43  ;;  %v6600_v9 = vrot.slane %v2130_v31, 1  ;;  %v2172_v28 = vrot.slane %v2130_v31, 7  ;;  %v7561_v13 = vsel %vm6604_vm14, 4294967295, %v7560_v13  ;;  %4886 = vmatpush3.bf16.msra.mxu0 %v4883_v41  ;;  %v435_v31 = vld [vmem:[#allocation8 + $0x18] sm:$0xff]  ;;  %vm2099_vm15 = vcmp.ge.s32.totalorder %v2089_v4, 0 }
 0x235   : > { %7562 = vst [vmem:[#allocation35_spill] sm:$0xff] %v7561_v13  ;;  %v6609_v52 = vmax.f32 %v2050_v55, 0.0  ;;  %v2025_v14 = vadd.f32 %v1955_v6, %v6422_v39  ;;  %v1795_v11 = vadd.f32 %v1794_v63, %v6372_v46  ;;  %v1796_v43 = vpop.f32.mrb[77].mxu1  ;;  %4888 = vmatprep.subr.bf16.mxu0 %v4887_v16  ;;  %v4891_v55 = vpack.c.bf16 %v521_v33, %v520_v2  ;;  %v452_v39 = vld [vmem:[#allocation8 + $0xa0] sm:$0xff]  ;;  %v523_v63 = vld [vmem:[#allocation8 + $0x2d8] sm:$0xff] }
 0x236   : > { %7559 = vst [vmem:[#allocation34_spill] sm:$0xff] %v6600_v9  ;;  %v6615_v38 = vsel %vm701_vm0, %v2231_v35, %v6600_v9  ;;  %v6619_v41 = vsel %vm628_vm1, %v6583_v21, %v2172_v28  ;;  %v6621_v37 = vpop.f32.mrb[74].mxu0  ;;  %v453_v35 = vld [vmem:[#allocation8 + $0xa8] sm:$0xff]  ;;  %vm2109_vm3 = vcmp.lt.s32.totalorder %v2089_v4, 16  ;;  %v436_v28 = vld [vmem:[#allocation8 + $0x20] sm:$0xff]  ;;  %v439_v13 = vld [vmem:[#allocation8 + $0x38] sm:$0xff] }
 0x237   : > { %7563 = vst [vmem:[#allocation36_spill] sm:$0xff] %v6609_v52  ;;  %7564 = vst [vmem:[#allocation37_spill] sm:$0xff] %v6619_v41  ;;  %v2051_v46 = vadd.f32 %v6458_v57, %v2025_v14  ;;  %v1960_v6 = vadd.f32 %v6545_v10, %v1795_v11  ;;  %4523 = vmatprep.mubr.f32.mxu1 %v6615_v38  ;;  %2543 = vmatmul.mubr.f32.gmra.mrb[86].mxu0 %v6619_v41  ;;  %v2131_v45 = vsel %vm6604_vm14, %v6609_v52, 0.0  ;;  %v6630_v43 = vpop.f32.mrb[75].mxu0  ;;  %v437_v41 = vld [vmem:[#allocation8 + $0x28] sm:$0xff] }
 0x238   : > { %v1799_v2 = vpop.f32.mrb[78].mxu1  ;;  %4524 = vmatmul.mubr.msk.f32.vlgmr.msra.gmra.mrb[100].mxu1 %vm701_vm0, %v6600_v9  ;;  %3693 = vmatprep.mubr.msk.f32.mxu0 %vm6604_vm14, %v6609_v52  ;;  %v4977_v14 = vpack.c.bf16 %v435_v31, %v434_v26  ;;  %v6641_v25 = vrot.slane %v2131_v45, 7  ;;  %v4895_v52 = vpack.c.bf16 %v523_v63, %v522_v20  ;;  %v4979_v54 = vpack.c.bf16 %v453_v35, %v452_v39  ;;  %v454_v26 = vld [vmem:[#allocation8 + $0xb0] sm:$0xff]  ;;  %v455_v31 = vld [vmem:[#allocation8 + $0xb8] sm:$0xff]  ;;  %v525_v39 = vld [vmem:[#allocation8 + $0x2e8] sm:$0xff] }
 0x239   : > { %v6637_v10 = vmax.f32 %v2051_v46, 0.0  ;;  %v2026_v11 = vadd.f32 %v1960_v6, %v6428_v48  ;;  %v1800_v33 = vadd.f32 %v1799_v2, %v6377_v56  ;;  %v1801_v40 = vpop.f32.mrb[79].mxu1  ;;  %4890 = vmatpush3.bf16.msra.mxu0 %v4887_v16  ;;  %4974 = vmatpush3.bf16.msra.mxu1 %v4973_v18  ;;  %v6654_v16 = vadd.s32 5, %v6453_v17  ;;  %vm6665_vm4 = vmand %vm2099_vm15, %vm2109_vm3  ;;  %v7609_v35 = vld [vmem:[#allocation26_spill] sm:$0xff] }
 0x23a   : > { %7566 = vst [vmem:[#allocation39_spill] sm:$0xff] %v6641_v25  ;;  %4892 = vmatprep.subr.bf16.mxu0 %v4891_v55  ;;  %v6643_v21 = vpop.f32.mrb[76].mxu0  ;;  %4976 = vmatprep.subr.bf16.mxu1 %v4975_v5  ;;  %v524_v5 = vld [vmem:[#allocation8 + $0x2e0] sm:$0xff]  ;;  %v4981_v2 = vpack.c.bf16 %v437_v41, %v436_v28 }
 0x23b   : > { %7565 = vst [vmem:[#allocation38_spill] sm:$0xff] %v6637_v10  ;;  %v2052_v46 = vadd.f32 %v6458_v57, %v2026_v11  ;;  %v1965_v48 = vadd.f32 %v6534_v8, %v1800_v33  ;;  %3695 = vmatmul.mubr.msk.f32.gmra.mrb[88].mxu0 %vm5948_vm2, %v6641_v25  ;;  %v2132_v56 = vsel %vm6604_vm14, %v6637_v10, 0.0  ;;  %v6656_v18 = vpop.f32.mrb[77].mxu0  ;;  %v2234_v8 = vrot.slane %v2131_v45, 1 }
 0x23c   : > { %v1804_v6 = vpop.f32.mrb[80].mxu1  ;;  %3696 = vmatprep.mubr.msk.f32.mxu0 %vm6604_vm14, %v6637_v10  ;;  %v6661_v20 = vrot.slane %v2132_v56, 1  ;;  %v2175_v63 = vrot.slane %v2132_v56, 7  ;;  %v4983_v45 = vpack.c.bf16 %v455_v31, %v454_v26  ;;  %v438_v10 = vld [vmem:[#allocation8 + $0x30] sm:$0xff]  ;;  %v457_v26 = vld [vmem:[#allocation8 + $0xc8] sm:$0xff]  ;;  %v527_v31 = vld [vmem:[#allocation8 + $0x2f8] sm:$0xff] }
 0x23d   : > { %v6669_v11 = vmax.f32 %v2052_v46, 0.0  ;;  %v2027_v33 = vadd.f32 %v1965_v48, %v6426_v53  ;;  %v1805_v40 = vadd.f32 %v1804_v6, %v6380_v30  ;;  %v1806_v9 = vpop.f32.mrb[81].mxu1  ;;  %4894 = vmatpush3.bf16.msra.mxu0 %v4891_v55  ;;  %4978 = vmatpush3.bf16.msra.mxu1 %v4977_v14  ;;  %v4899_v53 = vpack.c.bf16 %v525_v39, %v524_v5  ;;  %v456_v30 = vld [vmem:[#allocation8 + $0xc0] sm:$0xff] }
 0x23e   : > { %v6675_v4 = vsel %vm701_vm0, %v2234_v8, %v6661_v20  ;;  %v6679_v56 = vsel %vm628_vm1, %v6641_v25, %v2175_v63  ;;  %4896 = vmatprep.subr.bf16.mxu0 %v4895_v52  ;;  %4980 = vmatprep.subr.bf16.mxu1 %v4979_v54  ;;  %v6681_v41 = vpop.f32.mrb[78].mxu0  ;;  %v526_v54 = vld [vmem:[#allocation8 + $0x2f0] sm:$0xff]  ;;  %vm2100_vm6 = vcmp.ge.s32.totalorder %v6654_v16, 0  ;;  %vm2110_vm7 = vcmp.lt.s32.totalorder %v6654_v16, 16  ;;  %v440_v63 = vld [vmem:[#allocation8 + $0x40] sm:$0xff]  ;;  %v459_v25 = vld [vmem:[#allocation8 + $0xd8] sm:$0xff] }
 0x23f   : > { %7569 = vst [vmem:[#allocation40_spill] sm:$0xff] %v6669_v11  ;;  %7570 = vst [vmem:[#allocation41_spill] sm:$0xff] %v6679_v56  ;;  %v2053_v9 = vadd.f32 %v6458_v57, %v2027_v33  ;;  %v1970_v55 = vadd.f32 %v6574_v0, %v1805_v40  ;;  %4526 = vmatprep.mubr.f32.mxu1 %v6675_v4  ;;  %2553 = vmatmul.mubr.f32.gmra.mrb[90].mxu0 %v6679_v56  ;;  %v2133_v14 = vsel %vm6665_vm4, %v6669_v11, 0.0  ;;  %v6690_v28 = vpop.f32.mrb[79].mxu0  ;;  %v441_v33 = vld [vmem:[#allocation8 + $0x48] sm:$0xff]  ;;  %v458_v56 = vld [vmem:[#allocation8 + $0xd0] sm:$0xff] }
 0x240   : > { %v1809_v46 = vpop.f32.mrb[82].mxu1  ;;  %4527 = vmatmul.mubr.msk.f32.gmra.mrb[102].mxu1 %vm701_vm0, %v6661_v20  ;;  %3697 = vmatprep.mubr.msk.f32.mxu0 %vm6665_vm4, %v6669_v11  ;;  %v4985_v0 = vpack.c.bf16 %v439_v13, %v438_v10  ;;  %v6703_v8 = vrot.slane %v2133_v14, 7  ;;  %v4987_v40 = vpack.c.bf16 %v457_v26, %v456_v30  ;;  %v4903_v11 = vpack.c.bf16 %v527_v31, %v526_v54  ;;  %vm6723_vm9 = vmand %vm2100_vm6, %vm2110_vm7 }
 0x241   : > { %v6699_v48 = vmax.f32 %v2053_v9, 0.0  ;;  %v2028_v5 = vadd.f32 %v1970_v55, %v6432_v61  ;;  %v1810_v39 = vadd.f32 %v1809_v46, %v6383_v22  ;;  %v1811_v6 = vpop.f32.mrb[83].mxu1  ;;  %4898 = vmatpush3.bf16.msra.mxu0 %v4895_v52  ;;  %4982 = vmatpush3.bf16.msra.mxu1 %v4981_v2  ;;  %v2091_v61 = vadd.s32 6, %v6453_v17  ;;  %v544_v52 = vld [vmem:[#allocation8 + $0x380] sm:$0xff]  ;;  %v545_v2 = vld [vmem:[#allocation8 + $0x388] sm:$0xff] }
 0x242   : > { %4900 = vmatprep.subr.bf16.mxu0 %v4899_v53  ;;  %4984 = vmatprep.subr.bf16.mxu1 %v4983_v45  ;;  %v2237_v30 = vrot.slane %v2133_v14, 1  ;;  %v4989_v26 = vpack.c.bf16 %v441_v33, %v440_v63  ;;  %v4991_v14 = vpack.c.bf16 %v459_v25, %v458_v56  ;;  %v443_v6 = vld [vmem:[#allocation8 + $0x58] sm:$0xff]  ;;  %v4907_v63 = vpack.c.bf16 %v545_v2, %v544_v52  ;;  %v460_v56 = vld [vmem:[#allocation8 + $0xe0] sm:$0xff] }
 0x243   : > { %v2054_v13 = vadd.f32 %v6458_v57, %v2028_v5  ;;  %v1975_v10 = vadd.f32 %v6567_v58, %v1810_v39  ;;  %3699 = vmatmul.mubr.msk.f32.gmra.mrb[92].mxu0 %vm5948_vm2, %v6703_v8  ;;  %v2134_v22 = vsel %vm6665_vm4, %v6699_v48, 0.0  ;;  %v442_v39 = vld [vmem:[#allocation8 + $0x50] sm:$0xff]  ;;  %vm2101_vm10 = vcmp.ge.s32.totalorder %v2091_v61, 0 }
 0x244   : > { %v1814_v45 = vpop.f32.mrb[84].mxu1  ;;  %3700 = vmatprep.mubr.msk.f32.mxu0 %vm6665_vm4, %v6699_v48  ;;  %v6717_v9 = vrot.slane %v2134_v22, 1  ;;  %v2178_v58 = vrot.slane %v2134_v22, 7  ;;  %vm2111_vm12 = vcmp.lt.s32.totalorder %v2091_v61, 16 }
 0x245   : > { %v6727_v54 = vmax.f32 %v2054_v13, 0.0  ;;  %v2029_v31 = vadd.f32 %v1975_v10, %v6430_v24  ;;  %v1815_v46 = vadd.f32 %v1814_v45, %v6386_v36  ;;  %v1816_v5 = vpop.f32.mrb[85].mxu1  ;;  %4902 = vmatpush3.bf16.msra.mxu0 %v4899_v53  ;;  %4986 = vmatpush3.bf16.msra.mxu1 %v4985_v0  ;;  %v461_v53 = vld [vmem:[#allocation8 + $0xe8] sm:$0xff]  ;;  %v444_v45 = vld [vmem:[#allocation8 + $0x60] sm:$0xff]  ;;  %vm6772_vm13 = vmand %vm2101_vm10, %vm2111_vm12 }
 0x246   : > { %v6733_v16 = vsel %vm701_vm0, %v2237_v30, %v6717_v9  ;;  %v6737_v22 = vsel %vm628_vm1, %v6703_v8, %v2178_v58  ;;  %4988 = vmatprep.subr.bf16.mxu1 %v4987_v40  ;;  %4904 = vmatprep.subr.bf16.mxu0 %v4903_v11  ;;  %v4995_v2 = vpack.c.bf16 %v461_v53, %v460_v56  ;;  %v445_v30 = vld [vmem:[#allocation8 + $0x68] sm:$0xff]  ;;  %v446_v56 = vld [vmem:[#allocation8 + $0x70] sm:$0xff]  ;;  %v447_v53 = vld [vmem:[#allocation8 + $0x78] sm:$0xff] }
 0x247   : > { %v2055_v24 = vadd.f32 %v6458_v57, %v2029_v31  ;;  %v1980_v36 = vadd.f32 %v6595_v27, %v1815_v46  ;;  %4529 = vmatprep.mubr.f32.mxu1 %v6733_v16  ;;  %2563 = vmatmul.mubr.f32.gmra.mrb[94].mxu0 %v6737_v22  ;;  %v2135_v25 = vsel %vm6723_vm9, %v6727_v54, 0.0  ;;  %v4993_v27 = vpack.c.bf16 %v443_v6, %v442_v39 }
 0x248   : > { %v1819_v0 = vpop.f32.mrb[86].mxu1  ;;  %4530 = vmatmul.mubr.msk.f32.gmra.mrb[104].mxu1 %vm701_vm0, %v6717_v9  ;;  %3701 = vmatprep.mubr.msk.f32.mxu0 %vm6723_vm9, %v6727_v54  ;;  %v6755_v52 = vrot.slane %v2135_v25, 7  ;;  %v2240_v46 = vrot.slane %v2135_v25, 1  ;;  %v2092_v39 = vadd.s32 7, %v6453_v17  ;;  %v4997_v25 = vpack.c.bf16 %v445_v30, %v444_v45 }
 0x249   : > { %v6751_v33 = vmax.f32 %v2055_v24, 0.0  ;;  %v2030_v40 = vadd.f32 %v1980_v36, %v6436_v15  ;;  %v1820_v13 = vadd.f32 %v1819_v0, %v6389_v62  ;;  %v1821_v10 = vpop.f32.mrb[87].mxu1  ;;  %4990 = vmatpush3.bf16.msra.mxu1 %v4989_v26  ;;  %4906 = vmatpush3.bf16.msra.mxu0 %v4903_v11  ;;  %v462_v15 = vld [vmem:[#allocation8 + $0xf0] sm:$0xff]  ;;  %v463_v26 = vld [vmem:[#allocation8 + $0xf8] sm:$0xff] }
 0x24a   : > { %4992 = vmatprep.subr.bf16.mxu1 %v4991_v14  ;;  %4908 = vmatprep.subr.bf16.mxu0 %v4907_v63  ;;  %v465_v10 = vld [vmem:[#allocation8 + $0x108] sm:$0xff]  ;;  %vm2102_vm15 = vcmp.ge.s32.totalorder %v2092_v39, 0  ;;  %vm2112_vm3 = vcmp.lt.s32.totalorder %v2092_v39, 16 }
 0x24b   : > { %v2056_v58 = vadd.f32 %v6458_v57, %v2030_v40  ;;  %v1985_v31 = vadd.f32 %v6585_v29, %v1820_v13  ;;  %3703 = vmatmul.mubr.msk.f32.gmra.mrb[96].mxu0 %vm5948_vm2, %v6755_v52  ;;  %v2136_v62 = vsel %vm6723_vm9, %v6751_v33, 0.0  ;;  %v4999_v40 = vpack.c.bf16 %v463_v26, %v462_v15  ;;  %vm6824_vm6 = vmand %vm2102_vm15, %vm2112_vm3 }
 0x24c   : > { %v1824_v11 = vpop.f32.mrb[88].mxu1  ;;  %3704 = vmatprep.mubr.msk.f32.mxu0 %vm6723_vm9, %v6751_v33  ;;  %v6768_v5 = vrot.slane %v2136_v62, 1  ;;  %v2181_v14 = vrot.slane %v2136_v62, 7 }
 0x24d   : > { %v6777_v6 = vmax.f32 %v2056_v58, 0.0  ;;  %v2031_v63 = vadd.f32 %v1985_v31, %v6434_v60  ;;  %v1825_v24 = vadd.f32 %v1824_v11, %v6392_v50  ;;  %v1826_v36 = vpop.f32.mrb[89].mxu1  ;;  %4994 = vmatpush3.bf16.msra.mxu1 %v4993_v27  ;;  %v464_v27 = vld [vmem:[#allocation8 + $0x100] sm:$0xff] }
 0x24e   : > { %v6783_v61 = vsel %vm701_vm0, %v2240_v46, %v6768_v5  ;;  %v6787_v0 = vsel %vm628_vm1, %v6755_v52, %v2181_v14  ;;  %4996 = vmatprep.subr.bf16.mxu1 %v4995_v2  ;;  %v6807_v15 = vpack.c.bf16 %v465_v10, %v464_v27 }
 0x24f   : > { %v2057_v13 = vadd.f32 %v6458_v57, %v2031_v63  ;;  %v1990_v60 = vadd.f32 %v6630_v43, %v1825_v24  ;;  %4532 = vmatprep.mubr.f32.mxu1 %v6783_v61  ;;  %2573 = vmatmul.mubr.f32.gmra.mrb[98].mxu0 %v6787_v0  ;;  %v2137_v50 = vsel %vm6772_vm13, %v6777_v6, 0.0  ;;  %v5001_v43 = vpack.c.bf16 %v447_v53, %v446_v56 }
 0x250   : > { %v1829_v45 = vpop.f32.mrb[90].mxu1  ;;  %4533 = vmatmul.mubr.msk.f32.gmra.mrb[106].mxu1 %vm701_vm0, %v6768_v5  ;;  %3705 = vmatprep.mubr.msk.f32.mxu0 %vm6772_vm13, %v6777_v6  ;;  %v6805_v62 = vrot.slane %v2137_v50, 7  ;;  %v2243_v46 = vrot.slane %v2137_v50, 1  ;;  %v2093_v24 = vadd.s32 8, %v6453_v17 }
 0x251   : > { %v6801_v2 = vmax.f32 %v2057_v13, 0.0  ;;  %v2032_v30 = vadd.f32 %v1990_v60, %v6440_v23  ;;  %v1830_v58 = vadd.f32 %v1829_v45, %v6395_v32  ;;  %v1831_v31 = vpop.f32.mrb[91].mxu1  ;;  %4998 = vmatpush3.bf16.msra.mxu1 %v4997_v25 }
 0x252   : > { %5000 = vmatprep.subr.bf16.mxu1 %v4999_v40  ;;  %vm2103_vm7 = vcmp.ge.s32.totalorder %v2093_v24, 0  ;;  %vm2113_vm10 = vcmp.lt.s32.totalorder %v2093_v24, 16 }
 0x253   : > { %v2058_v26 = vadd.f32 %v6458_v57, %v2032_v30  ;;  %v1995_v11 = vadd.f32 %v6621_v37, %v1830_v58  ;;  %3707 = vmatmul.mubr.msk.f32.gmra.mrb[100].mxu0 %vm5948_vm2, %v6805_v62  ;;  %v2138_v23 = vsel %vm6772_vm13, %v6801_v2, 0.0  ;;  %vm6875_vm12 = vmand %vm2103_vm7, %vm2113_vm10 }
 0x254   : > { %v1834_v32 = vpop.f32.mrb[92].mxu1  ;;  %3708 = vmatprep.mubr.msk.f32.mxu0 %vm6772_vm13, %v6801_v2  ;;  %v6820_v14 = vrot.slane %v2138_v23, 1  ;;  %v2184_v63 = vrot.slane %v2138_v23, 7 }
 0x255   : > { %v6829_v36 = vmax.f32 %v2058_v26, 0.0  ;;  %v2033_v25 = vadd.f32 %v1995_v11, %v6438_v12  ;;  %v1835_v56 = vadd.f32 %v1834_v32, %v6398_v19  ;;  %v1836_v53 = vpop.f32.mrb[93].mxu1  ;;  %5002 = vmatpush3.bf16.msra.mxu1 %v5001_v43 }
 0x256   : > { %v6835_v40 = vsel %vm701_vm0, %v2243_v46, %v6820_v14  ;;  %v6839_v39 = vsel %vm628_vm1, %v6805_v62, %v2184_v63  ;;  %5004 = vmatprep.subr.bf16.mxu1 %v6807_v15  ;;  %v2094_v63 = vadd.s32 9, %v6453_v17 }
 0x257   : > { %v2059_v13 = vadd.f32 %v6458_v57, %v2033_v25  ;;  %v2000_v60 = vadd.f32 %v6656_v18, %v1835_v56  ;;  %4535 = vmatprep.mubr.f32.mxu1 %v6835_v40  ;;  %2583 = vmatmul.mubr.f32.gmra.mrb[102].mxu0 %v6839_v39  ;;  %v2139_v19 = vsel %vm6824_vm6, %v6829_v36, 0.0 }
 0x258   : > { %v1839_v12 = vpop.f32.mrb[94].mxu1  ;;  %4536 = vmatmul.mubr.msk.f32.gmra.mrb[108].mxu1 %vm701_vm0, %v6820_v14  ;;  %3709 = vmatprep.mubr.msk.f32.mxu0 %vm6824_vm6, %v6829_v36  ;;  %v6858_v45 = vrot.slane %v2139_v19, 7  ;;  %vm2104_vm15 = vcmp.ge.s32.totalorder %v2094_v63, 0  ;;  %vm2114_vm3 = vcmp.lt.s32.totalorder %v2094_v63, 16 }
 0x259   : > { %v6854_v50 = vmax.f32 %v2059_v13, 0.0  ;;  %v2034_v18 = vadd.f32 %v2000_v60, %v6444_v42  ;;  %v1840_v27 = vadd.f32 %v1839_v12, %v6401_v7  ;;  %v1841_v10 = vpop.f32.mrb[95].mxu1  ;;  %v2246_v7 = vrot.slane %v2139_v19, 1  ;;  %vm6933_vm7 = vmand %vm2104_vm15, %vm2114_vm3 }
 0x25b   : > { %v2060_v43 = vadd.f32 %v6458_v57, %v2034_v18  ;;  %v2005_v30 = vadd.f32 %v6643_v21, %v1840_v27  ;;  %3711 = vmatmul.mubr.msk.f32.gmra.mrb[104].mxu0 %vm5948_vm2, %v6858_v45  ;;  %v2140_v58 = vsel %vm6824_vm6, %v6854_v50, 0.0 }
 0x25c   : > { %v1844_v31 = vpop.f32.mrb[96].mxu1  ;;  %3712 = vmatprep.mubr.msk.f32.mxu0 %vm6824_vm6, %v6854_v50  ;;  %v6871_v42 = vrot.slane %v2140_v58, 1  ;;  %v2187_v26 = vrot.slane %v2140_v58, 7  ;;  %v2228_v58 = vrot.slane %v6517_v47, 1 }
 0x25d   : > { %v6879_v11 = vmax.f32 %v2060_v43, 0.0  ;;  %v2035_v23 = vadd.f32 %v2005_v30, %v6442_v34  ;;  %v1845_v32 = vadd.f32 %v1844_v31, %v6404_v1  ;;  %v1846_v46 = vpop.f32.mrb[97].mxu1  ;;  %v528_v31 = vld [vmem:[#allocation8 + $0x300] sm:$0xff] }
 0x25e   : > { %v6886_v25 = vsel %vm701_vm0, %v2246_v7, %v6871_v42  ;;  %v6890_v24 = vsel %vm628_vm1, %v6858_v45, %v2187_v26  ;;  %v529_v7 = vld [vmem:[#allocation8 + $0x308] sm:$0xff] }
 0x25f   : > { %v2061_v56 = vadd.f32 %v6458_v57, %v2035_v23  ;;  %v2010_v53 = vadd.f32 %v6690_v28, %v1845_v32  ;;  %4538 = vmatprep.mubr.f32.mxu1 %v6886_v25  ;;  %2593 = vmatmul.mubr.f32.gmra.mrb[106].mxu0 %v6890_v24  ;;  %v2141_v1 = vsel %vm6875_vm12, %v6879_v11, 0.0  ;;  %v546_v32 = vld [vmem:[#allocation8 + $0x390] sm:$0xff]  ;;  %v4909_v63 = vpack.c.bf16 %v529_v7, %v528_v31  ;;  %v532_v7 = vld [vmem:[#allocation8 + $0x320] sm:$0xff] }
 0x260   : > { %v1849_v34 = vpop.f32.mrb[98].mxu1  ;;  %4539 = vmatmul.mubr.msk.f32.gmra.mrb[110].mxu1 %vm701_vm0, %v6871_v42  ;;  %3713 = vmatprep.mubr.msk.f32.mxu0 %vm6875_vm12, %v6879_v11  ;;  %v6908_v19 = vrot.slane %v2141_v1, 7  ;;  %v2249_v27 = vrot.slane %v2141_v1, 1  ;;  %v530_v1 = vld [vmem:[#allocation8 + $0x310] sm:$0xff] }
 0x261   : > { %v6904_v17 = vmax.f32 %v2061_v56, 0.0  ;;  %v2036_v28 = vadd.f32 %v2010_v53, %v6450_v59  ;;  %v1850_v13 = vadd.f32 %v1849_v34, %v6407_v51  ;;  %v1851_v60 = vpop.f32.mrb[99].mxu1  ;;  %v6921_v51 = vrot.slane %v6543_v49, 1  ;;  %v531_v34 = vld [vmem:[#allocation8 + $0x318] sm:$0xff] }
 0x262   : > { %v549_v60 = vld [vmem:[#allocation8 + $0x3a8] sm:$0xff] }
 0x263   : > { %v6911_v12 = vadd.f32 %v6458_v57, %v2036_v28  ;;  %v2015_v18 = vadd.f32 %v6681_v41, %v1850_v13  ;;  %3715 = vmatmul.mubr.msk.f32.gmra.mrb[108].mxu0 %vm5948_vm2, %v6908_v19  ;;  %v2142_v59 = vsel %vm6875_vm12, %v6904_v17, 0.0  ;;  %v6952_v46 = vsel %vm701_vm0, %v2228_v58, %v6921_v51  ;;  %v548_v13 = vld [vmem:[#allocation8 + $0x3a0] sm:$0xff] }
 0x264   : > { %3716 = vmatprep.mubr.msk.f32.mxu0 %vm6875_vm12, %v6904_v17  ;;  %v6926_v10 = vrot.slane %v2142_v59, 1  ;;  %v2190_v43 = vrot.slane %v2142_v59, 7  ;;  %v4915_v31 = vpack.c.bf16 %v549_v60, %v548_v13  ;;  %v470_v13 = vld [vmem:[#allocation8 + $0x130] sm:$0xff] }
 0x265   : > { %v7491_v41 = vmax.f32 %v6911_v12, 0.0  ;;  %v2037_v30 = vadd.f32 %v2015_v18, %v6448_v44  ;;  %v547_v44 = vld [vmem:[#allocation8 + $0x398] sm:$0xff] }
 0x266   : > { %v6939_v26 = vsel %vm701_vm0, %v2249_v27, %v6926_v10  ;;  %v6943_v23 = vsel %vm628_vm1, %v6908_v19, %v2190_v43  ;;  %v4911_v53 = vpack.c.bf16 %v547_v44, %v546_v32  ;;  %v533_v32 = vld [vmem:[#allocation8 + $0x328] sm:$0xff] }
 0x267   : > { %v6946_v47 = vadd.f32 %v6458_v57, %v2037_v30  ;;  %4541 = vmatprep.mubr.f32.mxu1 %v6939_v26  ;;  %2603 = vmatmul.mubr.f32.gmra.mrb[110].mxu0 %v6943_v23  ;;  %v6961_v57 = vsel %vm6933_vm7, %v7491_v41, 0.0  ;;  %v4913_v30 = vpack.c.bf16 %v531_v34, %v530_v1  ;;  %v551_v41 = vld [vmem:[#allocation8 + $0x3b8] sm:$0xff]  ;;  %v7585_v34 = vld [vmem:[#allocation19_spill] sm:$0xff]  ;;  %v4917_v60 = vpack.c.bf16 %v533_v32, %v532_v7  ;;  %v536_v32 = vld [vmem:[#allocation8 + $0x340] sm:$0xff] }
 0x268   : > { %4542 = vmatmul.mubr.msk.f32.gmra.mrb[112].mxu1 %vm701_vm0, %v6926_v10  ;;  %4467 = vmatprep.mubr.f32.mxu0 %v6952_v46  ;;  %7582 = vst [vmem:[#allocation43_spill] sm:$0xff] %v6961_v57  ;;  %v2252_v18 = vrot.slane %v6961_v57, 1  ;;  %v7492_v27 = vrot.slane %v6961_v57, 7  ;;  %v467_v1 = vld [vmem:[#allocation8 + $0x118] sm:$0xff] }
 0x269   : > { %7581 = vst [vmem:[#allocation42_spill] sm:$0xff] %v6946_v47  ;;  %v7490_v56 = vmax.f32 %v6946_v47, 0.0  ;;  %v7588_v47 = vld [vmem:[#allocation21_spill] sm:$0xff] }
 0x26a   : > { %v7589_v57 = vrot.slane %v7588_v47, 7  ;;  %v537_v47 = vld [vmem:[#allocation8 + $0x348] sm:$0xff] }
 0x26b   : > { %4468 = vmatmul.mubr.msk.f32.vlgmr.msra.gmra.mrb[112].mxu0 %vm701_vm0, %v6921_v51  ;;  %v2144_v28 = vsel %vm6933_vm7, %v7490_v56, 0.0  ;;  %v550_v56 = vld [vmem:[#allocation8 + $0x3b0] sm:$0xff] }
 0x26c   : > { %4470 = vmatprep.mubr.f32.mxu0 %v6615_v38  ;;  %4910 = vmatpush3.bf16.msra.mxu0 %v4909_v63  ;;  %v2253_v59 = vrot.slane %v2144_v28, 1  ;;  %v2193_v43 = vrot.slane %v2144_v28, 7  ;;  %v7584_v63 = vld [vmem:[#allocation34_spill] sm:$0xff]  ;;  %v7586_v28 = vmax.f32 %v7585_v34, 0.0  ;;  %v469_v34 = vld [vmem:[#allocation8 + $0x128] sm:$0xff] }
 0x26d   : > { %4912 = vmatprep.subr.bf16.mxu0 %v4911_v53  ;;  %v466_v53 = vld [vmem:[#allocation8 + $0x110] sm:$0xff] }
 0x26e   : > { %v2254_v58 = vsel %vm701_vm0, %v2252_v18, %v2253_v59  ;;  %v6977_v44 = vsel %vm628_vm1, %v7492_v27, %v2193_v43  ;;  %v4919_v18 = vpack.c.bf16 %v551_v41, %v550_v56  ;;  %v534_v43 = vld [vmem:[#allocation8 + $0x330] sm:$0xff]  ;;  %v552_v27 = vld [vmem:[#allocation8 + $0x3c0] sm:$0xff] }
 0x26f   : > { %7583 = vst [vmem:[#allocation44_spill] sm:$0xff] %v6977_v44  ;;  %4544 = vmatprep.mubr.f32.mxu1 %v2254_v58  ;;  %4471 = vmatmul.mubr.msk.f32.gmra.mrb[114].mxu0 %vm701_vm0, %v7584_v63  ;;  %v535_v58 = vld [vmem:[#allocation8 + $0x338] sm:$0xff]  ;;  %v5007_v44 = vpack.c.bf16 %v467_v1, %v466_v53  ;;  %v7613_v55 = vld [vmem:[#allocation43_spill] sm:$0xff] }
 0x270   : > { %4545 = vmatmul.mubr.msk.f32.gmra.mrb[114].mxu1 %vm701_vm0, %v2253_v59  ;;  %4473 = vmatprep.mubr.f32.mxu0 %v6675_v4  ;;  %v553_v59 = vld [vmem:[#allocation8 + $0x3c8] sm:$0xff]  ;;  %v4921_v56 = vpack.c.bf16 %v535_v58, %v534_v43  ;;  %v555_v53 = vld [vmem:[#allocation8 + $0x3d8] sm:$0xff]  ;;  %v7593_v43 = vld [vmem:[#allocation22_spill] sm:$0xff] }
 0x271   : > { %4914 = vmatpush3.bf16.msra.mxu0 %v4913_v30  ;;  %3765 = vmatprep.mubr.msk.f32.mxu1 %vm6472_vm5, %v7586_v28  ;;  %v468_v30 = vld [vmem:[#allocation8 + $0x120] sm:$0xff]  ;;  %v4923_v7 = vpack.c.bf16 %v553_v59, %v552_v27  ;;  %v7592_v28 = vld [vmem:[#allocation23_spill] sm:$0xff]  ;;  %v4925_v27 = vpack.c.bf16 %v537_v47, %v536_v32  ;;  %v538_v58 = vld [vmem:[#allocation8 + $0x350] sm:$0xff] }
 0x272   : > { %4916 = vmatprep.subr.bf16.mxu0 %v4915_v31  ;;  %v7590_v31 = vld [vmem:[#allocation18_spill] sm:$0xff]  ;;  %v5011_v1 = vpack.c.bf16 %v469_v34, %v468_v30  ;;  %v539_v59 = vld [vmem:[#allocation8 + $0x358] sm:$0xff]  ;;  %v557_v34 = vld [vmem:[#allocation8 + $0x3e8] sm:$0xff] }
 0x273   : > { %4474 = vmatmul.mubr.msk.f32.gmra.mrb[116].mxu0 %vm701_vm0, %v6661_v20  ;;  %v7591_v41 = vmax.f32 %v7590_v31, 0.0  ;;  %v556_v30 = vld [vmem:[#allocation8 + $0x3e0] sm:$0xff]  ;;  %v473_v32 = vld [vmem:[#allocation8 + $0x148] sm:$0xff] }
 0x274   : > { %3767 = vmatmul.mubr.msk.f32.vlgmr.msra.gmra.mrb[116].mxu1 %vm5948_vm2, %v7589_v57  ;;  %4476 = vmatprep.mubr.f32.mxu0 %v6733_v16  ;;  %v554_v57 = vld [vmem:[#allocation8 + $0x3d0] sm:$0xff]  ;;  %v4931_v47 = vpack.c.bf16 %v557_v34, %v556_v30  ;;  %v543_v34 = vld [vmem:[#allocation8 + $0x378] sm:$0xff] }
 0x275   : > { %4918 = vmatpush3.bf16.msra.mxu0 %v4917_v60  ;;  %3768 = vmatprep.mubr.msk.f32.mxu1 %vm6472_vm5, %v7591_v41  ;;  %v471_v60 = vld [vmem:[#allocation8 + $0x138] sm:$0xff]  ;;  %v7595_v41 = vld [vmem:[#allocation28_spill] sm:$0xff] }
 0x276   : > { %5006 = vmatpush3.bf16.msra.mxu1 %v6807_v15  ;;  %4920 = vmatprep.subr.bf16.mxu0 %v4919_v18  ;;  %v4927_v18 = vpack.c.bf16 %v555_v53, %v554_v57  ;;  %v5015_v31 = vpack.c.bf16 %v471_v60, %v470_v13  ;;  %v540_v57 = vld [vmem:[#allocation8 + $0x360] sm:$0xff]  ;;  %v541_v53 = vld [vmem:[#allocation8 + $0x368] sm:$0xff]  ;;  %v559_v13 = vld [vmem:[#allocation8 + $0x3f8] sm:$0xff] }
 0x277   : > { %4477 = vmatmul.mubr.msk.f32.gmra.mrb[118].mxu0 %vm701_vm0, %v6717_v9  ;;  %5008 = vmatprep.subr.bf16.mxu1 %v5007_v44  ;;  %v475_v15 = vld [vmem:[#allocation8 + $0x158] sm:$0xff]  ;;  %v542_v30 = vld [vmem:[#allocation8 + $0x370] sm:$0xff] }
 0x278   : > { %3161 = vmatmul.mubr.f32.gmra.mrb[118].mxu1 %v7592_v28  ;;  %4479 = vmatprep.mubr.f32.mxu0 %v6783_v61  ;;  %v558_v28 = vld [vmem:[#allocation8 + $0x3f0] sm:$0xff] }
 0x279   : > { %4922 = vmatpush3.bf16.msra.mxu0 %v4921_v56  ;;  %3769 = vmatprep.mubr.msk.f32.mxu1 %vm6498_vm8, %v7593_v43  ;;  %v472_v56 = vld [vmem:[#allocation8 + $0x140] sm:$0xff]  ;;  %v7597_v43 = vld [vmem:[#allocation31_spill] sm:$0xff] }
 0x27a   : > { %4924 = vmatprep.subr.bf16.mxu0 %v4923_v7  ;;  %5010 = vmatpush3.bf16.msra.mxu1 %v5007_v44  ;;  %v7596_v44 = vld [vmem:[#allocation27_spill] sm:$0xff]  ;;  %v4929_v7 = vpack.c.bf16 %v539_v59, %v538_v58  ;;  %v5019_v60 = vpack.c.bf16 %v473_v32, %v472_v56  ;;  %v7598_v58 = vld [vmem:[#allocation30_spill] sm:$0xff]  ;;  %v4933_v59 = vpack.c.bf16 %v541_v53, %v540_v57  ;;  %v7600_v56 = vld [vmem:[#allocation33_spill] sm:$0xff] }
 0x27b   : > { %4480 = vmatmul.mubr.msk.f32.gmra.mrb[120].mxu0 %vm701_vm0, %v6768_v5  ;;  %5012 = vmatprep.subr.bf16.mxu1 %v5011_v1  ;;  %v476_v32 = vld [vmem:[#allocation8 + $0x160] sm:$0xff]  ;;  %v7602_v57 = vld [vmem:[#allocation37_spill] sm:$0xff] }
 0x27c   : > { %3771 = vmatmul.mubr.msk.f32.gmra.mrb[120].mxu1 %vm5948_vm2, %v7595_v41  ;;  %4482 = vmatprep.mubr.f32.mxu0 %v6835_v40  ;;  %v479_v53 = vld [vmem:[#allocation8 + $0x178] sm:$0xff] }
 0x27d   : > { %4926 = vmatpush3.bf16.msra.mxu0 %v4925_v27  ;;  %3772 = vmatprep.mubr.msk.f32.mxu1 %vm6498_vm8, %v7596_v44  ;;  %v474_v27 = vld [vmem:[#allocation8 + $0x150] sm:$0xff]  ;;  %v477_v44 = vld [vmem:[#allocation8 + $0x168] sm:$0xff] }
 0x27e   : > { %4928 = vmatprep.subr.bf16.mxu0 %v4927_v18  ;;  %5014 = vmatpush3.bf16.msra.mxu1 %v5011_v1  ;;  %v4935_v1 = vpack.c.bf16 %v559_v13, %v558_v28  ;;  %v5023_v41 = vpack.c.bf16 %v475_v15, %v474_v27  ;;  %v7603_v28 = vld [vmem:[#allocation36_spill] sm:$0xff]  ;;  %v7607_v27 = vld [vmem:[#allocation41_spill] sm:$0xff] }
 0x27f   : > { %4483 = vmatmul.mubr.msk.f32.gmra.mrb[122].mxu0 %vm701_vm0, %v6820_v14  ;;  %5016 = vmatprep.subr.bf16.mxu1 %v5015_v31  ;;  %v7608_v15 = vld [vmem:[#allocation40_spill] sm:$0xff] }
 0x280   : > { %3171 = vmatmul.mubr.f32.gmra.mrb[122].mxu1 %v7597_v43  ;;  %4485 = vmatprep.mubr.f32.mxu0 %v6886_v25  ;;  %v7606_v43 = vld [vmem:[#allocation38_spill] sm:$0xff] }
 0x281   : > { %4930 = vmatpush3.bf16.msra.mxu0 %v4929_v7  ;;  %3773 = vmatprep.mubr.msk.f32.mxu1 %vm6554_vm11, %v7598_v58  ;;  %v7601_v7 = vld [vmem:[#allocation32_spill] sm:$0xff] }
 0x282   : > { %4932 = vmatprep.subr.bf16.mxu0 %v4931_v47  ;;  %5018 = vmatpush3.bf16.msra.mxu1 %v5015_v31  ;;  %v4937_v47 = vpack.c.bf16 %v543_v34, %v542_v30  ;;  %v5027_v31 = vpack.c.bf16 %v477_v44, %v476_v32 }
 0x283   : > { %4486 = vmatmul.mubr.msk.f32.gmra.mrb[124].mxu0 %vm701_vm0, %v6871_v42  ;;  %5020 = vmatprep.subr.bf16.mxu1 %v5019_v60 }
 0x284   : > { %3775 = vmatmul.mubr.msk.f32.gmra.mrb[124].mxu1 %vm5948_vm2, %v7600_v56  ;;  %4488 = vmatprep.mubr.f32.mxu0 %v6939_v26  ;;  %v478_v26 = vld [vmem:[#allocation8 + $0x170] sm:$0xff] }
 0x285   : > { %4934 = vmatpush3.bf16.msra.mxu0 %v4933_v59  ;;  %3776 = vmatprep.mubr.msk.f32.mxu1 %vm6554_vm11, %v7601_v7 }
 0x286   : > { %4936 = vmatprep.subr.bf16.mxu0 %v4935_v1  ;;  %5022 = vmatpush3.bf16.msra.mxu1 %v5019_v60  ;;  %v5031_v60 = vpack.c.bf16 %v479_v53, %v478_v26 }
 0x287   : > { %4489 = vmatmul.mubr.msk.f32.gmra.mrb[126].mxu0 %vm701_vm0, %v6926_v10  ;;  %5024 = vmatprep.subr.bf16.mxu1 %v5023_v41  ;;  %v7605_v10 = vld [vmem:[#allocation39_spill] sm:$0xff] }
 0x288   : > { %3181 = vmatmul.mubr.f32.gmra.mrb[126].mxu1 %v7602_v57  ;;  %3725 = vmatprep.mubr.msk.f32.mxu0 %vm6554_vm11, %v7598_v58 }
 0x289   : > { %4938 = vmatpush3.bf16.msra.mxu0 %v4937_v47  ;;  %3777 = vmatprep.mubr.msk.f32.mxu1 %vm6604_vm14, %v7603_v28 }
 0x28a   : > { %5026 = vmatpush3.bf16.msra.mxu1 %v5023_v41 }
 0x28b   : > { %5028 = vmatprep.subr.bf16.mxu1 %v5027_v31 }
 0x28c   : > { %3727 = vmatmul.mubr.msk.f32.vlgmr.msra.gmra.mrb[128].mxu0 %vm5948_vm2, %v7600_v56  ;;  %3779 = vmatmul.mubr.msk.f32.gmra.mrb[128].mxu1 %vm5948_vm2, %v7605_v10 }
 0x28d   : > { %3728 = vmatprep.mubr.msk.f32.mxu0 %vm6554_vm11, %v7601_v7  ;;  %3780 = vmatprep.mubr.msk.f32.mxu1 %vm6604_vm14, %v7606_v43 }
 0x28e   : > { %5030 = vmatpush3.bf16.msra.mxu1 %v5027_v31 }
 0x28f   : > { %5032 = vmatprep.subr.bf16.mxu1 %v5031_v60 }
 0x290   : > { %2871 = vmatmul.mubr.f32.gmra.mrb[130].mxu0 %v7602_v57  ;;  %3191 = vmatmul.mubr.f32.gmra.mrb[130].mxu1 %v7607_v27 }
 0x291   : > { %3729 = vmatprep.mubr.msk.f32.mxu0 %vm6604_vm14, %v7603_v28  ;;  %3781 = vmatprep.mubr.msk.f32.mxu1 %vm6665_vm4, %v7608_v15 }
 0x292   : > { %5034 = vmatpush3.bf16.msra.mxu1 %v5031_v60 }
 0x294   : > { %3731 = vmatmul.mubr.msk.f32.gmra.mrb[132].mxu0 %vm5948_vm2, %v7605_v10  ;;  %3783 = vmatmul.mubr.msk.f32.gmra.mrb[132].mxu1 %vm5948_vm2, %v6703_v8 }
 0x295   : > { %3732 = vmatprep.mubr.msk.f32.mxu0 %vm6604_vm14, %v7606_v43  ;;  %3784 = vmatprep.mubr.msk.f32.mxu1 %vm6665_vm4, %v6699_v48 }
 0x298   : > { %2881 = vmatmul.mubr.f32.gmra.mrb[134].mxu0 %v7607_v27  ;;  %3201 = vmatmul.mubr.f32.gmra.mrb[134].mxu1 %v6737_v22 }
 0x299   : > { %3733 = vmatprep.mubr.msk.f32.mxu0 %vm6665_vm4, %v7608_v15  ;;  %3785 = vmatprep.mubr.msk.f32.mxu1 %vm6723_vm9, %v6727_v54 }
 0x29c   : > { %3735 = vmatmul.mubr.msk.f32.gmra.mrb[136].mxu0 %vm5948_vm2, %v6703_v8  ;;  %3787 = vmatmul.mubr.msk.f32.gmra.mrb[136].mxu1 %vm5948_vm2, %v6755_v52 }
 0x29d   : > { %3736 = vmatprep.mubr.msk.f32.mxu0 %vm6665_vm4, %v6699_v48  ;;  %3788 = vmatprep.mubr.msk.f32.mxu1 %vm6723_vm9, %v6751_v33  ;;  %v7610_v48 = vld [vmem:[#allocation24_spill] sm:$0xff] }
 0x29e   : > { %v7611_v8 = vrot.slane %v7610_v48, 1 }
 0x2a0   : > { %2891 = vmatmul.mubr.f32.gmra.mrb[138].mxu0 %v6737_v22  ;;  %3211 = vmatmul.mubr.f32.gmra.mrb[138].mxu1 %v6787_v0 }
 0x2a1   : > { %3737 = vmatprep.mubr.msk.f32.mxu0 %vm6723_vm9, %v6727_v54  ;;  %3789 = vmatprep.mubr.msk.f32.mxu1 %vm6772_vm13, %v6777_v6  ;;  %v7614_v54 = vrot.slane %v7613_v55, 7 }
 0x2a4   : > { %3739 = vmatmul.mubr.msk.f32.gmra.mrb[140].mxu0 %vm5948_vm2, %v6755_v52  ;;  %3791 = vmatmul.mubr.msk.f32.gmra.mrb[140].mxu1 %vm5948_vm2, %v6805_v62 }
 0x2a5   : > { %3740 = vmatprep.mubr.msk.f32.mxu0 %vm6723_vm9, %v6751_v33  ;;  %3792 = vmatprep.mubr.msk.f32.mxu1 %vm6772_vm13, %v6801_v2 }
 0x2a8   : > { %2901 = vmatmul.mubr.f32.gmra.mrb[142].mxu0 %v6787_v0  ;;  %3221 = vmatmul.mubr.f32.gmra.mrb[142].mxu1 %v6839_v39 }
 0x2a9   : > { %3741 = vmatprep.mubr.msk.f32.mxu0 %vm6772_vm13, %v6777_v6  ;;  %3793 = vmatprep.mubr.msk.f32.mxu1 %vm6824_vm6, %v6829_v36 }
 0x2ac   : > { %3743 = vmatmul.mubr.msk.f32.gmra.mrb[144].mxu0 %vm5948_vm2, %v6805_v62  ;;  %3795 = vmatmul.mubr.msk.f32.gmra.mrb[144].mxu1 %vm5948_vm2, %v6858_v45 }
 0x2ad   : > { %3744 = vmatprep.mubr.msk.f32.mxu0 %vm6772_vm13, %v6801_v2  ;;  %3796 = vmatprep.mubr.msk.f32.mxu1 %vm6824_vm6, %v6854_v50 }
 0x2b0   : > { %2911 = vmatmul.mubr.f32.gmra.mrb[146].mxu0 %v6839_v39  ;;  %3231 = vmatmul.mubr.f32.gmra.mrb[146].mxu1 %v6890_v24 }
 0x2b1   : > { %3745 = vmatprep.mubr.msk.f32.mxu0 %vm6824_vm6, %v6829_v36  ;;  %4579 = vmatprep.mubr.f32.mxu1 %v7609_v35 }
 0x2b4   : > { %3747 = vmatmul.mubr.msk.f32.gmra.mrb[148].mxu0 %vm5948_vm2, %v6858_v45  ;;  %4580 = vmatmul.mubr.msk.f32.vlgmr.msra.gmra.mrb[100].mxu1 %vm701_vm0, %v7611_v8 }
 0x2b5   : > { %3748 = vmatprep.mubr.msk.f32.mxu0 %vm6824_vm6, %v6854_v50  ;;  %4582 = vmatprep.mubr.f32.mxu1 %v6952_v46 }
 0x2b8   : > { %2921 = vmatmul.mubr.f32.gmra.mrb[150].mxu0 %v6890_v24  ;;  %4583 = vmatmul.mubr.msk.f32.gmra.mrb[102].mxu1 %vm701_vm0, %v6921_v51 }
 0x2b9   : > { %3749 = vmatprep.mubr.msk.f32.mxu0 %vm6875_vm12, %v6879_v11  ;;  %4585 = vmatprep.mubr.f32.mxu1 %v6615_v38  ;;  %v7612_v38 = vmax.f32 %v6911_v12, 0.0 }
 0x2bc   : > { %3751 = vmatmul.mubr.msk.f32.gmra.mrb[152].mxu0 %vm5948_vm2, %v6908_v19  ;;  %4586 = vmatmul.mubr.msk.f32.gmra.mrb[104].mxu1 %vm701_vm0, %v7584_v63 }
 0x2bd   : > { %3752 = vmatprep.mubr.msk.f32.mxu0 %vm6875_vm12, %v6904_v17  ;;  %4588 = vmatprep.mubr.f32.mxu1 %v6675_v4  ;;  %v7615_v4 = vld [vmem:[#allocation42_spill] sm:$0xff] }
 0x2be   : > { %v7616_v22 = vmax.f32 %v7615_v4, 0.0 }
 0x2c0   : > { %2931 = vmatmul.mubr.f32.gmra.mrb[154].mxu0 %v6943_v23  ;;  %4589 = vmatmul.mubr.msk.f32.gmra.mrb[106].mxu1 %vm701_vm0, %v6661_v20  ;;  %v7617_v20 = vld [vmem:[#allocation44_spill] sm:$0xff] }
 0x2c1   : > { %3753 = vmatprep.mubr.msk.f32.mxu0 %vm6933_vm7, %v7612_v38  ;;  %4591 = vmatprep.mubr.f32.mxu1 %v6733_v16 }
 0x2c4   : > { %3755 = vmatmul.mubr.msk.f32.gmra.mrb[156].mxu0 %vm5948_vm2, %v7614_v54  ;;  %4592 = vmatmul.mubr.msk.f32.gmra.mrb[108].mxu1 %vm701_vm0, %v6717_v9 }
 0x2c5   : > { %3756 = vmatprep.mubr.msk.f32.mxu0 %vm6933_vm7, %v7616_v22  ;;  %4594 = vmatprep.mubr.f32.mxu1 %v6783_v61 }
 0x2c8   : > { %2941 = vmatmul.mubr.f32.gmra.mrb[158].mxu0 %v7617_v20  ;;  %4595 = vmatmul.mubr.msk.f32.gmra.mrb[110].mxu1 %vm701_vm0, %v6768_v5 }
 0x2c9   : > { %4597 = vmatprep.mubr.f32.mxu1 %v6835_v40 }
 0x2cc   : > { %4598 = vmatmul.mubr.msk.f32.gmra.mrb[112].mxu1 %vm701_vm0, %v6820_v14 }
 0x2cd   : > { %4600 = vmatprep.mubr.f32.mxu1 %v6886_v25 }
 0x2d0   : > { %4601 = vmatmul.mubr.msk.f32.gmra.mrb[114].mxu1 %vm701_vm0, %v6871_v42 }
 0x2fe   : > { %v3945_v3 = vpop.f32.mrb[80].mxu0 }
 0x2ff   : > { %v3946_v9 = vpop.f32.mrb[81].mxu0 }
 0x300   : > { %v3947_v16 = vadd.f32 %v3946_v9, %v3945_v3 }
 0x302   : > { %v3948_v33 = vpop.f32.mrb[82].mxu0 }
 0x303   : > { %v3949_v52 = vpop.f32.mrb[83].mxu0 }
 0x304   : > { %v3950_v29 = vadd.f32 %v3949_v52, %v3948_v33 }
 0x306   : > { %v3951_v6 = vpop.f32.mrb[84].mxu0 }
 0x307   : > { %v3952_v61 = vpop.f32.mrb[85].mxu0 }
 0x308   : > { %v3953_v0 = vadd.f32 %v3952_v61, %v3951_v6 }
 0x30a   : > { %v3954_v5 = vpop.f32.mrb[86].mxu0 }
 0x30b   : > { %v3955_v2 = vpop.f32.mrb[87].mxu0 }
 0x30c   : > { %v3956_v62 = vadd.f32 %v3955_v2, %v3954_v5 }
 0x30e   : > { %v3957_v37 = vpop.f32.mrb[88].mxu0 }
 0x30f   : > { %v3958_v36 = vpop.f32.mrb[89].mxu0 }
 0x310   : > { %v3959_v14 = vadd.f32 %v3958_v36, %v3957_v37 }
 0x312   : > { %v3960_v40 = vpop.f32.mrb[90].mxu0 }
 0x313   : > { %v3961_v39 = vpop.f32.mrb[91].mxu0 }
 0x314   : > { %v3962_v50 = vadd.f32 %v3961_v39, %v3960_v40 }
 0x316   : > { %v3963_v45 = vpop.f32.mrb[92].mxu0 }
 0x317   : > { %v3964_v42 = vpop.f32.mrb[93].mxu0 }
 0x318   : > { %v3965_v21 = vadd.f32 %v3964_v42, %v3963_v45 }
 0x31a   : > { %v3966_v11 = vpop.f32.mrb[94].mxu0 }
 0x31b   : > { %v3967_v25 = vpop.f32.mrb[95].mxu0 }
 0x31c   : > { %v3968_v24 = vadd.f32 %v3967_v25, %v3966_v11 }
 0x31e   : > { %v3969_v17 = vpop.f32.mrb[96].mxu0 }
 0x31f   : > { %v3970_v19 = vpop.f32.mrb[97].mxu0 }
 0x320   : > { %v3971_v12 = vadd.f32 %v3970_v19, %v3969_v17 }
 0x322   : > { %v3972_v51 = vpop.f32.mrb[98].mxu0 }
 0x323   : > { %v3973_v49 = vpop.f32.mrb[99].mxu0 }
 0x324   : > { %v3974_v23 = vadd.f32 %v3973_v49, %v3972_v51 }
 0x326   : > { %v3975_v46 = vpop.f32.mrb[100].mxu0 }
 0x327   : > { %v3976_v63 = vpop.f32.mrb[101].mxu0 }
 0x328   : > { %v3977_v58 = vadd.f32 %v3976_v63, %v3975_v46 }
 0x32a   : > { %v3978_v18 = vpop.f32.mrb[102].mxu0 }
 0x32b   : > { %v3979_v59 = vpop.f32.mrb[103].mxu0 }
 0x32c   : > { %v3980_v1 = vadd.f32 %v3979_v59, %v3978_v18 }
 0x32e   : > { %v3981_v30 = vpop.f32.mrb[104].mxu0 }
 0x32f   : > { %v3982_v34 = vpop.f32.mrb[105].mxu0 }
 0x330   : > { %v3983_v41 = vadd.f32 %v3982_v34, %v3981_v30 }
 0x332   : > { %v3984_v56 = vpop.f32.mrb[106].mxu0 }
 0x333   : > { %v3985_v32 = vpop.f32.mrb[107].mxu0 }
 0x334   : > { %v3986_v44 = vadd.f32 %v3985_v32, %v3984_v56 }
 0x336   : > { %v3987_v7 = vpop.f32.mrb[108].mxu0 }
 0x337   : > { %v3988_v47 = vpop.f32.mrb[109].mxu0 }
 0x338   : > { %v3989_v31 = vadd.f32 %v3988_v47, %v3987_v7 }
 0x33a   : > { %v3990_v57 = vpop.f32.mrb[110].mxu0 }
 0x33b   : > { %v3991_v26 = vpop.f32.mrb[111].mxu0 }
 0x33c   : > { %v3992_v53 = vadd.f32 %v3991_v26, %v3990_v57 }
 0x33e   : > { %v4469_v28 = vpop.f32.mrb[112].mxu0 }
 0x33f   : > { %v7192_v13 = vadd.f32 %v4469_v28, %v3950_v29  ;;  %v2674_v60 = vpop.f32.mrb[113].mxu0 }
 0x340   : > { %v2675_v10 = vadd.f32 %v3947_v16, %v2674_v60 }
 0x342   : > { %v4472_v43 = vpop.f32.mrb[114].mxu0 }
 0x343   : > { %v7194_v27 = vadd.f32 %v4472_v43, %v3956_v62  ;;  %v2684_v15 = vpop.f32.mrb[115].mxu0 }
 0x344   : > { %v7196_v35 = vadd.f32 %v3953_v0, %v2684_v15 }
 0x346   : > { %v4475_v48 = vpop.f32.mrb[116].mxu0 }
 0x347   : > { %v7198_v8 = vadd.f32 %v4475_v48, %v3962_v50  ;;  %v4169_v38 = vpop.f32.mrb[116].mxu1  ;;  %v2694_v55 = vpop.f32.mrb[117].mxu0 }
 0x348   : > { %v7200_v54 = vadd.f32 %v3959_v14, %v2694_v55  ;;  %v4170_v4 = vpop.f32.mrb[117].mxu1 }
 0x349   : > { %v4171_v22 = vadd.f32 %v4170_v4, %v4169_v38 }
 0x34a   : > { %v4478_v20 = vpop.f32.mrb[118].mxu0 }
 0x34b   : > { %v7202_v3 = vadd.f32 %v4478_v20, %v3968_v24  ;;  %v4172_v9 = vpop.f32.mrb[118].mxu1  ;;  %v2704_v16 = vpop.f32.mrb[119].mxu0 }
 0x34c   : > { %v7204_v33 = vadd.f32 %v3965_v21, %v2704_v16  ;;  %v4173_v52 = vpop.f32.mrb[119].mxu1 }
 0x34d   : > { %v4174_v29 = vadd.f32 %v4173_v52, %v4172_v9 }
 0x34e   : > { %v4481_v6 = vpop.f32.mrb[120].mxu0 }
 0x34f   : > { %v7206_v61 = vadd.f32 %v4481_v6, %v3974_v23  ;;  %v4175_v0 = vpop.f32.mrb[120].mxu1  ;;  %v2714_v5 = vpop.f32.mrb[121].mxu0 }
 0x350   : > { %v7208_v2 = vadd.f32 %v3971_v12, %v2714_v5  ;;  %v4176_v62 = vpop.f32.mrb[121].mxu1 }
 0x351   : > { %v4177_v37 = vadd.f32 %v4176_v62, %v4175_v0 }
 0x352   : > { %v4484_v36 = vpop.f32.mrb[122].mxu0 }
 0x353   : > { %v7210_v14 = vadd.f32 %v4484_v36, %v3980_v1  ;;  %v4178_v40 = vpop.f32.mrb[122].mxu1  ;;  %v2724_v39 = vpop.f32.mrb[123].mxu0 }
 0x354   : > { %v7212_v50 = vadd.f32 %v3977_v58, %v2724_v39  ;;  %v4179_v45 = vpop.f32.mrb[123].mxu1 }
 0x355   : > { %v4180_v42 = vadd.f32 %v4179_v45, %v4178_v40 }
 0x356   : > { %v4487_v21 = vpop.f32.mrb[124].mxu0 }
 0x357   : > { %v7214_v11 = vadd.f32 %v4487_v21, %v3986_v44  ;;  %v4181_v25 = vpop.f32.mrb[124].mxu1  ;;  %v2734_v24 = vpop.f32.mrb[125].mxu0 }
 0x358   : > { %v7216_v17 = vadd.f32 %v3983_v41, %v2734_v24  ;;  %v4182_v19 = vpop.f32.mrb[125].mxu1 }
 0x359   : > { %v4183_v12 = vadd.f32 %v4182_v19, %v4181_v25 }
 0x35a   : > { %v4490_v51 = vpop.f32.mrb[126].mxu0 }
 0x35b   : > { %v7218_v49 = vadd.f32 %v4490_v51, %v3992_v53  ;;  %v4184_v23 = vpop.f32.mrb[126].mxu1  ;;  %v2744_v46 = vpop.f32.mrb[127].mxu0 }
 0x35c   : > { %v7220_v63 = vadd.f32 %v3989_v31, %v2744_v46  ;;  %v4185_v58 = vpop.f32.mrb[127].mxu1 }
 0x35d   : > { %v4186_v18 = vadd.f32 %v4185_v58, %v4184_v23 }
 0x35f   : > { %v4057_v59 = vpop.f32.mrb[128].mxu0  ;;  %v4187_v1 = vpop.f32.mrb[128].mxu1 }
 0x360   : > { %v4058_v30 = vpop.f32.mrb[129].mxu0  ;;  %v4188_v34 = vpop.f32.mrb[129].mxu1 }
 0x361   : > { %v4059_v56 = vadd.f32 %v4058_v30, %v4057_v59  ;;  %v4189_v32 = vadd.f32 %v4188_v34, %v4187_v1 }
 0x363   : > { %v5040_v44 = vadd.f32 %v4059_v56, %v2675_v10  ;;  %v4060_v41 = vpop.f32.mrb[130].mxu0  ;;  %v4190_v7 = vpop.f32.mrb[130].mxu1 }
 0x364   : > { %v4061_v47 = vpop.f32.mrb[131].mxu0  ;;  %v4191_v57 = vpop.f32.mrb[131].mxu1 }
 0x365   : > { %v4062_v26 = vadd.f32 %v4061_v47, %v4060_v41  ;;  %v4192_v53 = vadd.f32 %v4191_v57, %v4190_v7  ;;  %v7222_v28 = vadd.f32 %v5040_v44, %v4171_v22 }
 0x367   : > { %v5036_v31 = vadd.f32 %v4062_v26, %v7192_v13  ;;  %v4063_v60 = vpop.f32.mrb[132].mxu0  ;;  %v4193_v43 = vpop.f32.mrb[132].mxu1 }
 0x368   : > { %v4064_v15 = vpop.f32.mrb[133].mxu0  ;;  %v4194_v48 = vpop.f32.mrb[133].mxu1 }
 0x369   : > { %v4065_v38 = vadd.f32 %v4064_v15, %v4063_v60  ;;  %v4195_v55 = vadd.f32 %v4194_v48, %v4193_v43  ;;  %v7225_v4 = vadd.f32 %v5036_v31, %v4174_v29 }
 0x36b   : > { %v5048_v10 = vadd.f32 %v4065_v38, %v7196_v35  ;;  %v4066_v20 = vpop.f32.mrb[134].mxu0  ;;  %v4196_v9 = vpop.f32.mrb[134].mxu1 }
 0x36c   : > { %v4067_v16 = vpop.f32.mrb[135].mxu0  ;;  %v4197_v52 = vpop.f32.mrb[135].mxu1 }
 0x36d   : > { %v4068_v6 = vadd.f32 %v4067_v16, %v4066_v20  ;;  %v7228_v0 = vadd.f32 %v4197_v52, %v4196_v9  ;;  %v7230_v22 = vadd.f32 %v5048_v10, %v4177_v37 }
 0x36f   : > { %v5044_v13 = vadd.f32 %v4068_v6, %v7194_v27  ;;  %v4069_v5 = vpop.f32.mrb[136].mxu0  ;;  %v4199_v62 = vpop.f32.mrb[136].mxu1 }
 0x370   : > { %v4070_v36 = vpop.f32.mrb[137].mxu0  ;;  %v4200_v40 = vpop.f32.mrb[137].mxu1 }
 0x371   : > { %v4071_v39 = vadd.f32 %v4070_v36, %v4069_v5  ;;  %v7233_v29 = vadd.f32 %v4200_v40, %v4199_v62  ;;  %v7235_v45 = vadd.f32 %v5044_v13, %v4180_v42  ;;  %v5250_v62 = vld [vmem:[%s5761_s6 + $0x20] sm:$0xff] }
 0x373   : > { %v5056_v35 = vadd.f32 %v4071_v39, %v7200_v54  ;;  %v4072_v21 = vpop.f32.mrb[138].mxu0  ;;  %v4202_v25 = vpop.f32.mrb[138].mxu1 }
 0x374   : > { %v4073_v24 = vpop.f32.mrb[139].mxu0  ;;  %v4203_v19 = vpop.f32.mrb[139].mxu1 }
 0x375   : > { %v4074_v51 = vadd.f32 %v4073_v24, %v4072_v21  ;;  %v7238_v37 = vadd.f32 %v4203_v19, %v4202_v25  ;;  %v7240_v23 = vadd.f32 %v5056_v35, %v4183_v12 }
 0x377   : > { %v5052_v27 = vadd.f32 %v4074_v51, %v7198_v8  ;;  %v4075_v46 = vpop.f32.mrb[140].mxu0  ;;  %v4205_v58 = vpop.f32.mrb[140].mxu1 }
 0x378   : > { %v4076_v59 = vpop.f32.mrb[141].mxu0  ;;  %v4206_v1 = vpop.f32.mrb[141].mxu1 }
 0x379   : > { %v4077_v30 = vadd.f32 %v4076_v59, %v4075_v46  ;;  %v7243_v42 = vadd.f32 %v4206_v1, %v4205_v58  ;;  %v7245_v34 = vadd.f32 %v5052_v27, %v4186_v18  ;;  %v5252_v59 = vld [vmem:[%s5761_s6 + $0x30] sm:$0xff] }
 0x37b   : > { %v5064_v54 = vadd.f32 %v4077_v30, %v7204_v33  ;;  %v4078_v56 = vpop.f32.mrb[142].mxu0  ;;  %v4208_v44 = vpop.f32.mrb[142].mxu1 }
 0x37c   : > { %v4079_v41 = vpop.f32.mrb[143].mxu0  ;;  %v4209_v7 = vpop.f32.mrb[143].mxu1 }
 0x37d   : > { %v4080_v47 = vadd.f32 %v4079_v41, %v4078_v56  ;;  %v7248_v12 = vadd.f32 %v4209_v7, %v4208_v44  ;;  %v7250_v57 = vadd.f32 %v5064_v54, %v4189_v32  ;;  %v5253_v7 = vld [vmem:[%s5761_s6 + $0x48] sm:$0xff] }
 0x37f   : > { %v5060_v8 = vadd.f32 %v4080_v47, %v7202_v3  ;;  %v4081_v26 = vpop.f32.mrb[144].mxu0  ;;  %v4211_v31 = vpop.f32.mrb[144].mxu1  ;;  %v7261_v3 = vld [vmem:[%s7426_s4] ss:$0 sm:$0xff] }
 0x380   : > { %v4082_v60 = vpop.f32.mrb[145].mxu0  ;;  %v4212_v18 = vpop.f32.mrb[145].mxu1  ;;  %v2351_v36 = vadd.f32 %v5250_v62, %v7261_v3  ;;  %v2356_v47 = vadd.f32 %v5253_v7, %v7261_v3 }
 0x381   : > { %v4083_v43 = vadd.f32 %v4082_v60, %v4081_v26  ;;  %v7253_v15 = vadd.f32 %v4212_v18, %v4211_v31  ;;  %v7255_v33 = vadd.f32 %v5060_v8, %v4192_v53  ;;  %v5249_v53 = vld [vmem:[%s5761_s6 + $0x28] sm:$0xff] }
 0x383   : > { %v5072_v48 = vadd.f32 %v4083_v43, %v7208_v2  ;;  %v4084_v38 = vpop.f32.mrb[146].mxu0  ;;  %v4214_v32 = vpop.f32.mrb[146].mxu1  ;;  %v2352_v2 = vadd.f32 %v5249_v53, %v7261_v3 }
 0x384   : > { %v4085_v10 = vpop.f32.mrb[147].mxu0  ;;  %v4215_v20 = vpop.f32.mrb[147].mxu1 }
 0x385   : > { %v4086_v9 = vadd.f32 %v4085_v10, %v4084_v38  ;;  %v7263_v16 = vadd.f32 %v4215_v20, %v4214_v32  ;;  %v7266_v52 = vadd.f32 %v5072_v48, %v4195_v55 }
 0x387   : > { %v5068_v6 = vadd.f32 %v4086_v9, %v7206_v61  ;;  %v4087_v13 = vpop.f32.mrb[148].mxu0  ;;  %v4581_v5 = vpop.f32.mrb[100].mxu1  ;;  %v5251_v61 = vld [vmem:[%s5761_s6 + $0x38] sm:$0xff] }
 0x388   : > { %v5038_v40 = vadd.f32 %v7225_v4, %v4581_v5  ;;  %v4088_v39 = vpop.f32.mrb[149].mxu0  ;;  %v3302_v35 = vpop.f32.mrb[101].mxu1  ;;  %v2354_v19 = vadd.f32 %v5251_v61, %v7261_v3  ;;  %v2353_v4 = vadd.f32 %v5252_v59, %v7261_v3  ;;  %v5255_v9 = vld [vmem:[%s5761_s6 + $0x58] sm:$0xff]  ;;  %v5256_v5 = vld [vmem:[%s5761_s6 + $0x50] sm:$0xff] }
 0x389   : > { %v4089_v55 = vadd.f32 %v4088_v39, %v4087_v13  ;;  %v5042_v21 = vadd.f32 %v7222_v28, %v3302_v35  ;;  %v7278_v25 = vadd.f32 %v5068_v6, %v7228_v0  ;;  %v2358_v53 = vadd.f32 %v5255_v9, %v7261_v3 }
 0x38a   : > { %v3398_v24 = vadd.f32 %v5038_v40, %v2352_v2  ;;  %v2357_v62 = vadd.f32 %v5256_v5, %v7261_v3 }
 0x38b   : > { %v5080_v51 = vadd.f32 %v4089_v55, %v7212_v50  ;;  %v3397_v27 = vadd.f32 %v5042_v21, %v2351_v36  ;;  %v4090_v46 = vpop.f32.mrb[150].mxu0  ;;  %v4584_v58 = vpop.f32.mrb[102].mxu1 }
 0x38c   : > { %v3414_v1 = vmax.f32 %v3398_v24, 0.0  ;;  %v5046_v30 = vadd.f32 %v7235_v45, %v4584_v58  ;;  %v4091_v28 = vpop.f32.mrb[151].mxu0  ;;  %v3312_v0 = vpop.f32.mrb[103].mxu1  ;;  %v5257_v24 = vld [vmem:[%s5761_s6 + $0x68] sm:$0xff] }
 0x38d   : > { %v3413_v54 = vmax.f32 %v3397_v27, 0.0  ;;  %v4092_v56 = vadd.f32 %v4091_v28, %v4090_v46  ;;  %v5050_v44 = vadd.f32 %v7230_v22, %v3312_v0  ;;  %v7288_v41 = vadd.f32 %v5080_v51, %v7233_v29  ;;  %v5254_v29 = vld [vmem:[%s5761_s6 + $0x40] sm:$0xff] }
 0x38e   : > { %3430 = vst [vmem:[%s7290_s5 + $0x8] sm:$0xff] %v3414_v1  ;;  %v3400_v50 = vadd.f32 %v5046_v30, %v2354_v19  ;;  %v2355_v31 = vadd.f32 %v5254_v29, %v7261_v3  ;;  %v2360_v61 = vadd.f32 %v5257_v24, %v7261_v3  ;;  %v5258_v46 = vld [vmem:[%s5761_s6 + $0x60] sm:$0xff] }
 0x38f   : > { %3429 = vst [vmem:[%s7290_s5] sm:$0xff] %v3413_v54  ;;  %v5076_v45 = vadd.f32 %v4092_v56, %v7210_v14  ;;  %v3399_v8 = vadd.f32 %v5050_v44, %v2353_v4  ;;  %v4093_v26 = vpop.f32.mrb[152].mxu0  ;;  %v4587_v22 = vpop.f32.mrb[104].mxu1  ;;  %v2359_v58 = vadd.f32 %v5258_v46, %v7261_v3  ;;  %v5259_v54 = vld [vmem:[%s5761_s6 + $0x78] sm:$0xff] }
 0x390   : > { %v3416_v60 = vmax.f32 %v3400_v50, 0.0  ;;  %v5054_v18 = vadd.f32 %v7245_v34, %v4587_v22  ;;  %v4094_v43 = vpop.f32.mrb[153].mxu0  ;;  %v3322_v48 = vpop.f32.mrb[105].mxu1  ;;  %v2362_v56 = vadd.f32 %v5259_v54, %v7261_v3 }
 0x391   : > { %v3415_v38 = vmax.f32 %v3399_v8, 0.0  ;;  %v4095_v32 = vadd.f32 %v4094_v43, %v4093_v26  ;;  %v5058_v10 = vadd.f32 %v7240_v23, %v3322_v48  ;;  %v5077_v14 = vadd.f32 %v5076_v45, %v7238_v37 }
 0x392   : > { %3432 = vst [vmem:[%s7290_s5 + $0x18] sm:$0xff] %v3416_v60  ;;  %v3402_v20 = vadd.f32 %v5054_v18, %v2356_v47  ;;  %v5260_v47 = vld [vmem:[%s5761_s6 + $0x70] sm:$0xff]  ;;  %v5261_v18 = vld [vmem:[%s5761_s6 + $0x88] sm:$0xff] }
 0x393   : > { %3431 = vst [vmem:[%s7290_s5 + $0x10] sm:$0xff] %v3415_v38  ;;  %v5088_v2 = vadd.f32 %v4095_v32, %v7216_v17  ;;  %v3401_v34 = vadd.f32 %v5058_v10, %v2355_v31  ;;  %v4096_v6 = vpop.f32.mrb[154].mxu0  ;;  %v4590_v13 = vpop.f32.mrb[106].mxu1  ;;  %v2361_v45 = vadd.f32 %v5260_v47, %v7261_v3  ;;  %v2364_v43 = vadd.f32 %v5261_v18, %v7261_v3  ;;  %v5262_v10 = vld [vmem:[%s5761_s6 + $0x80] sm:$0xff] }
 0x394   : > { %v3418_v23 = vmax.f32 %v3402_v20, 0.0  ;;  %v5062_v37 = vadd.f32 %v7255_v33, %v4590_v13  ;;  %v4097_v36 = vpop.f32.mrb[155].mxu0  ;;  %v3332_v40 = vpop.f32.mrb[107].mxu1 }
 0x395   : > { %v3417_v39 = vmax.f32 %v3401_v34, 0.0  ;;  %v4098_v35 = vadd.f32 %v4097_v36, %v4096_v6  ;;  %v5066_v55 = vadd.f32 %v7250_v57, %v3332_v40  ;;  %v5089_v17 = vadd.f32 %v5088_v2, %v7243_v42 }
 0x396   : > { %3434 = vst [vmem:[%s7290_s5 + $0x28] sm:$0xff] %v3418_v23  ;;  %v3404_v21 = vadd.f32 %v5062_v37, %v2358_v53 }
 0x397   : > { %3433 = vst [vmem:[%s7290_s5 + $0x20] sm:$0xff] %v3417_v39  ;;  %v5084_v19 = vadd.f32 %v4098_v35, %v7214_v11  ;;  %v3403_v33 = vadd.f32 %v5066_v55, %v2357_v62  ;;  %v4099_v51 = vpop.f32.mrb[156].mxu0  ;;  %v4593_v27 = vpop.f32.mrb[108].mxu1  ;;  %v5264_v62 = vld [vmem:[%s5761_s6 + $0x90] sm:$0xff] }
 0x398   : > { %v3420_v57 = vmax.f32 %v3404_v21, 0.0  ;;  %v5070_v42 = vadd.f32 %v7278_v25, %v4593_v27  ;;  %v4100_v59 = vpop.f32.mrb[157].mxu0  ;;  %v3342_v4 = vpop.f32.mrb[109].mxu1  ;;  %v2365_v23 = vadd.f32 %v5264_v62, %v7261_v3 }
 0x399   : > { %v3419_v1 = vmax.f32 %v3403_v33, 0.0  ;;  %v4101_v30 = vadd.f32 %v4100_v59, %v4099_v51  ;;  %v5074_v28 = vadd.f32 %v7266_v52, %v3342_v4  ;;  %v5085_v11 = vadd.f32 %v5084_v19, %v7248_v12 }
 0x39a   : > { %3436 = vst [vmem:[%s7290_s5 + $0x38] sm:$0xff] %v3420_v57  ;;  %v3406_v0 = vadd.f32 %v5070_v42, %v2360_v61 }
 0x39b   : > { %3435 = vst [vmem:[%s7290_s5 + $0x30] sm:$0xff] %v3419_v1  ;;  %v5096_v44 = vadd.f32 %v4101_v30, %v7220_v63  ;;  %v3405_v25 = vadd.f32 %v5074_v28, %v2359_v58  ;;  %v4102_v50 = vpop.f32.mrb[158].mxu0  ;;  %v4596_v7 = vpop.f32.mrb[110].mxu1 }
 0x39c   : > { %v3422_v52 = vmax.f32 %v3406_v0, 0.0  ;;  %v5078_v12 = vadd.f32 %v5077_v14, %v4596_v7  ;;  %v4103_v8 = vpop.f32.mrb[159].mxu0  ;;  %v3352_v26 = vpop.f32.mrb[111].mxu1  ;;  %v2363_v14 = vadd.f32 %v5262_v10, %v7261_v3 }
 0x39d   : > { %v3421_v22 = vmax.f32 %v3405_v25, 0.0  ;;  %v4104_v29 = vadd.f32 %v4103_v8, %v4102_v50  ;;  %v5082_v31 = vadd.f32 %v7288_v41, %v3352_v26  ;;  %v5097_v63 = vadd.f32 %v5096_v44, %v7253_v15 }
 0x39e   : > { %3438 = vst [vmem:[%s7290_s5 + $0x48] sm:$0xff] %v3422_v52  ;;  %v3408_v60 = vadd.f32 %v5078_v12, %v2362_v56 }
 0x39f   : > { %3437 = vst [vmem:[%s7290_s5 + $0x40] sm:$0xff] %v3421_v22  ;;  %v5092_v48 = vadd.f32 %v4104_v29, %v7218_v49  ;;  %v3407_v38 = vadd.f32 %v5082_v31, %v2361_v45  ;;  %v4599_v32 = vpop.f32.mrb[112].mxu1  ;;  %v5263_v49 = vld [vmem:[%s5761_s6 + $0x98] sm:$0xff]  ;;  %s7620_s6 = smov %s7619_s26 }
 0x3a0   : > { %v3424_v15 = vmax.f32 %v3408_v60, 0.0  ;;  %v5086_v41 = vadd.f32 %v5085_v11, %v4599_v32  ;;  %v3362_v20 = vpop.f32.mrb[113].mxu1  ;;  %v2366_v6 = vadd.f32 %v5263_v49, %v7261_v3 }
 0x3a1   : > { %v3423_v9 = vmax.f32 %v3407_v38, 0.0  ;;  %v5090_v53 = vadd.f32 %v5089_v17, %v3362_v20  ;;  %v5093_v2 = vadd.f32 %v5092_v48, %v7263_v16 }
 0x3a2   : > { %3440 = vst [vmem:[%s7290_s5 + $0x58] sm:$0xff] %v3424_v15  ;;  %v3410_v34 = vadd.f32 %v5086_v41, %v2364_v43 }
 0x3a3   : > { %3439 = vst [vmem:[%s7290_s5 + $0x50] sm:$0xff] %v3423_v9  ;;  %v3409_v13 = vadd.f32 %v5090_v53, %v2363_v14  ;;  %v4602_v5 = vpop.f32.mrb[114].mxu1 }
 0x3a4   : > { %v3426_v37 = vmax.f32 %v3410_v34, 0.0  ;;  %v5094_v36 = vadd.f32 %v5093_v2, %v4602_v5  ;;  %v3372_v16 = vpop.f32.mrb[115].mxu1 }
 0x3a5   : > { %v3425_v40 = vmax.f32 %v3409_v13, 0.0  ;;  %v5098_v39 = vadd.f32 %v5097_v63, %v3372_v16 }
 0x3a6   : > { %3442 = vst [vmem:[%s7290_s5 + $0x68] sm:$0xff] %v3426_v37  ;;  %v3412_v35 = vadd.f32 %v5094_v36, %v2366_v6 }
 0x3a7   : > { %3441 = vst [vmem:[%s7290_s5 + $0x60] sm:$0xff] %v3425_v40  ;;  %v3411_v55 = vadd.f32 %v5098_v39, %v2365_v23 }
 0x3a8   : > { %v3428_v17 = vmax.f32 %v3412_v35, 0.0 }
 0x3a9   : > { %v3427_v3 = vmax.f32 %v3411_v55, 0.0 }
 0x3aa   : > { %3444 = vst [vmem:[%s7290_s5 + $0x78] sm:$0xff] %v3428_v17 }
 0x3ab   : > { %3443 = vst [vmem:[%s7290_s5 + $0x70] sm:$0xff] %v3427_v3 }
 0x3ac   : > { %5364 = shalt.err (!%p5361_p5)
}
 0x3ad   : > { %s5365_s12 = scalar_lea.hbm %s7353_s8, 2048  ;;  %s5369_s17 = scalar_lea.hbm %s7620_s6, 8192 }
 0x3ae   : > { %p5366_p8 = scmp.ne.s32.totalorder %s7353_s8, %s5365_s12  ;;  %p5370_p6 = scmp.lt.u32.totalorder %s7353_s8, %s7620_s6 }
 0x3af   : > { %p5371_p10 = scmp.lt.u32.totalorder %s5369_s17, %s5365_s12  ;;  %p5373_p4 = scmp.lt.u32.totalorder %s5365_s12, %s7353_s8 }
 0x3b0   : > { %p5367_p12 = pnand %p5366_p8, %p7621_p3 }
 0x3b1   : > { %p5372_p1 = por %p5371_p10, %p5370_p6 }
 0x3b2   : > { %p5368_p2 = pneg %p5367_p12 }
 0x3b3   : > { %p5374_p7 = por %p5373_p4, %p5372_p1 }
 0x3b5   : > { %p5375_p13 = pnand %p5374_p7, %p5368_p2 }
 0x3b7   : > { %5378 = shalt.err (!%p5375_p13)
}
 0x3b8   : > { %s5486_s25 = smov 128   ;;  %s5487_s10 = smov 8  }
 0x3b9   : > { %5128 = dma.vmem_to_hbm [thread:$0]  (%p7621_p3), %s7355_s7, 2048, %s7353_s8, %s7361_s11, %s5486_s25, %s5486_s25, %s5487_s10  }
 0x3ba PF: > { %s7622_s30 = sld [smem:[#allocation13_spill]]  ;;  %s7623_s26 = sld [smem:[#allocation16_spill]] }
 0x3bb   : > { %p5150_p9 = scmp.ge.s32.totalorder %s5477_s28, 2 }
 0x3c0   : > { %s3477_s18 = sand.u32 1, %s7622_s30   ;;  %p7624_p11 = scmp.ne.s32.totalorder %s7623_s26, 0 }
 0x3c1   : > { %s3478_s13 = scalar_lea.sflag [#allocation5], %s3477_s18 }
 0x3c2   : > { %p5142_p0 = pnand %p5150_p9, %p7624_p11 }
 0x3c4   : > { %5432 = dma.done.wait (!%p5142_p0), %s3478_s13, 2048  }
 0x3c5   : > { %5434 = vsyncadd (!%p5142_p0), %s3478_s13, 4294965248  ;;  %s22_s28 = sadd.s32 1, %s5477_s28   ;;  %s7625_s24 = smov %s5694_s21 }
 0x3c6   : > { %p19_p5 = scmp.ge.s32.totalorder %s22_s28, 6   ;;  %s7626_s7 = sld [smem:[#allocation14_spill]] }
 0x3c7   : > { %s7627_s26 = sld [smem:[#allocation17_spill]]  ;;  %s7628_s18 = smov %s5441_s19 }
 0x3c8   : > { %s7629_s19 = smov %s5445_s20  ;;  %s7630_s20 = smov %s5699_s3 }
 0x3c9   : > { %s7631_s21 = smov %s5453_s22  ;;  %s7632_s22 = smov %s5457_s23 }
 0x3ca   : > { %s7633_s23 = smov %s7625_s24  ;;  %s7635_s25 = smov %s5473_s27 }
 0x3cb   : > { %s7636_s27 = smov %s7642_s14  ;;  %21 = sbr.rel (!%p19_p5) target bundleno = 14 (0xe), region = 96 }
 0x3cc   : > { %s7634_s24 = smov %s7626_s7 }
 0x3d2   :  { %3483 = vsyncpa [#allocation4], 1 }
 0x3d3   :  { %3485 = vsyncpa [#allocation4 + $0x1], 1 }
 0x3d4   :  { %3486 = vsyncpa [#allocation7], 1 }
 0x3d5   :  { %3487 = vsyncpa [#allocation5], 1 }
 0x3d6   :  { %3489 = vsyncpa [#allocation5 + $0x1], 1 }

</bundles_post_ra>
